<compile_context>
chip_gen: v6e
topology: v6e:2x2x1
jax: 0.10.0
libtpu: 0.0.40
codegen_flags: <defaults>
</compile_context>

<pallas_src>
import functools

import jax
import jax.numpy as jnp
from jax.experimental import pallas as pl
from jax.experimental.pallas import tpu as pltpu


TILE_M = 512  # rows per grid step; multiple of 8, VMEM-safe on v5e/v6e/v7x


# ---------------------------------------------------------------------------
# Pallas kernel: fused (bf16 x bf16 -> f32) matmul + bias (+ optional ReLU)
# ---------------------------------------------------------------------------
def _matmul_bias_kernel(apply_relu, x_ref, w_ref, b_ref, o_ref):
    acc = jnp.dot(x_ref[...], w_ref[...], preferred_element_type=jnp.float32)
    acc = acc + b_ref[...]          # (tm, N) + (1, N), f32
    if apply_relu:
        acc = jnp.maximum(acc, 0.0)
    o_ref[...] = acc.astype(o_ref.dtype)


def matmul_bias(x, w, b, *, relu, out_dtype, tile_m=TILE_M):
    """y = relu?(x @ w + b).  x:(M,K), w:(K,N) bf16 operands, b:(N,) f32."""
    M, K = x.shape
    K2, N = w.shape
    assert K == K2, (K, K2)
    x = x.astype(jnp.bfloat16)
    w = w.astype(jnp.bfloat16)
    b2 = b.astype(jnp.float32).reshape(1, N)

    if M > tile_m:
        tm = tile_m                          # multiple of 8; ragged tail masked
        grid_m = int(pl.cdiv(M, tm))
    else:
        tm = M                               # full-array block (any M allowed)
        grid_m = 1

    kernel = functools.partial(_matmul_bias_kernel, relu)
    return pl.pallas_call(
        kernel,
        out_shape=jax.ShapeDtypeStruct((M, N), out_dtype),
        grid=(grid_m,),
        in_specs=[
            pl.BlockSpec((tm, K), lambda i: (i, 0)),   # rows tiled over grid
            pl.BlockSpec((K, N), lambda i: (0, 0)),    # weight VMEM-resident
            pl.BlockSpec((1, N), lambda i: (0, 0)),    # bias VMEM-resident
        ],
        out_specs=pl.BlockSpec((tm, N), lambda i: (i, 0)),
        compiler_params=pltpu.CompilerParams(
            dimension_semantics=("parallel",)),        # v7x: shard across TCs
    )(x, w, b2)


# ---------------------------------------------------------------------------
# Plain-JAX glue: NHWC im2col (static strided slices + concat, no transposes)
# ---------------------------------------------------------------------------
def im2col_nhwc(x, kh, kw, stride, pad):
    """x: (N, H, W, C) -> patches (N*oh*ow, kh*kw*C); K index = (i*kw+j)*C + c."""
    if pad:
        x = jnp.pad(x, ((0, 0), (pad, pad), (pad, pad), (0, 0)))
    n, h, w, c = x.shape
    oh = (h - kh) // stride + 1
    ow = (w - kw) // stride + 1
    cols = []
    for i in range(kh):
        for j in range(kw):
            cols.append(
                x[:, i:i + stride * oh:stride, j:j + stride * ow:stride, :])
    p = jnp.concatenate(cols, axis=-1).reshape(n * oh * ow, kh * kw * c)
    return p, oh, ow


def conv2d_relu(x, w_mm, b, *, kh, kw, stride, pad):
    """NHWC conv + ReLU.  w_mm is matmul-ready: (kh*kw*in_c, out_c)."""
    n = x.shape[0]
    out_c = w_mm.shape[1]
    patches, oh, ow = im2col_nhwc(x, kh, kw, stride, pad)   # (N*oh*ow, K) bf16
    y = matmul_bias(patches, w_mm, b, relu=True, out_dtype=jnp.bfloat16)
    return y.reshape(n, oh, ow, out_c)       # already NHWC -- no transpose


# ---------------------------------------------------------------------------
# Deterministic parameter init (PyTorch-default-style uniform bounds), stored
# matmul-ready: conv W -> (kh*kw*in_c, out_c) bf16; fc W permuted to the NHWC
# flatten order and pre-transposed to (512, n_class) bf16.
# ---------------------------------------------------------------------------
def init_params(key, n_class):
    ks = jax.random.split(key, 8)

    def conv_init(kw_, kb_, out_c, in_c, kh, kw):
        fan_in = in_c * kh * kw
        bound = 1.0 / (fan_in ** 0.5)
        w = jax.random.uniform(kw_, (out_c, in_c, kh, kw), jnp.float32,
                               -bound, bound)
        b = jax.random.uniform(kb_, (out_c,), jnp.float32, -bound, bound)
        # (out_c, in_c, kh, kw) -> (kh, kw, in_c, out_c) -> (kh*kw*in_c, out_c)
        # matching the im2col K ordering (i*kw + j)*in_c + c.
        w_mm = w.transpose(2, 3, 1, 0).reshape(kh * kw * in_c, out_c)
        return w_mm.astype(jnp.bfloat16), b

    w1, b1 = conv_init(ks[0], ks[1], 64, 3, 8, 8)
    w2, b2 = conv_init(ks[2], ks[3], 128, 64, 6, 6)
    w3, b3 = conv_init(ks[4], ks[5], 128, 128, 5, 5)

    bound = 1.0 / (512.0 ** 0.5)
    wf = jax.random.uniform(ks[6], (n_class, 512), jnp.float32, -bound, bound)
    bf = jax.random.uniform(ks[7], (n_class,), jnp.float32, -bound, bound)
    # PyTorch's fc consumes the NCHW flatten (index c*4 + h*2 + w); our conv3
    # output is NHWC-flattened (index (h*2 + w)*128 + c).  Permute + pre-
    # transpose the fc weight once here so the hot path has no transposes.
    wf_nhwc = (wf.reshape(n_class, 128, 2, 2)
                 .transpose(0, 2, 3, 1)
                 .reshape(n_class, 512))
    wf_t = wf_nhwc.T.astype(jnp.bfloat16)    # (512, n_class)
    return dict(w1=w1, b1=b1, w2=w2, b2=b2, w3=w3, b3=b3, wf=wf_t, bf=bf)


# ---------------------------------------------------------------------------
# Full LisaCNN forward (input in PyTorch NCHW, output (N, n_class) float32)
# ---------------------------------------------------------------------------
def lisa_cnn_forward(params, x):
    # x: (N, 3, 32, 32) NCHW f32.  One-time layout change to NHWC + bf16.
    x = jnp.transpose(x, (0, 2, 3, 1)).astype(jnp.bfloat16)                       # (N,32,32,3)
    x = conv2d_relu(x, params["w1"], params["b1"], kh=8, kw=8, stride=2, pad=3)   # (N,16,16,64)
    x = conv2d_relu(x, params["w2"], params["b2"], kh=6, kw=6, stride=2, pad=0)   # (N,6,6,128)
    x = conv2d_relu(x, params["w3"], params["b3"], kh=5, kw=5, stride=1, pad=0)   # (N,2,2,128)
    n = x.shape[0]
    feats = x.reshape(n, 512)                # NHWC flatten; wf was permuted to match
    return matmul_bias(feats, params["wf"], params["bf"], relu=False,
                       out_dtype=jnp.float32)                                     # (N, n_class)


if __name__ == "__main__":
    n_class = 16
    key = jax.random.PRNGKey(0)
    kp, kx = jax.random.split(key)
    params = init_params(kp, n_class)
    x = jax.random.normal(kx, (2, 3, 32, 32), dtype=jnp.float32)

    fwd = jax.jit(lisa_cnn_forward)
    out = jax.block_until_ready(fwd(params, x))
    assert out.shape == (2, n_class), out.shape
    assert out.dtype == jnp.float32
    print("KERNEL_OK")
</pallas_src>

<mosaic_0001>
module attributes {stable_mosaic.version = 11 : i64} {
  func.func @_matmul_bias_kernel(%arg0: i32, %arg1: memref<512x192xbf16, #tpu.memory_space<vmem>>, %arg2: memref<192x64xbf16, #tpu.memory_space<vmem>>, %arg3: memref<1x64xf32, #tpu.memory_space<vmem>>, %arg4: memref<512x64xbf16, #tpu.memory_space<vmem>>) attributes {dimension_semantics = [#tpu.dimension_semantics<parallel>], iteration_bounds = array<i64: 1>, scalar_prefetch = 0 : i64, scratch_operands = 0 : i64, tpu.core_type = #tpu.core_type<tc>, window_params = [{transform_indices = @transform_0, window_bounds = array<i64: 512, 192>}, {pipeline_mode = #tpu.pipeline_mode<synchronous>, transform_indices = @transform_1, window_bounds = array<i64: 192, 64>}, {pipeline_mode = #tpu.pipeline_mode<synchronous>, transform_indices = @transform_2, window_bounds = array<i64: 1, 64>}, {transform_indices = @transform_3, window_bounds = array<i64: 512, 64>}]} {
    %c0 = arith.constant 0 : index
    %c0_0 = arith.constant 0 : index
    %0 = vector.load %arg1[%c0, %c0_0] : memref<512x192xbf16, #tpu.memory_space<vmem>>, vector<512x192xbf16>
    %c0_1 = arith.constant 0 : index
    %c0_2 = arith.constant 0 : index
    %1 = vector.load %arg2[%c0_1, %c0_2] : memref<192x64xbf16, #tpu.memory_space<vmem>>, vector<192x64xbf16>
    %cst = arith.constant dense<0.000000e+00> : vector<512x64xf32>
    %2 = tpu.matmul %0, %1, %cst {dimension_numbers = #tpu.dot_dimension_numbers<[1], [0], [0], [1], [0, 0, 1, 1], [], []>} : vector<512x192xbf16>, vector<192x64xbf16>, vector<512x64xf32> -> vector<512x64xf32>
    %c0_3 = arith.constant 0 : index
    %c0_4 = arith.constant 0 : index
    %3 = vector.load %arg3[%c0_3, %c0_4] : memref<1x64xf32, #tpu.memory_space<vmem>>, vector<1x64xf32>
    %4 = vector.broadcast %3 : vector<1x64xf32> to vector<512x64xf32>
    %5 = arith.addf %2, %4 : vector<512x64xf32>
    %cst_5 = arith.constant 0.000000e+00 : f32
    %6 = vector.broadcast %cst_5 : f32 to vector<512x64xf32>
    %7 = arith.maximumf %5, %6 : vector<512x64xf32>
    %8 = arith.truncf %7 : vector<512x64xf32> to vector<512x64xbf16>
    %c0_6 = arith.constant 0 : index
    %c0_7 = arith.constant 0 : index
    %9 = vector.load %arg4[%c0_6, %c0_7] : memref<512x64xbf16, #tpu.memory_space<vmem>>, vector<512x64xbf16>
    tpu.vector_store %arg4[%c0_6, %c0_7], %8 {strides = array<i32>} : memref<512x64xbf16, #tpu.memory_space<vmem>>, vector<512x64xbf16>,
    return
  }
  func.func @transform_0(%arg0: i32) -> (i32, i32) {
    %c0_i32 = arith.constant 0 : i32
    %c0_i32_0 = arith.constant 0 : i32
    return %arg0, %c0_i32 : i32, i32
  }
  func.func @transform_1(%arg0: i32) -> (i32, i32) {
    %c0_i32 = arith.constant 0 : i32
    %c0_i32_0 = arith.constant 0 : i32
    %c0_i32_1 = arith.constant 0 : i32
    return %c0_i32, %c0_i32_0 : i32, i32
  }
  func.func @transform_2(%arg0: i32) -> (i32, i32) {
    %c0_i32 = arith.constant 0 : i32
    %c0_i32_0 = arith.constant 0 : i32
    %c0_i32_1 = arith.constant 0 : i32
    return %c0_i32, %c0_i32_0 : i32, i32
  }
  func.func @transform_3(%arg0: i32) -> (i32, i32) {
    %c0_i32 = arith.constant 0 : i32
    %c0_i32_0 = arith.constant 0 : i32
    return %arg0, %c0_i32 : i32, i32
  }
}

module attributes {stable_mosaic.version = 11 : i64} {
  func.func @_matmul_bias_kernel(%arg0: i32, %arg1: memref<72x2304xbf16, #tpu.memory_space<vmem>>, %arg2: memref<2304x128xbf16, #tpu.memory_space<vmem>>, %arg3: memref<1x128xf32, #tpu.memory_space<vmem>>, %arg4: memref<72x128xbf16, #tpu.memory_space<vmem>>) attributes {dimension_semantics = [#tpu.dimension_semantics<parallel>], iteration_bounds = array<i64: 1>, scalar_prefetch = 0 : i64, scratch_operands = 0 : i64, tpu.core_type = #tpu.core_type<tc>, window_params = [{transform_indices = @transform_0, window_bounds = array<i64: 72, 2304>}, {pipeline_mode = #tpu.pipeline_mode<synchronous>, transform_indices = @transform_1, window_bounds = array<i64: 2304, 128>}, {pipeline_mode = #tpu.pipeline_mode<synchronous>, transform_indices = @transform_2, window_bounds = array<i64: 1, 128>}, {transform_indices = @transform_3, window_bounds = array<i64: 72, 128>}]} {
    %c0 = arith.constant 0 : index
    %c0_0 = arith.constant 0 : index
    %0 = vector.load %arg1[%c0, %c0_0] : memref<72x2304xbf16, #tpu.memory_space<vmem>>, vector<72x2304xbf16>
    %c0_1 = arith.constant 0 : index
    %c0_2 = arith.constant 0 : index
    %1 = vector.load %arg2[%c0_1, %c0_2] : memref<2304x128xbf16, #tpu.memory_space<vmem>>, vector<2304x128xbf16>
    %cst = arith.constant dense<0.000000e+00> : vector<72x128xf32>
    %2 = tpu.matmul %0, %1, %cst {dimension_numbers = #tpu.dot_dimension_numbers<[1], [0], [0], [1], [0, 0, 1, 1], [], []>} : vector<72x2304xbf16>, vector<2304x128xbf16>, vector<72x128xf32> -> vector<72x128xf32>
    %c0_3 = arith.constant 0 : index
    %c0_4 = arith.constant 0 : index
    %3 = vector.load %arg3[%c0_3, %c0_4] : memref<1x128xf32, #tpu.memory_space<vmem>>, vector<1x128xf32>
    %4 = vector.broadcast %3 : vector<1x128xf32> to vector<72x128xf32>
    %5 = arith.addf %2, %4 : vector<72x128xf32>
    %cst_5 = arith.constant 0.000000e+00 : f32
    %6 = vector.broadcast %cst_5 : f32 to vector<72x128xf32>
    %7 = arith.maximumf %5, %6 : vector<72x128xf32>
    %8 = arith.truncf %7 : vector<72x128xf32> to vector<72x128xbf16>
    %c0_6 = arith.constant 0 : index
    %c0_7 = arith.constant 0 : index
    %9 = vector.load %arg4[%c0_6, %c0_7] : memref<72x128xbf16, #tpu.memory_space<vmem>>, vector<72x128xbf16>
    tpu.vector_store %arg4[%c0_6, %c0_7], %8 {strides = array<i32>} : memref<72x128xbf16, #tpu.memory_space<vmem>>, vector<72x128xbf16>,
    return
  }
  func.func @transform_0(%arg0: i32) -> (i32, i32) {
    %c0_i32 = arith.constant 0 : i32
    %c0_i32_0 = arith.constant 0 : i32
    return %arg0, %c0_i32 : i32, i32
  }
  func.func @transform_1(%arg0: i32) -> (i32, i32) {
    %c0_i32 = arith.constant 0 : i32
    %c0_i32_0 = arith.constant 0 : i32
    %c0_i32_1 = arith.constant 0 : i32
    return %c0_i32, %c0_i32_0 : i32, i32
  }
  func.func @transform_2(%arg0: i32) -> (i32, i32) {
    %c0_i32 = arith.constant 0 : i32
    %c0_i32_0 = arith.constant 0 : i32
    %c0_i32_1 = arith.constant 0 : i32
    return %c0_i32, %c0_i32_0 : i32, i32
  }
  func.func @transform_3(%arg0: i32) -> (i32, i32) {
    %c0_i32 = arith.constant 0 : i32
    %c0_i32_0 = arith.constant 0 : i32
    return %arg0, %c0_i32 : i32, i32
  }
}

module attributes {stable_mosaic.version = 11 : i64} {
  func.func @_matmul_bias_kernel(%arg0: i32, %arg1: memref<8x3200xbf16, #tpu.memory_space<vmem>>, %arg2: memref<3200x128xbf16, #tpu.memory_space<vmem>>, %arg3: memref<1x128xf32, #tpu.memory_space<vmem>>, %arg4: memref<8x128xbf16, #tpu.memory_space<vmem>>) attributes {dimension_semantics = [#tpu.dimension_semantics<parallel>], iteration_bounds = array<i64: 1>, scalar_prefetch = 0 : i64, scratch_operands = 0 : i64, tpu.core_type = #tpu.core_type<tc>, window_params = [{transform_indices = @transform_0, window_bounds = array<i64: 8, 3200>}, {pipeline_mode = #tpu.pipeline_mode<synchronous>, transform_indices = @transform_1, window_bounds = array<i64: 3200, 128>}, {pipeline_mode = #tpu.pipeline_mode<synchronous>, transform_indices = @transform_2, window_bounds = array<i64: 1, 128>}, {transform_indices = @transform_3, window_bounds = array<i64: 8, 128>}]} {
    %c0 = arith.constant 0 : index
    %c0_0 = arith.constant 0 : index
    %0 = vector.load %arg1[%c0, %c0_0] : memref<8x3200xbf16, #tpu.memory_space<vmem>>, vector<8x3200xbf16>
    %c0_1 = arith.constant 0 : index
    %c0_2 = arith.constant 0 : index
    %1 = vector.load %arg2[%c0_1, %c0_2] : memref<3200x128xbf16, #tpu.memory_space<vmem>>, vector<3200x128xbf16>
    %cst = arith.constant dense<0.000000e+00> : vector<8x128xf32>
    %2 = tpu.matmul %0, %1, %cst {dimension_numbers = #tpu.dot_dimension_numbers<[1], [0], [0], [1], [0, 0, 1, 1], [], []>} : vector<8x3200xbf16>, vector<3200x128xbf16>, vector<8x128xf32> -> vector<8x128xf32>
    %c0_3 = arith.constant 0 : index
    %c0_4 = arith.constant 0 : index
    %3 = vector.load %arg3[%c0_3, %c0_4] : memref<1x128xf32, #tpu.memory_space<vmem>>, vector<1x128xf32>
    %4 = vector.broadcast %3 : vector<1x128xf32> to vector<8x128xf32>
    %5 = arith.addf %2, %4 : vector<8x128xf32>
    %cst_5 = arith.constant 0.000000e+00 : f32
    %6 = vector.broadcast %cst_5 : f32 to vector<8x128xf32>
    %7 = arith.maximumf %5, %6 : vector<8x128xf32>
    %8 = arith.truncf %7 : vector<8x128xf32> to vector<8x128xbf16>
    %c0_6 = arith.constant 0 : index
    %c0_7 = arith.constant 0 : index
    %9 = vector.load %arg4[%c0_6, %c0_7] : memref<8x128xbf16, #tpu.memory_space<vmem>>, vector<8x128xbf16>
    tpu.vector_store %arg4[%c0_6, %c0_7], %8 {strides = array<i32>} : memref<8x128xbf16, #tpu.memory_space<vmem>>, vector<8x128xbf16>,
    return
  }
  func.func @transform_0(%arg0: i32) -> (i32, i32) {
    %c0_i32 = arith.constant 0 : i32
    %c0_i32_0 = arith.constant 0 : i32
    return %arg0, %c0_i32 : i32, i32
  }
  func.func @transform_1(%arg0: i32) -> (i32, i32) {
    %c0_i32 = arith.constant 0 : i32
    %c0_i32_0 = arith.constant 0 : i32
    %c0_i32_1 = arith.constant 0 : i32
    return %c0_i32, %c0_i32_0 : i32, i32
  }
  func.func @transform_2(%arg0: i32) -> (i32, i32) {
    %c0_i32 = arith.constant 0 : i32
    %c0_i32_0 = arith.constant 0 : i32
    %c0_i32_1 = arith.constant 0 : i32
    return %c0_i32, %c0_i32_0 : i32, i32
  }
  func.func @transform_3(%arg0: i32) -> (i32, i32) {
    %c0_i32 = arith.constant 0 : i32
    %c0_i32_0 = arith.constant 0 : i32
    return %arg0, %c0_i32 : i32, i32
  }
}

module attributes {stable_mosaic.version = 11 : i64} {
  func.func @_matmul_bias_kernel(%arg0: i32, %arg1: memref<2x512xbf16, #tpu.memory_space<vmem>>, %arg2: memref<512x16xbf16, #tpu.memory_space<vmem>>, %arg3: memref<1x16xf32, #tpu.memory_space<vmem>>, %arg4: memref<2x16xf32, #tpu.memory_space<vmem>>) attributes {dimension_semantics = [#tpu.dimension_semantics<parallel>], iteration_bounds = array<i64: 1>, scalar_prefetch = 0 : i64, scratch_operands = 0 : i64, tpu.core_type = #tpu.core_type<tc>, window_params = [{transform_indices = @transform_0, window_bounds = array<i64: 2, 512>}, {pipeline_mode = #tpu.pipeline_mode<synchronous>, transform_indices = @transform_1, window_bounds = array<i64: 512, 16>}, {pipeline_mode = #tpu.pipeline_mode<synchronous>, transform_indices = @transform_2, window_bounds = array<i64: 1, 16>}, {transform_indices = @transform_3, window_bounds = array<i64: 2, 16>}]} {
    %c0 = arith.constant 0 : index
    %c0_0 = arith.constant 0 : index
    %0 = vector.load %arg1[%c0, %c0_0] : memref<2x512xbf16, #tpu.memory_space<vmem>>, vector<2x512xbf16>
    %c0_1 = arith.constant 0 : index
    %c0_2 = arith.constant 0 : index
    %1 = vector.load %arg2[%c0_1, %c0_2] : memref<512x16xbf16, #tpu.memory_space<vmem>>, vector<512x16xbf16>
    %cst = arith.constant dense<0.000000e+00> : vector<2x16xf32>
    %2 = tpu.matmul %0, %1, %cst {dimension_numbers = #tpu.dot_dimension_numbers<[1], [0], [0], [1], [0, 0, 1, 1], [], []>} : vector<2x512xbf16>, vector<512x16xbf16>, vector<2x16xf32> -> vector<2x16xf32>
    %c0_3 = arith.constant 0 : index
    %c0_4 = arith.constant 0 : index
    %3 = vector.load %arg3[%c0_3, %c0_4] : memref<1x16xf32, #tpu.memory_space<vmem>>, vector<1x16xf32>
    %4 = vector.broadcast %3 : vector<1x16xf32> to vector<2x16xf32>
    %5 = arith.addf %2, %4 : vector<2x16xf32>
    %c0_5 = arith.constant 0 : index
    %c0_6 = arith.constant 0 : index
    %6 = vector.load %arg4[%c0_5, %c0_6] : memref<2x16xf32, #tpu.memory_space<vmem>>, vector<2x16xf32>
    tpu.vector_store %arg4[%c0_5, %c0_6], %5 {strides = array<i32>} : memref<2x16xf32, #tpu.memory_space<vmem>>, vector<2x16xf32>,
    return
  }
  func.func @transform_0(%arg0: i32) -> (i32, i32) {
    %c0_i32 = arith.constant 0 : i32
    %c0_i32_0 = arith.constant 0 : i32
    return %arg0, %c0_i32 : i32, i32
  }
  func.func @transform_1(%arg0: i32) -> (i32, i32) {
    %c0_i32 = arith.constant 0 : i32
    %c0_i32_0 = arith.constant 0 : i32
    %c0_i32_1 = arith.constant 0 : i32
    return %c0_i32, %c0_i32_0 : i32, i32
  }
  func.func @transform_2(%arg0: i32) -> (i32, i32) {
    %c0_i32 = arith.constant 0 : i32
    %c0_i32_0 = arith.constant 0 : i32
    %c0_i32_1 = arith.constant 0 : i32
    return %c0_i32, %c0_i32_0 : i32, i32
  }
  func.func @transform_3(%arg0: i32) -> (i32, i32) {
    %c0_i32 = arith.constant 0 : i32
    %c0_i32_0 = arith.constant 0 : i32
    return %arg0, %c0_i32 : i32, i32
  }
}

</mosaic_0001>

<bundles_post_ra>
// kernel: lisa_cnn_forward.4
= control target key start
LH: loop header
LB: loop body
LE: loop exit
PB: predicated region body
PF: predicated region fallthrough
CT: control target
= control target key end

     0   :  { %v1615_v0 = vmov 0   ;;  %vm470_vm0 = vcmask 523264   ;;  %vm1176_vm1 = vcmask 519168   ;;  %s2245_s1 = inlined_call_operand.vmem [shape: bf16[192,64], index: 1, kind: input, shape index: {}]   ;;  %s2246_s0 = inlined_call_operand.vmem [shape: bf16[512,192], index: 0, kind: input, shape index: {}]   ;;  %s2247_s2 = inlined_call_operand.vmem [shape: f32[1,64], index: 2, kind: input, shape index: {}]   ;;  %s2248_s3 = inlined_call_operand.vmem [shape: bf16[512,64], index: 3, kind: output, shape index: {}]  }
   0x1   :  { %567 = vmatprep.subr.bf16.mxu0 %v1615_v0  ;;  %1482 = vmatprep.subr.bf16.mxu1 %v1615_v0  ;;  %v1507_v1 = vld [vmem:[%s2245_s1 + $0x38] sm:$0xff]   ;;  %v1508_v2 = vld [vmem:[%s2245_s1 + $0x30] sm:$0xff]   ;;  %v1509_v3 = vld [vmem:[%s2245_s1 + $0x28] sm:$0xff]  }
   0x2   :  { %568 = vmatpush1.bf16.msra.mxu0 %v1507_v1  ;;  %1494 = vmatpush1.bf16.msra.mxu1 %v1507_v1  ;;  %v1510_v4 = vld [vmem:[%s2245_s1 + $0x20] sm:$0xff]   ;;  %v1511_v6 = vld [vmem:[%s2245_s1 + $0x18] sm:$0xff]   ;;  %v1512_v8 = vld [vmem:[%s2245_s1 + $0x10] sm:$0xff]  }
   0x3   :  { %569 = vmatprep.subr.bf16.mxu0 %v1615_v0  ;;  %1483 = vmatprep.subr.bf16.mxu1 %v1615_v0  ;;  %v1521_v5 = vld [vmem:[%s2246_s0 + $0x4] ss:$8 sps:$4 sm:$0xff]   ;;  %v1515_v11 = vld [vmem:[%s2245_s1 + $0x58] sm:$0xff]   ;;  %v1516_v12 = vld [vmem:[%s2245_s1 + $0x50] sm:$0xff]  }
   0x4   :  { %v1524_v7 = vld [vmem:[%s2246_s0 + $0x104] ss:$8 sps:$4 sm:$0xff]   ;;  %1322 = vmatprep.mubr.msk.bf16.mxu0 %vm470_vm0, %v1521_v5  ;;  %v1519_v15 = vld [vmem:[%s2246_s0] ss:$8 sps:$4 sm:$0xff]   ;;  %v1525_v17 = vld [vmem:[%s2246_s0 + $0x14] ss:$8 sps:$4 sm:$0xff]  }
   0x5   :  { %1338 = vmatprep.mubr.msk.bf16.mxu1 %vm470_vm0, %v1524_v7  ;;  %v1513_v9 = vld [vmem:[%s2245_s1 + $0x8] sm:$0xff]   ;;  %v1514_v10 = vld [vmem:[%s2245_s1] sm:$0xff]   ;;  %v1527_v18 = vld [vmem:[%s2246_s0 + $0x114] ss:$8 sps:$4 sm:$0xff]  }
   0x6   :  { %570 = vmatpush1.bf16.msra.mxu0 %v1508_v2  ;;  %1495 = vmatpush1.bf16.msra.mxu1 %v1508_v2  ;;  %v1517_v13 = vld [vmem:[%s2245_s1 + $0x48] sm:$0xff]   ;;  %v1518_v14 = vld [vmem:[%s2245_s1 + $0x40] sm:$0xff]   ;;  %v1529_v19 = vld [vmem:[%s2246_s0 + $0x10] ss:$8 sps:$4 sm:$0xff]  }
   0x7   :  { %571 = vmatprep.subr.bf16.mxu0 %v1615_v0  ;;  %1484 = vmatprep.subr.bf16.mxu1 %v1615_v0  ;;  %v1522_v16 = vld [vmem:[%s2246_s0 + $0x100] ss:$8 sps:$4 sm:$0xff]   ;;  %v1530_v20 = vld [vmem:[%s2246_s0 + $0x110] ss:$8 sps:$4 sm:$0xff]   ;;  %v1531_v21 = vld [vmem:[%s2246_s0 + $0x24] ss:$8 sps:$4 sm:$0xff]  }
   0x8   :  { %v1533_v22 = vld [vmem:[%s2246_s0 + $0x124] ss:$8 sps:$4 sm:$0xff]   ;;  %v1535_v23 = vld [vmem:[%s2246_s0 + $0x20] ss:$8 sps:$4 sm:$0xff]   ;;  %v1537_v25 = vld [vmem:[%s2246_s0 + $0x34] ss:$8 sps:$4 sm:$0xff]  }
   0x9   :  { %v1536_v24 = vld [vmem:[%s2246_s0 + $0x120] ss:$8 sps:$4 sm:$0xff]   ;;  %v1539_v26 = vld [vmem:[%s2246_s0 + $0x134] ss:$8 sps:$4 sm:$0xff]   ;;  %v1541_v27 = vld [vmem:[%s2246_s0 + $0x30] ss:$8 sps:$4 sm:$0xff]  }
   0xa   :  { %572 = vmatpush1.bf16.msra.mxu0 %v1509_v3  ;;  %1496 = vmatpush1.bf16.msra.mxu1 %v1509_v3  ;;  %v1542_v28 = vld [vmem:[%s2246_s0 + $0x130] ss:$8 sps:$4 sm:$0xff]   ;;  %v1543_v29 = vld [vmem:[%s2246_s0 + $0x44] ss:$8 sps:$4 sm:$0xff]   ;;  %v1547_v31 = vld [vmem:[%s2246_s0 + $0x40] ss:$8 sps:$4 sm:$0xff]  }
   0xb   :  { %573 = vmatprep.subr.bf16.mxu0 %v1615_v0  ;;  %1485 = vmatprep.subr.bf16.mxu1 %v1615_v0  ;;  %v1545_v30 = vld [vmem:[%s2246_s0 + $0x144] ss:$8 sps:$4 sm:$0xff]   ;;  %v1548_v32 = vld [vmem:[%s2246_s0 + $0x140] ss:$8 sps:$4 sm:$0xff]   ;;  %v1549_v33 = vld [vmem:[%s2246_s0 + $0x54] ss:$8 sps:$4 sm:$0xff]  }
   0xc   :  { %v1551_v34 = vld [vmem:[%s2246_s0 + $0x154] ss:$8 sps:$4 sm:$0xff]   ;;  %v1553_v35 = vld [vmem:[%s2246_s0 + $0x50] ss:$8 sps:$4 sm:$0xff]   ;;  %v1555_v37 = vld [vmem:[%s2246_s0 + $0x64] ss:$8 sps:$4 sm:$0xff]  }
   0xd   :  { %v1554_v36 = vld [vmem:[%s2246_s0 + $0x150] ss:$8 sps:$4 sm:$0xff]   ;;  %v1557_v38 = vld [vmem:[%s2246_s0 + $0x164] ss:$8 sps:$4 sm:$0xff]   ;;  %v1559_v39 = vld [vmem:[%s2246_s0 + $0x60] ss:$8 sps:$4 sm:$0xff]  }
   0xe   :  { %574 = vmatpush1.bf16.msra.mxu0 %v1510_v4  ;;  %1497 = vmatpush1.bf16.msra.mxu1 %v1510_v4  ;;  %v1560_v40 = vld [vmem:[%s2246_s0 + $0x160] ss:$8 sps:$4 sm:$0xff]   ;;  %v1561_v41 = vld [vmem:[%s2246_s0 + $0x74] ss:$8 sps:$4 sm:$0xff]   ;;  %v1565_v43 = vld [vmem:[%s2246_s0 + $0x70] ss:$8 sps:$4 sm:$0xff]  }
   0xf   :  { %575 = vmatprep.subr.bf16.mxu0 %v1615_v0  ;;  %1486 = vmatprep.subr.bf16.mxu1 %v1615_v0  ;;  %v1563_v42 = vld [vmem:[%s2246_s0 + $0x174] ss:$8 sps:$4 sm:$0xff]   ;;  %v1566_v44 = vld [vmem:[%s2246_s0 + $0x170] ss:$8 sps:$4 sm:$0xff]   ;;  %v1567_v45 = vld [vmem:[%s2246_s0 + $0x84] ss:$8 sps:$4 sm:$0xff]  }
  0x10   :  { %v1569_v46 = vld [vmem:[%s2246_s0 + $0x184] ss:$8 sps:$4 sm:$0xff]   ;;  %v1571_v47 = vld [vmem:[%s2246_s0 + $0x80] ss:$8 sps:$4 sm:$0xff]   ;;  %v1573_v49 = vld [vmem:[%s2246_s0 + $0x94] ss:$8 sps:$4 sm:$0xff]  }
  0x11   :  { %v1572_v48 = vld [vmem:[%s2246_s0 + $0x180] ss:$8 sps:$4 sm:$0xff]   ;;  %v1575_v50 = vld [vmem:[%s2246_s0 + $0x194] ss:$8 sps:$4 sm:$0xff]   ;;  %v1577_v51 = vld [vmem:[%s2246_s0 + $0x90] ss:$8 sps:$4 sm:$0xff]  }
  0x12   :  { %576 = vmatpush1.bf16.msra.mxu0 %v1511_v6  ;;  %1498 = vmatpush1.bf16.msra.mxu1 %v1511_v6  ;;  %v1578_v52 = vld [vmem:[%s2246_s0 + $0x190] ss:$8 sps:$4 sm:$0xff]   ;;  %v1579_v53 = vld [vmem:[%s2246_s0 + $0xa4] ss:$8 sps:$4 sm:$0xff]   ;;  %v1583_v55 = vld [vmem:[%s2246_s0 + $0xa0] ss:$8 sps:$4 sm:$0xff]  }
  0x13   :  { %577 = vmatprep.subr.bf16.mxu0 %v1615_v0  ;;  %1487 = vmatprep.subr.bf16.mxu1 %v1615_v0  ;;  %v1581_v54 = vld [vmem:[%s2246_s0 + $0x1a4] ss:$8 sps:$4 sm:$0xff]   ;;  %v1584_v56 = vld [vmem:[%s2246_s0 + $0x1a0] ss:$8 sps:$4 sm:$0xff]   ;;  %v1585_v57 = vld [vmem:[%s2246_s0 + $0xb4] ss:$8 sps:$4 sm:$0xff]  }
  0x14   :  { %v1587_v58 = vld [vmem:[%s2246_s0 + $0x1b4] ss:$8 sps:$4 sm:$0xff]   ;;  %v1589_v59 = vld [vmem:[%s2246_s0 + $0xb0] ss:$8 sps:$4 sm:$0xff]   ;;  %v1591_v61 = vld [vmem:[%s2246_s0 + $0xc4] ss:$8 sps:$4 sm:$0xff]  }
  0x15   :  { %v1590_v60 = vld [vmem:[%s2246_s0 + $0x1b0] ss:$8 sps:$4 sm:$0xff]   ;;  %v1593_v62 = vld [vmem:[%s2246_s0 + $0x1c4] ss:$8 sps:$4 sm:$0xff]   ;;  %v1595_v63 = vld [vmem:[%s2246_s0 + $0xc0] ss:$8 sps:$4 sm:$0xff]  }
  0x16   :  { %578 = vmatpush1.bf16.msra.mxu0 %v1512_v8  ;;  %1499 = vmatpush1.bf16.msra.mxu1 %v1512_v8  ;;  %v1597_v1 = vld [vmem:[%s2246_s0 + $0xd4] ss:$8 sps:$4 sm:$0xff]   ;;  %v1601_v3 = vld [vmem:[%s2246_s0 + $0xd0] ss:$8 sps:$4 sm:$0xff]   ;;  %v1603_v5 = vld [vmem:[%s2246_s0 + $0xe4] ss:$8 sps:$4 sm:$0xff]  }
  0x17   :  { %579 = vmatprep.subr.bf16.mxu0 %v1615_v0  ;;  %1488 = vmatprep.subr.bf16.mxu1 %v1615_v0  ;;  %v1599_v2 = vld [vmem:[%s2246_s0 + $0x1d4] ss:$8 sps:$4 sm:$0xff]   ;;  %v1602_v4 = vld [vmem:[%s2246_s0 + $0x1d0] ss:$8 sps:$4 sm:$0xff]   ;;  %v1605_v6 = vld [vmem:[%s2246_s0 + $0x1e4] ss:$8 sps:$4 sm:$0xff]  }
  0x18   :  { %v1607_v7 = vld [vmem:[%s2246_s0 + $0xe0] ss:$8 sps:$4 sm:$0xff]  }
  0x19   :  { %v1608_v8 = vld [vmem:[%s2246_s0 + $0x1e0] ss:$8 sps:$4 sm:$0xff]  }
  0x1a   :  { %580 = vmatpush1.bf16.msra.mxu0 %v1513_v9  ;;  %1500 = vmatpush1.bf16.msra.mxu1 %v1513_v9  ;;  %v1609_v9 = vld [vmem:[%s2246_s0 + $0xf4] ss:$8 sps:$4 sm:$0xff]  }
  0x1b   :  { %581 = vmatprep.subr.bf16.mxu0 %v1615_v0  ;;  %1489 = vmatprep.subr.bf16.mxu1 %v1615_v0 }
  0x1e   :  { %582 = vmatpush1.bf16.msra.mxu0 %v1514_v10  ;;  %1501 = vmatpush1.bf16.msra.mxu1 %v1514_v10  ;;  %v1611_v10 = vld [vmem:[%s2246_s0 + $0x1f4] ss:$8 sps:$4 sm:$0xff]  }
  0x1f   :  { %591 = vmatprep.subr.bf16.mxu0 %v1615_v0  ;;  %1490 = vmatprep.subr.bf16.mxu1 %v1615_v0 }
  0x22   :  { %592 = vmatpush2.bf16.msra.mxu0 %v1515_v11  ;;  %1502 = vmatpush2.bf16.msra.mxu1 %v1515_v11  ;;  %v1613_v11 = vld [vmem:[%s2246_s0 + $0xf0] ss:$8 sps:$4 sm:$0xff]  }
  0x23   :  { %593 = vmatprep.subr.bf16.mxu0 %v1615_v0  ;;  %1491 = vmatprep.subr.bf16.mxu1 %v1615_v0 }
  0x26   :  { %594 = vmatpush2.bf16.msra.mxu0 %v1516_v12  ;;  %1503 = vmatpush2.bf16.msra.mxu1 %v1516_v12  ;;  %v1614_v12 = vld [vmem:[%s2246_s0 + $0x1f0] ss:$8 sps:$4 sm:$0xff]  }
  0x27   :  { %595 = vmatprep.subr.bf16.mxu0 %v1615_v0  ;;  %1492 = vmatprep.subr.bf16.mxu1 %v1615_v0 }
  0x2a   :  { %596 = vmatpush2.bf16.msra.mxu0 %v1517_v13  ;;  %1504 = vmatpush2.bf16.msra.mxu1 %v1517_v13  ;;  %v1923_v13 = vld [vmem:[%s2247_s2] ss:$0 sm:$0xff] }
  0x2b   :  { %597 = vmatprep.subr.bf16.mxu0 %v1615_v0  ;;  %1493 = vmatprep.subr.bf16.mxu1 %v1615_v0  ;;  %v1596_v0 = vld [vmem:[%s2246_s0 + $0x1c0] ss:$8 sps:$4 sm:$0xff]  }
  0x2e   :  { %598 = vmatpush2.bf16.msra.mxu0 %v1518_v14  ;;  %1505 = vmatpush2.bf16.msra.mxu1 %v1518_v14 }
  0x31   :  { %600 = vmatmul.mubr.bf16.vlgmr.msra.gmra.mxu0 %v1519_v15  ;;  %728 = vmatmul.mubr.bf16.vlgmr.msra.gmra.mxu1 %v1522_v16 }
  0x32   :  { %1323 = vmatprep.mubr.msk.bf16.mxu0 %vm470_vm0, %v1525_v17  ;;  %1339 = vmatprep.mubr.msk.bf16.mxu1 %vm470_vm0, %v1527_v18 }
  0x39   :  { %608 = vmatmul.mubr.bf16.gmra.mxu0 %v1529_v19  ;;  %736 = vmatmul.mubr.bf16.gmra.mxu1 %v1530_v20 }
  0x3a   :  { %1324 = vmatprep.mubr.msk.bf16.mxu0 %vm470_vm0, %v1531_v21  ;;  %1340 = vmatprep.mubr.msk.bf16.mxu1 %vm470_vm0, %v1533_v22 }
  0x41   :  { %616 = vmatmul.mubr.bf16.gmra.mxu0 %v1535_v23  ;;  %744 = vmatmul.mubr.bf16.gmra.mxu1 %v1536_v24 }
  0x42   :  { %1325 = vmatprep.mubr.msk.bf16.mxu0 %vm470_vm0, %v1537_v25  ;;  %1341 = vmatprep.mubr.msk.bf16.mxu1 %vm470_vm0, %v1539_v26 }
  0x49   :  { %624 = vmatmul.mubr.bf16.gmra.mxu0 %v1541_v27  ;;  %752 = vmatmul.mubr.bf16.gmra.mxu1 %v1542_v28 }
  0x4a   :  { %1326 = vmatprep.mubr.msk.bf16.mxu0 %vm470_vm0, %v1543_v29  ;;  %1342 = vmatprep.mubr.msk.bf16.mxu1 %vm470_vm0, %v1545_v30 }
  0x51   :  { %632 = vmatmul.mubr.bf16.gmra.mxu0 %v1547_v31  ;;  %760 = vmatmul.mubr.bf16.gmra.mxu1 %v1548_v32 }
  0x52   :  { %1327 = vmatprep.mubr.msk.bf16.mxu0 %vm470_vm0, %v1549_v33  ;;  %1343 = vmatprep.mubr.msk.bf16.mxu1 %vm470_vm0, %v1551_v34 }
  0x59   :  { %640 = vmatmul.mubr.bf16.gmra.mxu0 %v1553_v35  ;;  %768 = vmatmul.mubr.bf16.gmra.mxu1 %v1554_v36 }
  0x5a   :  { %1328 = vmatprep.mubr.msk.bf16.mxu0 %vm470_vm0, %v1555_v37  ;;  %1344 = vmatprep.mubr.msk.bf16.mxu1 %vm470_vm0, %v1557_v38 }
  0x61   :  { %648 = vmatmul.mubr.bf16.gmra.mxu0 %v1559_v39  ;;  %776 = vmatmul.mubr.bf16.gmra.mxu1 %v1560_v40 }
  0x62   :  { %1329 = vmatprep.mubr.msk.bf16.mxu0 %vm470_vm0, %v1561_v41  ;;  %1345 = vmatprep.mubr.msk.bf16.mxu1 %vm470_vm0, %v1563_v42 }
  0x69   :  { %656 = vmatmul.mubr.bf16.gmra.mxu0 %v1565_v43  ;;  %784 = vmatmul.mubr.bf16.gmra.mxu1 %v1566_v44 }
  0x6a   :  { %1330 = vmatprep.mubr.msk.bf16.mxu0 %vm470_vm0, %v1567_v45  ;;  %1346 = vmatprep.mubr.msk.bf16.mxu1 %vm470_vm0, %v1569_v46 }
  0x71   :  { %664 = vmatmul.mubr.bf16.gmra.mxu0 %v1571_v47  ;;  %792 = vmatmul.mubr.bf16.gmra.mxu1 %v1572_v48 }
  0x72   :  { %1331 = vmatprep.mubr.msk.bf16.mxu0 %vm470_vm0, %v1573_v49  ;;  %1347 = vmatprep.mubr.msk.bf16.mxu1 %vm470_vm0, %v1575_v50 }
  0x79   :  { %672 = vmatmul.mubr.bf16.gmra.mxu0 %v1577_v51  ;;  %800 = vmatmul.mubr.bf16.gmra.mxu1 %v1578_v52 }
  0x7a   :  { %1332 = vmatprep.mubr.msk.bf16.mxu0 %vm470_vm0, %v1579_v53  ;;  %1348 = vmatprep.mubr.msk.bf16.mxu1 %vm470_vm0, %v1581_v54 }
  0x81   :  { %680 = vmatmul.mubr.bf16.gmra.mxu0 %v1583_v55  ;;  %808 = vmatmul.mubr.bf16.gmra.mxu1 %v1584_v56 }
  0x82   :  { %1333 = vmatprep.mubr.msk.bf16.mxu0 %vm470_vm0, %v1585_v57  ;;  %1349 = vmatprep.mubr.msk.bf16.mxu1 %vm470_vm0, %v1587_v58 }
  0x89   :  { %688 = vmatmul.mubr.bf16.gmra.mxu0 %v1589_v59  ;;  %816 = vmatmul.mubr.bf16.gmra.mxu1 %v1590_v60 }
  0x8a   :  { %1334 = vmatprep.mubr.msk.bf16.mxu0 %vm470_vm0, %v1591_v61  ;;  %1350 = vmatprep.mubr.msk.bf16.mxu1 %vm470_vm0, %v1593_v62 }
  0x91   :  { %696 = vmatmul.mubr.bf16.gmra.mxu0 %v1595_v63  ;;  %824 = vmatmul.mubr.bf16.gmra.mxu1 %v1596_v0 }
  0x92   :  { %1335 = vmatprep.mubr.msk.bf16.mxu0 %vm470_vm0, %v1597_v1  ;;  %1351 = vmatprep.mubr.msk.bf16.mxu1 %vm470_vm0, %v1599_v2 }
  0x99   :  { %704 = vmatmul.mubr.bf16.gmra.mxu0 %v1601_v3  ;;  %832 = vmatmul.mubr.bf16.gmra.mxu1 %v1602_v4 }
  0x9a   :  { %1336 = vmatprep.mubr.msk.bf16.mxu0 %vm470_vm0, %v1603_v5  ;;  %1352 = vmatprep.mubr.msk.bf16.mxu1 %vm470_vm0, %v1605_v6 }
  0xa1   :  { %712 = vmatmul.mubr.bf16.gmra.mxu0 %v1607_v7  ;;  %840 = vmatmul.mubr.bf16.gmra.mxu1 %v1608_v8 }
  0xa2   :  { %1337 = vmatprep.mubr.msk.bf16.mxu0 %vm470_vm0, %v1609_v9  ;;  %1353 = vmatprep.mubr.msk.bf16.mxu1 %vm470_vm0, %v1611_v10 }
  0xa9   :  { %720 = vmatmul.mubr.bf16.gmra.mxu0 %v1613_v11  ;;  %848 = vmatmul.mubr.bf16.gmra.mxu1 %v1614_v12 }
  0xf1   :  { %v601_v14 = vpop.f32.mrf.mxu0  ;;  %v729_v15 = vpop.f32.mrf.mxu1 }
  0xf2   :  { %v602_v16 = vadd.f32 %v1923_v13, %v601_v14  ;;  %v730_v17 = vadd.f32 %v1923_v13, %v729_v15 }
  0xf3   :  { %v603_v18 = vpop.f32.mrf.mxu0  ;;  %v731_v19 = vpop.f32.mrf.mxu1 }
  0xf4   :  { %v856_v20 = vmax.f32 %v602_v16, 0.0  ;;  %v888_v21 = vmax.f32 %v730_v17, 0.0 }
  0xf5   :  { %v604_v22 = vpop.f32.mrf.mxu0  ;;  %v732_v23 = vpop.f32.mrf.mxu1 }
  0xf6   :  { %v1418_v24 = vpack.c.bf16 %v856_v20, %v856_v20  ;;  %v1450_v25 = vpack.c.bf16 %v888_v21, %v888_v21  ;;  %v605_v26 = vadd.f32 %v1923_v13, %v604_v22  ;;  %v733_v27 = vadd.f32 %v1923_v13, %v732_v23 }
  0xf7   :  { %v606_v28 = vpop.f32.mrf.mxu0  ;;  %v734_v29 = vpop.f32.mrf.mxu1 }
  0xf8   :  { %1177 = vst.msk [vmem:[%s2248_s3] sm:$0xf] %vm1176_vm1, %v1418_v24  ;;  %1209 = vst.msk [vmem:[%s2248_s3 + $0x80] sm:$0xf] %vm1176_vm1, %v1450_v25  ;;  %v857_v30 = vmax.f32 %v605_v26, 0.0  ;;  %v889_v31 = vmax.f32 %v733_v27, 0.0 }
  0xf9   :  { %v609_v32 = vpop.f32.mrf.mxu0  ;;  %v737_v33 = vpop.f32.mrf.mxu1 }
  0xfa   :  { %v1419_v34 = vpack.c.bf16 %v857_v30, %v857_v30  ;;  %v1451_v35 = vpack.c.bf16 %v889_v31, %v889_v31  ;;  %v610_v36 = vadd.f32 %v1923_v13, %v609_v32  ;;  %v738_v37 = vadd.f32 %v1923_v13, %v737_v33 }
  0xfb   :  { %v611_v38 = vpop.f32.mrf.mxu0  ;;  %v739_v39 = vpop.f32.mrf.mxu1 }
  0xfc   :  { %1178 = vst.msk [vmem:[%s2248_s3 + $0x4] sm:$0xf] %vm1176_vm1, %v1419_v34  ;;  %1210 = vst.msk [vmem:[%s2248_s3 + $0x84] sm:$0xf] %vm1176_vm1, %v1451_v35  ;;  %v858_v40 = vmax.f32 %v610_v36, 0.0  ;;  %v890_v41 = vmax.f32 %v738_v37, 0.0 }
  0xfd   :  { %v612_v42 = vpop.f32.mrf.mxu0  ;;  %v740_v43 = vpop.f32.mrf.mxu1 }
  0xfe   :  { %v1420_v44 = vpack.c.bf16 %v858_v40, %v858_v40  ;;  %v1452_v45 = vpack.c.bf16 %v890_v41, %v890_v41  ;;  %v613_v46 = vadd.f32 %v1923_v13, %v612_v42  ;;  %v741_v47 = vadd.f32 %v1923_v13, %v740_v43 }
  0xff   :  { %v614_v48 = vpop.f32.mrf.mxu0  ;;  %v742_v49 = vpop.f32.mrf.mxu1 }
 0x100   :  { %1179 = vst.msk [vmem:[%s2248_s3 + $0x8] sm:$0xf] %vm1176_vm1, %v1420_v44  ;;  %1211 = vst.msk [vmem:[%s2248_s3 + $0x88] sm:$0xf] %vm1176_vm1, %v1452_v45  ;;  %v859_v50 = vmax.f32 %v613_v46, 0.0  ;;  %v891_v51 = vmax.f32 %v741_v47, 0.0 }
 0x101   :  { %v617_v52 = vpop.f32.mrf.mxu0  ;;  %v745_v53 = vpop.f32.mrf.mxu1 }
 0x102   :  { %v1421_v54 = vpack.c.bf16 %v859_v50, %v859_v50  ;;  %v1453_v55 = vpack.c.bf16 %v891_v51, %v891_v51  ;;  %v618_v56 = vadd.f32 %v1923_v13, %v617_v52  ;;  %v746_v57 = vadd.f32 %v1923_v13, %v745_v53 }
 0x103   :  { %v619_v58 = vpop.f32.mrf.mxu0  ;;  %v747_v59 = vpop.f32.mrf.mxu1 }
 0x104   :  { %1180 = vst.msk [vmem:[%s2248_s3 + $0xc] sm:$0xf] %vm1176_vm1, %v1421_v54  ;;  %1212 = vst.msk [vmem:[%s2248_s3 + $0x8c] sm:$0xf] %vm1176_vm1, %v1453_v55  ;;  %v860_v60 = vmax.f32 %v618_v56, 0.0  ;;  %v892_v61 = vmax.f32 %v746_v57, 0.0 }
 0x105   :  { %v620_v62 = vpop.f32.mrf.mxu0  ;;  %v748_v63 = vpop.f32.mrf.mxu1 }
 0x106   :  { %v1422_v0 = vpack.c.bf16 %v860_v60, %v860_v60  ;;  %v1454_v1 = vpack.c.bf16 %v892_v61, %v892_v61  ;;  %v621_v2 = vadd.f32 %v1923_v13, %v620_v62  ;;  %v749_v3 = vadd.f32 %v1923_v13, %v748_v63 }
 0x107   :  { %v622_v4 = vpop.f32.mrf.mxu0  ;;  %v750_v5 = vpop.f32.mrf.mxu1 }
 0x108   :  { %1181 = vst.msk [vmem:[%s2248_s3 + $0x10] sm:$0xf] %vm1176_vm1, %v1422_v0  ;;  %1213 = vst.msk [vmem:[%s2248_s3 + $0x90] sm:$0xf] %vm1176_vm1, %v1454_v1  ;;  %v861_v6 = vmax.f32 %v621_v2, 0.0  ;;  %v893_v7 = vmax.f32 %v749_v3, 0.0 }
 0x109   :  { %v625_v8 = vpop.f32.mrf.mxu0  ;;  %v753_v9 = vpop.f32.mrf.mxu1 }
 0x10a   :  { %v1423_v10 = vpack.c.bf16 %v861_v6, %v861_v6  ;;  %v1455_v11 = vpack.c.bf16 %v893_v7, %v893_v7  ;;  %v626_v12 = vadd.f32 %v1923_v13, %v625_v8  ;;  %v754_v14 = vadd.f32 %v1923_v13, %v753_v9 }
 0x10b   :  { %v627_v15 = vpop.f32.mrf.mxu0  ;;  %v755_v16 = vpop.f32.mrf.mxu1 }
 0x10c   :  { %1182 = vst.msk [vmem:[%s2248_s3 + $0x14] sm:$0xf] %vm1176_vm1, %v1423_v10  ;;  %1214 = vst.msk [vmem:[%s2248_s3 + $0x94] sm:$0xf] %vm1176_vm1, %v1455_v11  ;;  %v862_v17 = vmax.f32 %v626_v12, 0.0  ;;  %v894_v18 = vmax.f32 %v754_v14, 0.0 }
 0x10d   :  { %v628_v19 = vpop.f32.mrf.mxu0  ;;  %v756_v20 = vpop.f32.mrf.mxu1 }
 0x10e   :  { %v1424_v21 = vpack.c.bf16 %v862_v17, %v862_v17  ;;  %v1456_v22 = vpack.c.bf16 %v894_v18, %v894_v18  ;;  %v629_v23 = vadd.f32 %v1923_v13, %v628_v19  ;;  %v757_v24 = vadd.f32 %v1923_v13, %v756_v20 }
 0x10f   :  { %v630_v25 = vpop.f32.mrf.mxu0  ;;  %v758_v26 = vpop.f32.mrf.mxu1 }
 0x110   :  { %1183 = vst.msk [vmem:[%s2248_s3 + $0x18] sm:$0xf] %vm1176_vm1, %v1424_v21  ;;  %1215 = vst.msk [vmem:[%s2248_s3 + $0x98] sm:$0xf] %vm1176_vm1, %v1456_v22  ;;  %v863_v27 = vmax.f32 %v629_v23, 0.0  ;;  %v895_v28 = vmax.f32 %v757_v24, 0.0 }
 0x111   :  { %v633_v29 = vpop.f32.mrf.mxu0  ;;  %v761_v30 = vpop.f32.mrf.mxu1 }
 0x112   :  { %v1425_v31 = vpack.c.bf16 %v863_v27, %v863_v27  ;;  %v1457_v32 = vpack.c.bf16 %v895_v28, %v895_v28  ;;  %v634_v33 = vadd.f32 %v1923_v13, %v633_v29  ;;  %v762_v34 = vadd.f32 %v1923_v13, %v761_v30 }
 0x113   :  { %v635_v35 = vpop.f32.mrf.mxu0  ;;  %v763_v36 = vpop.f32.mrf.mxu1 }
 0x114   :  { %1184 = vst.msk [vmem:[%s2248_s3 + $0x1c] sm:$0xf] %vm1176_vm1, %v1425_v31  ;;  %1216 = vst.msk [vmem:[%s2248_s3 + $0x9c] sm:$0xf] %vm1176_vm1, %v1457_v32  ;;  %v864_v37 = vmax.f32 %v634_v33, 0.0  ;;  %v896_v38 = vmax.f32 %v762_v34, 0.0 }
 0x115   :  { %v636_v39 = vpop.f32.mrf.mxu0  ;;  %v764_v40 = vpop.f32.mrf.mxu1 }
 0x116   :  { %v1426_v41 = vpack.c.bf16 %v864_v37, %v864_v37  ;;  %v1458_v42 = vpack.c.bf16 %v896_v38, %v896_v38  ;;  %v637_v43 = vadd.f32 %v1923_v13, %v636_v39  ;;  %v765_v44 = vadd.f32 %v1923_v13, %v764_v40 }
 0x117   :  { %v638_v45 = vpop.f32.mrf.mxu0  ;;  %v766_v46 = vpop.f32.mrf.mxu1 }
 0x118   :  { %1185 = vst.msk [vmem:[%s2248_s3 + $0x20] sm:$0xf] %vm1176_vm1, %v1426_v41  ;;  %1217 = vst.msk [vmem:[%s2248_s3 + $0xa0] sm:$0xf] %vm1176_vm1, %v1458_v42  ;;  %v865_v47 = vmax.f32 %v637_v43, 0.0  ;;  %v897_v48 = vmax.f32 %v765_v44, 0.0 }
 0x119   :  { %v641_v49 = vpop.f32.mrf.mxu0  ;;  %v769_v50 = vpop.f32.mrf.mxu1 }
 0x11a   :  { %v1427_v51 = vpack.c.bf16 %v865_v47, %v865_v47  ;;  %v1459_v52 = vpack.c.bf16 %v897_v48, %v897_v48  ;;  %v642_v53 = vadd.f32 %v1923_v13, %v641_v49  ;;  %v770_v54 = vadd.f32 %v1923_v13, %v769_v50 }
 0x11b   :  { %v643_v55 = vpop.f32.mrf.mxu0  ;;  %v771_v56 = vpop.f32.mrf.mxu1 }
 0x11c   :  { %1186 = vst.msk [vmem:[%s2248_s3 + $0x24] sm:$0xf] %vm1176_vm1, %v1427_v51  ;;  %1218 = vst.msk [vmem:[%s2248_s3 + $0xa4] sm:$0xf] %vm1176_vm1, %v1459_v52  ;;  %v866_v57 = vmax.f32 %v642_v53, 0.0  ;;  %v898_v58 = vmax.f32 %v770_v54, 0.0 }
 0x11d   :  { %v644_v59 = vpop.f32.mrf.mxu0  ;;  %v772_v60 = vpop.f32.mrf.mxu1 }
 0x11e   :  { %v1428_v61 = vpack.c.bf16 %v866_v57, %v866_v57  ;;  %v1460_v62 = vpack.c.bf16 %v898_v58, %v898_v58  ;;  %v645_v63 = vadd.f32 %v1923_v13, %v644_v59  ;;  %v773_v0 = vadd.f32 %v1923_v13, %v772_v60 }
 0x11f   :  { %v646_v1 = vpop.f32.mrf.mxu0  ;;  %v774_v2 = vpop.f32.mrf.mxu1 }
 0x120   :  { %1187 = vst.msk [vmem:[%s2248_s3 + $0x28] sm:$0xf] %vm1176_vm1, %v1428_v61  ;;  %1219 = vst.msk [vmem:[%s2248_s3 + $0xa8] sm:$0xf] %vm1176_vm1, %v1460_v62  ;;  %v867_v3 = vmax.f32 %v645_v63, 0.0  ;;  %v899_v4 = vmax.f32 %v773_v0, 0.0 }
 0x121   :  { %v649_v5 = vpop.f32.mrf.mxu0  ;;  %v777_v6 = vpop.f32.mrf.mxu1 }
 0x122   :  { %v1429_v7 = vpack.c.bf16 %v867_v3, %v867_v3  ;;  %v1461_v8 = vpack.c.bf16 %v899_v4, %v899_v4  ;;  %v650_v9 = vadd.f32 %v1923_v13, %v649_v5  ;;  %v778_v10 = vadd.f32 %v1923_v13, %v777_v6 }
 0x123   :  { %v651_v11 = vpop.f32.mrf.mxu0  ;;  %v779_v12 = vpop.f32.mrf.mxu1 }
 0x124   :  { %1188 = vst.msk [vmem:[%s2248_s3 + $0x2c] sm:$0xf] %vm1176_vm1, %v1429_v7  ;;  %1220 = vst.msk [vmem:[%s2248_s3 + $0xac] sm:$0xf] %vm1176_vm1, %v1461_v8  ;;  %v868_v14 = vmax.f32 %v650_v9, 0.0  ;;  %v900_v15 = vmax.f32 %v778_v10, 0.0 }
 0x125   :  { %v652_v16 = vpop.f32.mrf.mxu0  ;;  %v780_v17 = vpop.f32.mrf.mxu1 }
 0x126   :  { %v1430_v18 = vpack.c.bf16 %v868_v14, %v868_v14  ;;  %v1462_v19 = vpack.c.bf16 %v900_v15, %v900_v15  ;;  %v653_v20 = vadd.f32 %v1923_v13, %v652_v16  ;;  %v781_v21 = vadd.f32 %v1923_v13, %v780_v17 }
 0x127   :  { %v654_v22 = vpop.f32.mrf.mxu0  ;;  %v782_v23 = vpop.f32.mrf.mxu1 }
 0x128   :  { %1189 = vst.msk [vmem:[%s2248_s3 + $0x30] sm:$0xf] %vm1176_vm1, %v1430_v18  ;;  %1221 = vst.msk [vmem:[%s2248_s3 + $0xb0] sm:$0xf] %vm1176_vm1, %v1462_v19  ;;  %v869_v24 = vmax.f32 %v653_v20, 0.0  ;;  %v901_v25 = vmax.f32 %v781_v21, 0.0 }
 0x129   :  { %v657_v26 = vpop.f32.mrf.mxu0  ;;  %v785_v27 = vpop.f32.mrf.mxu1 }
 0x12a   :  { %v1431_v28 = vpack.c.bf16 %v869_v24, %v869_v24  ;;  %v1463_v29 = vpack.c.bf16 %v901_v25, %v901_v25  ;;  %v658_v30 = vadd.f32 %v1923_v13, %v657_v26  ;;  %v786_v31 = vadd.f32 %v1923_v13, %v785_v27 }
 0x12b   :  { %v659_v32 = vpop.f32.mrf.mxu0  ;;  %v787_v33 = vpop.f32.mrf.mxu1 }
 0x12c   :  { %1190 = vst.msk [vmem:[%s2248_s3 + $0x34] sm:$0xf] %vm1176_vm1, %v1431_v28  ;;  %1222 = vst.msk [vmem:[%s2248_s3 + $0xb4] sm:$0xf] %vm1176_vm1, %v1463_v29  ;;  %v870_v34 = vmax.f32 %v658_v30, 0.0  ;;  %v902_v35 = vmax.f32 %v786_v31, 0.0 }
 0x12d   :  { %v660_v36 = vpop.f32.mrf.mxu0  ;;  %v788_v37 = vpop.f32.mrf.mxu1 }
 0x12e   :  { %v1432_v38 = vpack.c.bf16 %v870_v34, %v870_v34  ;;  %v1464_v39 = vpack.c.bf16 %v902_v35, %v902_v35  ;;  %v661_v40 = vadd.f32 %v1923_v13, %v660_v36  ;;  %v789_v41 = vadd.f32 %v1923_v13, %v788_v37 }
 0x12f   :  { %v662_v42 = vpop.f32.mrf.mxu0  ;;  %v790_v43 = vpop.f32.mrf.mxu1 }
 0x130   :  { %1191 = vst.msk [vmem:[%s2248_s3 + $0x38] sm:$0xf] %vm1176_vm1, %v1432_v38  ;;  %1223 = vst.msk [vmem:[%s2248_s3 + $0xb8] sm:$0xf] %vm1176_vm1, %v1464_v39  ;;  %v871_v44 = vmax.f32 %v661_v40, 0.0  ;;  %v903_v45 = vmax.f32 %v789_v41, 0.0 }
 0x131   :  { %v665_v46 = vpop.f32.mrf.mxu0  ;;  %v793_v47 = vpop.f32.mrf.mxu1 }
 0x132   :  { %v1433_v48 = vpack.c.bf16 %v871_v44, %v871_v44  ;;  %v1465_v49 = vpack.c.bf16 %v903_v45, %v903_v45  ;;  %v666_v50 = vadd.f32 %v1923_v13, %v665_v46  ;;  %v794_v51 = vadd.f32 %v1923_v13, %v793_v47 }
 0x133   :  { %v667_v52 = vpop.f32.mrf.mxu0  ;;  %v795_v53 = vpop.f32.mrf.mxu1 }
 0x134   :  { %1192 = vst.msk [vmem:[%s2248_s3 + $0x3c] sm:$0xf] %vm1176_vm1, %v1433_v48  ;;  %1224 = vst.msk [vmem:[%s2248_s3 + $0xbc] sm:$0xf] %vm1176_vm1, %v1465_v49  ;;  %v872_v54 = vmax.f32 %v666_v50, 0.0  ;;  %v904_v55 = vmax.f32 %v794_v51, 0.0 }
 0x135   :  { %v668_v56 = vpop.f32.mrf.mxu0  ;;  %v796_v57 = vpop.f32.mrf.mxu1 }
 0x136   :  { %v1434_v58 = vpack.c.bf16 %v872_v54, %v872_v54  ;;  %v1466_v59 = vpack.c.bf16 %v904_v55, %v904_v55  ;;  %v669_v60 = vadd.f32 %v1923_v13, %v668_v56  ;;  %v797_v61 = vadd.f32 %v1923_v13, %v796_v57 }
 0x137   :  { %v670_v62 = vpop.f32.mrf.mxu0  ;;  %v798_v63 = vpop.f32.mrf.mxu1 }
 0x138   :  { %1193 = vst.msk [vmem:[%s2248_s3 + $0x40] sm:$0xf] %vm1176_vm1, %v1434_v58  ;;  %1225 = vst.msk [vmem:[%s2248_s3 + $0xc0] sm:$0xf] %vm1176_vm1, %v1466_v59  ;;  %v873_v0 = vmax.f32 %v669_v60, 0.0  ;;  %v905_v1 = vmax.f32 %v797_v61, 0.0 }
 0x139   :  { %v673_v2 = vpop.f32.mrf.mxu0  ;;  %v801_v3 = vpop.f32.mrf.mxu1 }
 0x13a   :  { %v1435_v4 = vpack.c.bf16 %v873_v0, %v873_v0  ;;  %v1467_v5 = vpack.c.bf16 %v905_v1, %v905_v1  ;;  %v674_v6 = vadd.f32 %v1923_v13, %v673_v2  ;;  %v802_v7 = vadd.f32 %v1923_v13, %v801_v3 }
 0x13b   :  { %v675_v8 = vpop.f32.mrf.mxu0  ;;  %v803_v9 = vpop.f32.mrf.mxu1 }
 0x13c   :  { %1194 = vst.msk [vmem:[%s2248_s3 + $0x44] sm:$0xf] %vm1176_vm1, %v1435_v4  ;;  %1226 = vst.msk [vmem:[%s2248_s3 + $0xc4] sm:$0xf] %vm1176_vm1, %v1467_v5  ;;  %v874_v10 = vmax.f32 %v674_v6, 0.0  ;;  %v906_v11 = vmax.f32 %v802_v7, 0.0 }
 0x13d   :  { %v676_v12 = vpop.f32.mrf.mxu0  ;;  %v804_v14 = vpop.f32.mrf.mxu1 }
 0x13e   :  { %v1436_v15 = vpack.c.bf16 %v874_v10, %v874_v10  ;;  %v1468_v16 = vpack.c.bf16 %v906_v11, %v906_v11  ;;  %v677_v17 = vadd.f32 %v1923_v13, %v676_v12  ;;  %v805_v18 = vadd.f32 %v1923_v13, %v804_v14 }
 0x13f   :  { %v678_v19 = vpop.f32.mrf.mxu0  ;;  %v806_v20 = vpop.f32.mrf.mxu1 }
 0x140   :  { %1195 = vst.msk [vmem:[%s2248_s3 + $0x48] sm:$0xf] %vm1176_vm1, %v1436_v15  ;;  %1227 = vst.msk [vmem:[%s2248_s3 + $0xc8] sm:$0xf] %vm1176_vm1, %v1468_v16  ;;  %v875_v21 = vmax.f32 %v677_v17, 0.0  ;;  %v907_v22 = vmax.f32 %v805_v18, 0.0 }
 0x141   :  { %v681_v23 = vpop.f32.mrf.mxu0  ;;  %v809_v24 = vpop.f32.mrf.mxu1 }
 0x142   :  { %v1437_v25 = vpack.c.bf16 %v875_v21, %v875_v21  ;;  %v1469_v26 = vpack.c.bf16 %v907_v22, %v907_v22  ;;  %v682_v27 = vadd.f32 %v1923_v13, %v681_v23  ;;  %v810_v28 = vadd.f32 %v1923_v13, %v809_v24 }
 0x143   :  { %v683_v29 = vpop.f32.mrf.mxu0  ;;  %v811_v30 = vpop.f32.mrf.mxu1 }
 0x144   :  { %1196 = vst.msk [vmem:[%s2248_s3 + $0x4c] sm:$0xf] %vm1176_vm1, %v1437_v25  ;;  %1228 = vst.msk [vmem:[%s2248_s3 + $0xcc] sm:$0xf] %vm1176_vm1, %v1469_v26  ;;  %v876_v31 = vmax.f32 %v682_v27, 0.0  ;;  %v908_v32 = vmax.f32 %v810_v28, 0.0 }
 0x145   :  { %v684_v33 = vpop.f32.mrf.mxu0  ;;  %v812_v34 = vpop.f32.mrf.mxu1 }
 0x146   :  { %v1438_v35 = vpack.c.bf16 %v876_v31, %v876_v31  ;;  %v1470_v36 = vpack.c.bf16 %v908_v32, %v908_v32  ;;  %v685_v37 = vadd.f32 %v1923_v13, %v684_v33  ;;  %v813_v38 = vadd.f32 %v1923_v13, %v812_v34 }
 0x147   :  { %v686_v39 = vpop.f32.mrf.mxu0  ;;  %v814_v40 = vpop.f32.mrf.mxu1 }
 0x148   :  { %1197 = vst.msk [vmem:[%s2248_s3 + $0x50] sm:$0xf] %vm1176_vm1, %v1438_v35  ;;  %1229 = vst.msk [vmem:[%s2248_s3 + $0xd0] sm:$0xf] %vm1176_vm1, %v1470_v36  ;;  %v877_v41 = vmax.f32 %v685_v37, 0.0  ;;  %v909_v42 = vmax.f32 %v813_v38, 0.0 }
 0x149   :  { %v689_v43 = vpop.f32.mrf.mxu0  ;;  %v817_v44 = vpop.f32.mrf.mxu1 }
 0x14a   :  { %v1439_v45 = vpack.c.bf16 %v877_v41, %v877_v41  ;;  %v1471_v46 = vpack.c.bf16 %v909_v42, %v909_v42  ;;  %v690_v47 = vadd.f32 %v1923_v13, %v689_v43  ;;  %v818_v48 = vadd.f32 %v1923_v13, %v817_v44 }
 0x14b   :  { %v691_v49 = vpop.f32.mrf.mxu0  ;;  %v819_v50 = vpop.f32.mrf.mxu1 }
 0x14c   :  { %1198 = vst.msk [vmem:[%s2248_s3 + $0x54] sm:$0xf] %vm1176_vm1, %v1439_v45  ;;  %1230 = vst.msk [vmem:[%s2248_s3 + $0xd4] sm:$0xf] %vm1176_vm1, %v1471_v46  ;;  %v878_v51 = vmax.f32 %v690_v47, 0.0  ;;  %v910_v52 = vmax.f32 %v818_v48, 0.0 }
 0x14d   :  { %v692_v53 = vpop.f32.mrf.mxu0  ;;  %v820_v54 = vpop.f32.mrf.mxu1 }
 0x14e   :  { %v1440_v55 = vpack.c.bf16 %v878_v51, %v878_v51  ;;  %v1472_v56 = vpack.c.bf16 %v910_v52, %v910_v52  ;;  %v693_v57 = vadd.f32 %v1923_v13, %v692_v53  ;;  %v821_v58 = vadd.f32 %v1923_v13, %v820_v54 }
 0x14f   :  { %v694_v59 = vpop.f32.mrf.mxu0  ;;  %v822_v60 = vpop.f32.mrf.mxu1 }
 0x150   :  { %1199 = vst.msk [vmem:[%s2248_s3 + $0x58] sm:$0xf] %vm1176_vm1, %v1440_v55  ;;  %1231 = vst.msk [vmem:[%s2248_s3 + $0xd8] sm:$0xf] %vm1176_vm1, %v1472_v56  ;;  %v879_v61 = vmax.f32 %v693_v57, 0.0  ;;  %v911_v62 = vmax.f32 %v821_v58, 0.0 }
 0x151   :  { %v697_v63 = vpop.f32.mrf.mxu0  ;;  %v825_v0 = vpop.f32.mrf.mxu1 }
 0x152   :  { %v1441_v1 = vpack.c.bf16 %v879_v61, %v879_v61  ;;  %v1473_v2 = vpack.c.bf16 %v911_v62, %v911_v62  ;;  %v698_v3 = vadd.f32 %v1923_v13, %v697_v63  ;;  %v826_v4 = vadd.f32 %v1923_v13, %v825_v0 }
 0x153   :  { %v699_v5 = vpop.f32.mrf.mxu0  ;;  %v827_v6 = vpop.f32.mrf.mxu1 }
 0x154   :  { %1200 = vst.msk [vmem:[%s2248_s3 + $0x5c] sm:$0xf] %vm1176_vm1, %v1441_v1  ;;  %1232 = vst.msk [vmem:[%s2248_s3 + $0xdc] sm:$0xf] %vm1176_vm1, %v1473_v2  ;;  %v880_v7 = vmax.f32 %v698_v3, 0.0  ;;  %v912_v8 = vmax.f32 %v826_v4, 0.0 }
 0x155   :  { %v700_v9 = vpop.f32.mrf.mxu0  ;;  %v828_v10 = vpop.f32.mrf.mxu1 }
 0x156   :  { %v1442_v11 = vpack.c.bf16 %v880_v7, %v880_v7  ;;  %v1474_v12 = vpack.c.bf16 %v912_v8, %v912_v8  ;;  %v701_v14 = vadd.f32 %v1923_v13, %v700_v9  ;;  %v829_v15 = vadd.f32 %v1923_v13, %v828_v10 }
 0x157   :  { %v702_v16 = vpop.f32.mrf.mxu0  ;;  %v830_v17 = vpop.f32.mrf.mxu1 }
 0x158   :  { %1201 = vst.msk [vmem:[%s2248_s3 + $0x60] sm:$0xf] %vm1176_vm1, %v1442_v11  ;;  %1233 = vst.msk [vmem:[%s2248_s3 + $0xe0] sm:$0xf] %vm1176_vm1, %v1474_v12  ;;  %v881_v18 = vmax.f32 %v701_v14, 0.0  ;;  %v913_v19 = vmax.f32 %v829_v15, 0.0 }
 0x159   :  { %v705_v20 = vpop.f32.mrf.mxu0  ;;  %v833_v21 = vpop.f32.mrf.mxu1 }
 0x15a   :  { %v1443_v22 = vpack.c.bf16 %v881_v18, %v881_v18  ;;  %v1475_v23 = vpack.c.bf16 %v913_v19, %v913_v19  ;;  %v706_v24 = vadd.f32 %v1923_v13, %v705_v20  ;;  %v834_v25 = vadd.f32 %v1923_v13, %v833_v21 }
 0x15b   :  { %v707_v26 = vpop.f32.mrf.mxu0  ;;  %v835_v27 = vpop.f32.mrf.mxu1 }
 0x15c   :  { %1202 = vst.msk [vmem:[%s2248_s3 + $0x64] sm:$0xf] %vm1176_vm1, %v1443_v22  ;;  %1234 = vst.msk [vmem:[%s2248_s3 + $0xe4] sm:$0xf] %vm1176_vm1, %v1475_v23  ;;  %v882_v28 = vmax.f32 %v706_v24, 0.0  ;;  %v914_v29 = vmax.f32 %v834_v25, 0.0 }
 0x15d   :  { %v708_v30 = vpop.f32.mrf.mxu0  ;;  %v836_v31 = vpop.f32.mrf.mxu1 }
 0x15e   :  { %v1444_v32 = vpack.c.bf16 %v882_v28, %v882_v28  ;;  %v1476_v33 = vpack.c.bf16 %v914_v29, %v914_v29  ;;  %v709_v34 = vadd.f32 %v1923_v13, %v708_v30  ;;  %v837_v35 = vadd.f32 %v1923_v13, %v836_v31 }
 0x15f   :  { %v710_v36 = vpop.f32.mrf.mxu0  ;;  %v838_v37 = vpop.f32.mrf.mxu1 }
 0x160   :  { %1203 = vst.msk [vmem:[%s2248_s3 + $0x68] sm:$0xf] %vm1176_vm1, %v1444_v32  ;;  %1235 = vst.msk [vmem:[%s2248_s3 + $0xe8] sm:$0xf] %vm1176_vm1, %v1476_v33  ;;  %v883_v38 = vmax.f32 %v709_v34, 0.0  ;;  %v915_v39 = vmax.f32 %v837_v35, 0.0 }
 0x161   :  { %v713_v40 = vpop.f32.mrf.mxu0  ;;  %v841_v41 = vpop.f32.mrf.mxu1 }
 0x162   :  { %v1445_v42 = vpack.c.bf16 %v883_v38, %v883_v38  ;;  %v1477_v43 = vpack.c.bf16 %v915_v39, %v915_v39  ;;  %v714_v44 = vadd.f32 %v1923_v13, %v713_v40  ;;  %v842_v45 = vadd.f32 %v1923_v13, %v841_v41 }
 0x163   :  { %v715_v46 = vpop.f32.mrf.mxu0  ;;  %v843_v47 = vpop.f32.mrf.mxu1 }
 0x164   :  { %1204 = vst.msk [vmem:[%s2248_s3 + $0x6c] sm:$0xf] %vm1176_vm1, %v1445_v42  ;;  %1236 = vst.msk [vmem:[%s2248_s3 + $0xec] sm:$0xf] %vm1176_vm1, %v1477_v43  ;;  %v884_v48 = vmax.f32 %v714_v44, 0.0  ;;  %v916_v49 = vmax.f32 %v842_v45, 0.0 }
 0x165   :  { %v716_v50 = vpop.f32.mrf.mxu0  ;;  %v844_v51 = vpop.f32.mrf.mxu1 }
 0x166   :  { %v1446_v52 = vpack.c.bf16 %v884_v48, %v884_v48  ;;  %v1478_v53 = vpack.c.bf16 %v916_v49, %v916_v49  ;;  %v717_v54 = vadd.f32 %v1923_v13, %v716_v50  ;;  %v845_v55 = vadd.f32 %v1923_v13, %v844_v51 }
 0x167   :  { %v718_v56 = vpop.f32.mrf.mxu0  ;;  %v846_v57 = vpop.f32.mrf.mxu1 }
 0x168   :  { %1205 = vst.msk [vmem:[%s2248_s3 + $0x70] sm:$0xf] %vm1176_vm1, %v1446_v52  ;;  %1237 = vst.msk [vmem:[%s2248_s3 + $0xf0] sm:$0xf] %vm1176_vm1, %v1478_v53  ;;  %v885_v58 = vmax.f32 %v717_v54, 0.0  ;;  %v917_v59 = vmax.f32 %v845_v55, 0.0 }
 0x169   :  { %v721_v60 = vpop.f32.mrf.mxu0  ;;  %v849_v61 = vpop.f32.mrf.mxu1 }
 0x16a   :  { %v1447_v62 = vpack.c.bf16 %v885_v58, %v885_v58  ;;  %v1479_v63 = vpack.c.bf16 %v917_v59, %v917_v59  ;;  %v722_v0 = vadd.f32 %v1923_v13, %v721_v60  ;;  %v850_v1 = vadd.f32 %v1923_v13, %v849_v61 }
 0x16b   :  { %v723_v2 = vpop.f32.mrf.mxu0  ;;  %v851_v3 = vpop.f32.mrf.mxu1 }
 0x16c   :  { %1206 = vst.msk [vmem:[%s2248_s3 + $0x74] sm:$0xf] %vm1176_vm1, %v1447_v62  ;;  %1238 = vst.msk [vmem:[%s2248_s3 + $0xf4] sm:$0xf] %vm1176_vm1, %v1479_v63  ;;  %v886_v4 = vmax.f32 %v722_v0, 0.0  ;;  %v918_v5 = vmax.f32 %v850_v1, 0.0 }
 0x16d   :  { %v724_v6 = vpop.f32.mrf.mxu0  ;;  %v852_v7 = vpop.f32.mrf.mxu1 }
 0x16e   :  { %v1448_v8 = vpack.c.bf16 %v886_v4, %v886_v4  ;;  %v1480_v9 = vpack.c.bf16 %v918_v5, %v918_v5  ;;  %v725_v10 = vadd.f32 %v1923_v13, %v724_v6  ;;  %v853_v11 = vadd.f32 %v1923_v13, %v852_v7 }
 0x16f   :  { %v726_v12 = vpop.f32.mrf.mxu0  ;;  %v854_v14 = vpop.f32.mrf.mxu1 }
 0x170   :  { %1207 = vst.msk [vmem:[%s2248_s3 + $0x78] sm:$0xf] %vm1176_vm1, %v1448_v8  ;;  %1239 = vst.msk [vmem:[%s2248_s3 + $0xf8] sm:$0xf] %vm1176_vm1, %v1480_v9  ;;  %v887_v15 = vmax.f32 %v725_v10, 0.0  ;;  %v919_v16 = vmax.f32 %v853_v11, 0.0 }
 0x172   :  { %v1449_v17 = vpack.c.bf16 %v887_v15, %v887_v15  ;;  %v1481_v18 = vpack.c.bf16 %v919_v16, %v919_v16 }
 0x174   :  { %1208 = vst.msk [vmem:[%s2248_s3 + $0x7c] sm:$0xf] %vm1176_vm1, %v1449_v17  ;;  %1240 = vst.msk [vmem:[%s2248_s3 + $0xfc] sm:$0xf] %vm1176_vm1, %v1481_v18 }

// kernel: lisa_cnn_forward.5
= control target key start
LH: loop header
LB: loop body
LE: loop exit
PB: predicated region body
PF: predicated region fallthrough
CT: control target
= control target key end

     0   :  { %s4199_s1 = inlined_call_operand.vmem [shape: bf16[2304,128], index: 1, kind: input, shape index: {}]   ;;  %s4200_s0 = inlined_call_operand.vmem [shape: bf16[72,2304], index: 0, kind: input, shape index: {}]   ;;  %s4201_s2 = inlined_call_operand.vmem [shape: f32[1,128], index: 2, kind: input, shape index: {}]   ;;  %s4202_s3 = inlined_call_operand.vmem [shape: bf16[72,128], index: 3, kind: output, shape index: {}]  }
   0x1   :  { %v3091_v0 = vld [vmem:[%s4199_s1 + $0x78] sm:$0xff]   ;;  %v3095_v4 = vld [vmem:[%s4199_s1 + $0x70] sm:$0xff]   ;;  %v3099_v8 = vld [vmem:[%s4199_s1 + $0x68] sm:$0xff]  }
   0x2   :  { %v3092_v1 = vld [vmem:[%s4199_s1 + $0xf8] sm:$0xff]   ;;  %2661 = vmatprep.subr.bf16.mxu0 %v3091_v0  ;;  %v3096_v5 = vld [vmem:[%s4199_s1 + $0xf0] sm:$0xff]   ;;  %v3100_v9 = vld [vmem:[%s4199_s1 + $0xe8] sm:$0xff]  }
   0x3   :  { %v3093_v2 = vld [vmem:[%s4199_s1 + $0x38] sm:$0xff]   ;;  %2707 = vmatprep.subr.bf16.mxu1 %v3092_v1  ;;  %v3097_v6 = vld [vmem:[%s4199_s1 + $0x30] sm:$0xff]   ;;  %v3101_v10 = vld [vmem:[%s4199_s1 + $0x28] sm:$0xff]  }
   0x4   :  { %v3094_v3 = vld [vmem:[%s4199_s1 + $0xb8] sm:$0xff]   ;;  %2662 = vmatpush3.bf16.msra.mxu0 %v3093_v2  ;;  %v3098_v7 = vld [vmem:[%s4199_s1 + $0xb0] sm:$0xff]   ;;  %v3102_v11 = vld [vmem:[%s4199_s1 + $0xa8] sm:$0xff]  }
   0x5   :  { %2708 = vmatpush3.bf16.msra.mxu1 %v3094_v3  ;;  %2663 = vmatprep.subr.bf16.mxu0 %v3095_v4  ;;  %v3103_v12 = vld [vmem:[%s4199_s1 + $0x60] sm:$0xff]   ;;  %v3107_v16 = vld [vmem:[%s4199_s1 + $0x58] sm:$0xff]   ;;  %v3111_v20 = vld [vmem:[%s4199_s1 + $0x50] sm:$0xff]  }
   0x6   :  { %2709 = vmatprep.subr.bf16.mxu1 %v3096_v5  ;;  %v3104_v13 = vld [vmem:[%s4199_s1 + $0xe0] sm:$0xff]   ;;  %v3108_v17 = vld [vmem:[%s4199_s1 + $0xd8] sm:$0xff]   ;;  %v3112_v21 = vld [vmem:[%s4199_s1 + $0xd0] sm:$0xff]  }
   0x7   :  { %v3105_v14 = vld [vmem:[%s4199_s1 + $0x20] sm:$0xff]   ;;  %v3109_v18 = vld [vmem:[%s4199_s1 + $0x18] sm:$0xff]   ;;  %v3113_v22 = vld [vmem:[%s4199_s1 + $0x10] sm:$0xff]  }
   0x8   :  { %2664 = vmatpush3.bf16.msra.mxu0 %v3097_v6  ;;  %v3106_v15 = vld [vmem:[%s4199_s1 + $0xa0] sm:$0xff]   ;;  %v3110_v19 = vld [vmem:[%s4199_s1 + $0x98] sm:$0xff]   ;;  %v3114_v23 = vld [vmem:[%s4199_s1 + $0x90] sm:$0xff]  }
   0x9   :  { %2710 = vmatpush3.bf16.msra.mxu1 %v3098_v7  ;;  %2665 = vmatprep.subr.bf16.mxu0 %v3099_v8  ;;  %v3115_v24 = vld [vmem:[%s4199_s1 + $0x48] sm:$0xff]   ;;  %v3119_v28 = vld [vmem:[%s4199_s1 + $0x40] sm:$0xff]   ;;  %v3129_v36 = vld [vmem:[%s4199_s1 + $0x178] sm:$0xff]  }
   0xa   :  { %2711 = vmatprep.subr.bf16.mxu1 %v3100_v9  ;;  %v3116_v25 = vld [vmem:[%s4199_s1 + $0xc8] sm:$0xff]   ;;  %v3120_v29 = vld [vmem:[%s4199_s1 + $0xc0] sm:$0xff]   ;;  %v3130_v37 = vld [vmem:[%s4199_s1 + $0x138] sm:$0xff]  }
   0xb   :  { %v3117_v26 = vld [vmem:[%s4199_s1 + $0x8] sm:$0xff]   ;;  %v3121_v30 = vld [vmem:[%s4199_s1] sm:$0xff]   ;;  %v3131_v38 = vld [vmem:[%s4199_s1 + $0x170] sm:$0xff]  }
   0xc   :  { %2666 = vmatpush3.bf16.msra.mxu0 %v3101_v10  ;;  %v3118_v27 = vld [vmem:[%s4199_s1 + $0x88] sm:$0xff]   ;;  %v3122_v31 = vld [vmem:[%s4199_s1 + $0x80] sm:$0xff]   ;;  %v3132_v39 = vld [vmem:[%s4199_s1 + $0x130] sm:$0xff]  }
   0xd   :  { %2712 = vmatpush3.bf16.msra.mxu1 %v3102_v11  ;;  %2667 = vmatprep.subr.bf16.mxu0 %v3103_v12  ;;  %v3123_v32 = vld [vmem:[%s4200_s0] ss:$72 sps:$4 sm:$0xff]   ;;  %v3125_v33 = vld [vmem:[%s4200_s0 + $0x4] ss:$72 sps:$4 sm:$0xff]   ;;  %v3133_v40 = vld [vmem:[%s4200_s0 + $0x94] ss:$72 sps:$4 sm:$0xff]  }
   0xe   :  { %2713 = vmatprep.subr.bf16.mxu1 %v3104_v13  ;;  %v3126_v34 = vld [vmem:[%s4200_s0 + $0x8] ss:$72 sps:$4 sm:$0xff]   ;;  %v3128_v35 = vld [vmem:[%s4200_s0 + $0xc] ss:$72 sps:$4 sm:$0xff]   ;;  %1710 = vmatprep.mubr.bf16.mxu0 %v3125_v33  ;;  %v3135_v41 = vld [vmem:[%s4200_s0 + $0x9c] ss:$72 sps:$4 sm:$0xff]  }
   0xf   :  { %1782 = vmatprep.mubr.bf16.mxu1 %v3128_v35  ;;  %v3137_v42 = vld [vmem:[%s4200_s0 + $0x90] ss:$72 sps:$4 sm:$0xff]   ;;  %v3141_v46 = vld [vmem:[%s4199_s1 + $0x168] sm:$0xff]   ;;  %v3149_v52 = vld [vmem:[%s4199_s1 + $0x160] sm:$0xff]  }
  0x10   :  { %2668 = vmatpush3.bf16.msra.mxu0 %v3105_v14  ;;  %v3138_v43 = vld [vmem:[%s4200_s0 + $0x98] ss:$72 sps:$4 sm:$0xff]   ;;  %v3142_v47 = vld [vmem:[%s4199_s1 + $0x128] sm:$0xff]   ;;  %v3143_v48 = vld [vmem:[%s4199_s1 + $0x1f0] sm:$0xff]  }
  0x11   :  { %2714 = vmatpush3.bf16.msra.mxu1 %v3106_v15  ;;  %2669 = vmatprep.subr.bf16.mxu0 %v3107_v16  ;;  %v3139_v44 = vld [vmem:[%s4199_s1 + $0x1f8] sm:$0xff]   ;;  %v3144_v49 = vld [vmem:[%s4199_s1 + $0x1b0] sm:$0xff]   ;;  %v3145_v50 = vld [vmem:[%s4200_s0 + $0x124] ss:$72 sps:$4 sm:$0xff]  }
  0x12   :  { %2715 = vmatprep.subr.bf16.mxu1 %v3108_v17  ;;  %v3140_v45 = vld [vmem:[%s4199_s1 + $0x1b8] sm:$0xff]   ;;  %v3147_v51 = vld [vmem:[%s4200_s0 + $0x12c] ss:$72 sps:$4 sm:$0xff]   ;;  %v3150_v53 = vld [vmem:[%s4200_s0 + $0x120] ss:$72 sps:$4 sm:$0xff]  }
  0x13   :  { %v3151_v54 = vld [vmem:[%s4200_s0 + $0x128] ss:$72 sps:$4 sm:$0xff]   ;;  %v3152_v55 = vld [vmem:[%s4199_s1 + $0x120] sm:$0xff]   ;;  %v3155_v58 = vld [vmem:[%s4199_s1 + $0x158] sm:$0xff]  }
  0x14   :  { %2670 = vmatpush3.bf16.msra.mxu0 %v3109_v18  ;;  %v3153_v56 = vld [vmem:[%s4199_s1 + $0x1e8] sm:$0xff]   ;;  %v3156_v59 = vld [vmem:[%s4199_s1 + $0x1e0] sm:$0xff]   ;;  %v3157_v60 = vld [vmem:[%s4199_s1 + $0x118] sm:$0xff]  }
  0x15   :  { %2716 = vmatpush3.bf16.msra.mxu1 %v3110_v19  ;;  %2671 = vmatprep.subr.bf16.mxu0 %v3111_v20  ;;  %v3154_v57 = vld [vmem:[%s4199_s1 + $0x1a8] sm:$0xff]   ;;  %v3158_v61 = vld [vmem:[%s4199_s1 + $0x1a0] sm:$0xff]   ;;  %v3159_v62 = vld [vmem:[%s4200_s0 + $0x1b4] ss:$72 sps:$4 sm:$0xff]  }
  0x16   :  { %2717 = vmatprep.subr.bf16.mxu1 %v3112_v21  ;;  %v3161_v63 = vld [vmem:[%s4200_s0 + $0x1bc] ss:$72 sps:$4 sm:$0xff]   ;;  %v3163_v0 = vld [vmem:[%s4200_s0 + $0x1b0] ss:$72 sps:$4 sm:$0xff]   ;;  %v3171_v8 = vld [vmem:[%s4199_s1 + $0x148] sm:$0xff]  }
  0x17   :  { %v3164_v1 = vld [vmem:[%s4200_s0 + $0x1b8] ss:$72 sps:$4 sm:$0xff]   ;;  %v3166_v3 = vld [vmem:[%s4199_s1 + $0x150] sm:$0xff]   ;;  %v88_v11 = vld [vmem:[%s4200_s0 + $0x248] sm:$0xff] }
  0x18   :  { %2672 = vmatpush3.bf16.msra.mxu0 %v3113_v22  ;;  %v3165_v2 = vld [vmem:[%s4199_s1 + $0x1d8] sm:$0xff]   ;;  %v3168_v5 = vld [vmem:[%s4199_s1 + $0x110] sm:$0xff]   ;;  %v87_v9 = vld [vmem:[%s4200_s0 + $0x240] sm:$0xff]  ;;  %v2461_v13 = vcombine.high %v88_v11, %v88_v11  ;;  %v2460_v15 = vcombine.low %v88_v11, %v88_v11 }
  0x19   :  { %2718 = vmatpush3.bf16.msra.mxu1 %v3114_v23  ;;  %2673 = vmatprep.subr.bf16.mxu0 %v3115_v24  ;;  %v3167_v4 = vld [vmem:[%s4199_s1 + $0x198] sm:$0xff]   ;;  %v3169_v6 = vld [vmem:[%s4199_s1 + $0x1d0] sm:$0xff]   ;;  %v2459_v10 = vcombine.high %v87_v9, %v87_v9  ;;  %v2458_v12 = vcombine.low %v87_v9, %v87_v9  ;;  %v3174_v14 = vld [vmem:[%s4199_s1 + $0x108] sm:$0xff]  }
  0x1a   :  { %2719 = vmatprep.subr.bf16.mxu1 %v3116_v25  ;;  %v3170_v7 = vld [vmem:[%s4199_s1 + $0x190] sm:$0xff]   ;;  %v3177_v16 = vld [vmem:[%s4199_s1 + $0x1c8] sm:$0xff]   ;;  %v3179_v18 = vld [vmem:[%s4199_s1 + $0x140] sm:$0xff]  }
  0x1b   :  { %v3178_v17 = vld [vmem:[%s4199_s1 + $0x188] sm:$0xff]   ;;  %v3180_v19 = vld [vmem:[%s4199_s1 + $0x100] sm:$0xff]   ;;  %v3183_v22 = vld [vmem:[%s4200_s0 + $0x10] ss:$72 sps:$4 sm:$0xff]  }
  0x1c   :  { %2674 = vmatpush3.bf16.msra.mxu0 %v3117_v26  ;;  %v3181_v20 = vld [vmem:[%s4199_s1 + $0x1c0] sm:$0xff]   ;;  %v3185_v23 = vld [vmem:[%s4200_s0 + $0x14] ss:$72 sps:$4 sm:$0xff]   ;;  %v3198_v33 = vld [vmem:[%s4200_s0 + $0xa8] ss:$72 sps:$4 sm:$0xff]  }
  0x1d   :  { %2720 = vmatpush3.bf16.msra.mxu1 %v3118_v27  ;;  %2675 = vmatprep.subr.bf16.mxu0 %v3119_v28  ;;  %v3182_v21 = vld [vmem:[%s4199_s1 + $0x180] sm:$0xff]   ;;  %v3189_v26 = vld [vmem:[%s4199_s1 + $0x278] sm:$0xff]   ;;  %v3191_v28 = vld [vmem:[%s4199_s1 + $0x270] sm:$0xff]  }
  0x1e   :  { %2721 = vmatprep.subr.bf16.mxu1 %v3120_v29  ;;  %v3186_v24 = vld [vmem:[%s4200_s0 + $0x18] ss:$72 sps:$4 sm:$0xff]   ;;  %v3188_v25 = vld [vmem:[%s4200_s0 + $0x1c] ss:$72 sps:$4 sm:$0xff]   ;;  %v3192_v29 = vld [vmem:[%s4199_s1 + $0x230] sm:$0xff]  }
  0x1f   :  { %v3190_v27 = vld [vmem:[%s4199_s1 + $0x238] sm:$0xff]   ;;  %v3240_v9 = vld [vmem:[%s4199_s1 + $0x200] sm:$0xff]  }
  0x20   :  { %2676 = vmatpush3.bf16.msra.mxu0 %v3121_v30  ;;  %v3193_v30 = vld [vmem:[%s4200_s0 + $0xa4] ss:$72 sps:$4 sm:$0xff]   ;;  %v3200_v35 = vld [vmem:[%s4199_s1 + $0x2b8] sm:$0xff]  }
  0x21   :  { %2722 = vmatpush3.bf16.msra.mxu1 %v3122_v31  ;;  %2753 = vmatprep.subr.bf16.mxu0 %v3129_v36  ;;  %v3195_v31 = vld [vmem:[%s4200_s0 + $0xac] ss:$72 sps:$4 sm:$0xff]   ;;  %v3242_v11 = vld [vmem:[%s4199_s1 + $0x280] sm:$0xff]  }
  0x22   :  { %2799 = vmatprep.subr.bf16.mxu1 %v3139_v44  ;;  %v3201_v36 = vld [vmem:[%s4199_s1 + $0x268] sm:$0xff]   ;;  %v3211_v44 = vld [vmem:[%s4200_s0 + $0x138] ss:$72 sps:$4 sm:$0xff]  }
  0x23   :  { %1711 = vmatmul.mubr.bf16.vlgmr.msra.gmra.mxu0 %v3123_v32  ;;  %v3197_v32 = vld [vmem:[%s4200_s0 + $0xa0] ss:$72 sps:$4 sm:$0xff]  }
  0x24   :  { %1783 = vmatmul.mubr.bf16.vlgmr.msra.gmra.mxu1 %v3126_v34  ;;  %2754 = vmatpush3.bf16.msra.mxu0 %v3130_v37  ;;  %v3199_v34 = vld [vmem:[%s4199_s1 + $0x2f8] sm:$0xff]   ;;  %v3202_v37 = vld [vmem:[%s4199_s1 + $0x228] sm:$0xff]  }
  0x25   :  { %2755 = vmatprep.subr.bf16.mxu0 %v3131_v38  ;;  %1718 = vmatprep.mubr.bf16.mxu0 %v3133_v40  ;;  %v3203_v38 = vld [vmem:[%s4199_s1 + $0x2f0] sm:$0xff]  }
  0x26   :  { %1790 = vmatprep.mubr.bf16.mxu1 %v3135_v41  ;;  %2800 = vmatpush3.bf16.msra.mxu1 %v3140_v45  ;;  %v3205_v40 = vld [vmem:[%s4200_s0 + $0x134] ss:$72 sps:$4 sm:$0xff]   ;;  %v3212_v45 = vld [vmem:[%s4199_s1 + $0x220] sm:$0xff]  }
  0x27   :  { %2801 = vmatprep.subr.bf16.mxu1 %v3143_v48  ;;  %v3207_v41 = vld [vmem:[%s4200_s0 + $0x13c] ss:$72 sps:$4 sm:$0xff]  }
  0x28   :  { %2756 = vmatpush3.bf16.msra.mxu0 %v3132_v39  ;;  %v3204_v39 = vld [vmem:[%s4199_s1 + $0x2b0] sm:$0xff]   ;;  %v3215_v48 = vld [vmem:[%s4199_s1 + $0x258] sm:$0xff]  }
  0x29   :  { %2757 = vmatprep.subr.bf16.mxu0 %v3141_v46  ;;  %v3213_v46 = vld [vmem:[%s4199_s1 + $0x2e8] sm:$0xff]  }
  0x2a   :  { %2802 = vmatpush3.bf16.msra.mxu1 %v3144_v49  ;;  %v3216_v49 = vld [vmem:[%s4199_s1 + $0x2e0] sm:$0xff]  }
  0x2b   :  { %1719 = vmatmul.mubr.bf16.gmra.mxu0 %v3137_v42  ;;  %2803 = vmatprep.subr.bf16.mxu1 %v3153_v56  ;;  %v3209_v42 = vld [vmem:[%s4199_s1 + $0x260] sm:$0xff]   ;;  %v3225_v56 = vld [vmem:[%s4199_s1 + $0x2d8] sm:$0xff]  }
  0x2c   :  { %1791 = vmatmul.mubr.bf16.gmra.mxu1 %v3138_v43  ;;  %2758 = vmatpush3.bf16.msra.mxu0 %v3142_v47  ;;  %v3210_v43 = vld [vmem:[%s4200_s0 + $0x130] ss:$72 sps:$4 sm:$0xff]   ;;  %v3214_v47 = vld [vmem:[%s4199_s1 + $0x2a8] sm:$0xff]  }
  0x2d   :  { %1726 = vmatprep.mubr.bf16.mxu0 %v3145_v50  ;;  %1798 = vmatprep.mubr.bf16.mxu1 %v3147_v51  ;;  %v3217_v50 = vld [vmem:[%s4199_s1 + $0x218] sm:$0xff]   ;;  %v3218_v51 = vld [vmem:[%s4199_s1 + $0x2a0] sm:$0xff]  }
  0x2e   :  { %2759 = vmatprep.subr.bf16.mxu0 %v3149_v52  ;;  %2804 = vmatpush3.bf16.msra.mxu1 %v3154_v57  ;;  %v3219_v52 = vld [vmem:[%s4200_s0 + $0x1c4] ss:$72 sps:$4 sm:$0xff]   ;;  %v3226_v57 = vld [vmem:[%s4199_s1 + $0x250] sm:$0xff]  }
  0x2f   :  { %2805 = vmatprep.subr.bf16.mxu1 %v3156_v59  ;;  %v3228_v59 = vld [vmem:[%s4199_s1 + $0x210] sm:$0xff]  }
  0x30   :  { %2760 = vmatpush3.bf16.msra.mxu0 %v3152_v55  ;;  %v3224_v55 = vld [vmem:[%s4200_s0 + $0x1c8] ss:$72 sps:$4 sm:$0xff]  }
  0x31   :  { %2761 = vmatprep.subr.bf16.mxu0 %v3155_v58  ;;  %v3227_v58 = vld [vmem:[%s4199_s1 + $0x298] sm:$0xff]  }
  0x32   :  { %2806 = vmatpush3.bf16.msra.mxu1 %v3158_v61  ;;  %v3230_v61 = vld [vmem:[%s4199_s1 + $0x290] sm:$0xff]  }
  0x33   :  { %1727 = vmatmul.mubr.bf16.gmra.mxu0 %v3150_v53  ;;  %2807 = vmatprep.subr.bf16.mxu1 %v3165_v2  ;;  %v3221_v53 = vld [vmem:[%s4200_s0 + $0x1cc] ss:$72 sps:$4 sm:$0xff]  }
  0x34   :  { %1799 = vmatmul.mubr.bf16.gmra.mxu1 %v3151_v54  ;;  %2762 = vmatpush3.bf16.msra.mxu0 %v3157_v60  ;;  %v3223_v54 = vld [vmem:[%s4200_s0 + $0x1c0] ss:$72 sps:$4 sm:$0xff]   ;;  %v3229_v60 = vld [vmem:[%s4199_s1 + $0x2d0] sm:$0xff]  }
  0x35   :  { %1734 = vmatprep.mubr.bf16.mxu0 %v3159_v62  ;;  %1806 = vmatprep.mubr.bf16.mxu1 %v3161_v63  ;;  %v3231_v62 = vld [vmem:[%s4199_s1 + $0x248] sm:$0xff]   ;;  %v89_v63 = vld [vmem:[%s4200_s0 + $0x250] sm:$0xff] }
  0x36   :  { %2763 = vmatprep.subr.bf16.mxu0 %v3166_v3  ;;  %2808 = vmatpush3.bf16.msra.mxu1 %v3167_v4  ;;  %v3234_v3 = vld [vmem:[%s4199_s1 + $0x208] sm:$0xff]   ;;  %v2462_v4 = vcombine.low %v89_v63, %v89_v63 }
  0x37   :  { %2809 = vmatprep.subr.bf16.mxu1 %v3169_v6  ;;  %v3237_v6 = vld [vmem:[%s4199_s1 + $0x2c8] sm:$0xff]  }
  0x38   :  { %2764 = vmatpush3.bf16.msra.mxu0 %v3168_v5 }
  0x39   :  { %2765 = vmatprep.subr.bf16.mxu0 %v3171_v8  ;;  %v3239_v8 = vld [vmem:[%s4199_s1 + $0x240] sm:$0xff]  }
  0x3a   :  { %2810 = vmatpush3.bf16.msra.mxu1 %v3170_v7  ;;  %v3238_v7 = vld [vmem:[%s4199_s1 + $0x288] sm:$0xff]  }
  0x3b   :  { %1735 = vmatmul.mubr.bf16.gmra.mxu0 %v3163_v0  ;;  %2811 = vmatprep.subr.bf16.mxu1 %v3177_v16  ;;  %v90_v0 = vld [vmem:[%s4200_s0 + $0x258] sm:$0xff] }
  0x3c   :  { %1807 = vmatmul.mubr.bf16.gmra.mxu1 %v3164_v1  ;;  %1742 = vmatprep.mubr.bf16.mxu0 %v2459_v10  ;;  %v2463_v1 = vcombine.high %v89_v63, %v89_v63  ;;  %v2465_v2 = vcombine.high %v90_v0, %v90_v0  ;;  %v2464_v5 = vcombine.low %v90_v0, %v90_v0  ;;  %v3241_v10 = vld [vmem:[%s4199_s1 + $0x2c0] sm:$0xff]   ;;  %v3249_v16 = vld [vmem:[%s4199_s1 + $0x378] sm:$0xff]  }
  0x3d   :  { %1814 = vmatprep.mubr.bf16.mxu1 %v2461_v13  ;;  %2766 = vmatpush3.bf16.msra.mxu0 %v3174_v14  ;;  %v3245_v13 = vld [vmem:[%s4200_s0 + $0x24] ss:$72 sps:$4 sm:$0xff]   ;;  %v3246_v14 = vld [vmem:[%s4200_s0 + $0x28] ss:$72 sps:$4 sm:$0xff]  }
  0x3e   :  { %2812 = vmatpush3.bf16.msra.mxu1 %v3178_v17  ;;  %2767 = vmatprep.subr.bf16.mxu0 %v3179_v18  ;;  %v3250_v17 = vld [vmem:[%s4199_s1 + $0x338] sm:$0xff]   ;;  %v3251_v18 = vld [vmem:[%s4199_s1 + $0x370] sm:$0xff]   ;;  %v3300_v63 = vld [vmem:[%s4199_s1 + $0x300] sm:$0xff]  }
  0x3f   :  { %2813 = vmatprep.subr.bf16.mxu1 %v3181_v20  ;;  %v3253_v20 = vld [vmem:[%s4200_s0 + $0xb4] ss:$72 sps:$4 sm:$0xff]   ;;  %v3301_v0 = vld [vmem:[%s4199_s1 + $0x3c0] sm:$0xff]  }
  0x41   :  { %2768 = vmatpush3.bf16.msra.mxu0 %v3180_v19  ;;  %v3252_v19 = vld [vmem:[%s4199_s1 + $0x330] sm:$0xff]  }
  0x42   :  { %2814 = vmatpush3.bf16.msra.mxu1 %v3182_v21  ;;  %2845 = vmatprep.subr.bf16.mxu0 %v3189_v26  ;;  %v3255_v21 = vld [vmem:[%s4200_s0 + $0xbc] ss:$72 sps:$4 sm:$0xff]   ;;  %v3261_v26 = vld [vmem:[%s4199_s1 + $0x368] sm:$0xff]  }
  0x43   :  { %1743 = vmatmul.mubr.bf16.gmra.mxu0 %v2458_v12  ;;  %2891 = vmatprep.subr.bf16.mxu1 %v3199_v34  ;;  %v3243_v12 = vld [vmem:[%s4200_s0 + $0x20] ss:$72 sps:$4 sm:$0xff]  }
  0x44   :  { %1815 = vmatmul.mubr.bf16.gmra.mxu1 %v2460_v15  ;;  %1854 = vmatprep.mubr.bf16.mxu0 %v3185_v23  ;;  %v3248_v15 = vld [vmem:[%s4200_s0 + $0x2c] ss:$72 sps:$4 sm:$0xff]   ;;  %v3258_v23 = vld [vmem:[%s4200_s0 + $0xb8] ss:$72 sps:$4 sm:$0xff]   ;;  %v3271_v34 = vld [vmem:[%s4200_s0 + $0x148] ss:$72 sps:$4 sm:$0xff]  }
  0x45   :  { %1926 = vmatprep.mubr.bf16.mxu1 %v3188_v25  ;;  %v3260_v25 = vld [vmem:[%s4199_s1 + $0x3b8] sm:$0xff]  }
  0x4b   :  { %1855 = vmatmul.mubr.bf16.vlgmr.msra.gmra.mxu0 %v3183_v22  ;;  %v3257_v22 = vld [vmem:[%s4200_s0 + $0xb0] ss:$72 sps:$4 sm:$0xff]  }
  0x4c   :  { %1927 = vmatmul.mubr.bf16.vlgmr.msra.gmra.mxu1 %v3186_v24  ;;  %2846 = vmatpush3.bf16.msra.mxu0 %v3190_v27  ;;  %v3259_v24 = vld [vmem:[%s4199_s1 + $0x3f8] sm:$0xff]   ;;  %v3262_v27 = vld [vmem:[%s4199_s1 + $0x328] sm:$0xff]  }
  0x4d   :  { %2847 = vmatprep.subr.bf16.mxu0 %v3191_v28  ;;  %1862 = vmatprep.mubr.bf16.mxu0 %v3193_v30  ;;  %v3263_v28 = vld [vmem:[%s4199_s1 + $0x3f0] sm:$0xff]   ;;  %v3265_v30 = vld [vmem:[%s4200_s0 + $0x144] ss:$72 sps:$4 sm:$0xff]  }
  0x4e   :  { %1934 = vmatprep.mubr.bf16.mxu1 %v3195_v31  ;;  %2892 = vmatpush3.bf16.msra.mxu1 %v3200_v35  ;;  %v3267_v31 = vld [vmem:[%s4200_s0 + $0x14c] ss:$72 sps:$4 sm:$0xff]   ;;  %v3272_v35 = vld [vmem:[%s4199_s1 + $0x320] sm:$0xff]  }
  0x4f   :  { %2893 = vmatprep.subr.bf16.mxu1 %v3203_v38  ;;  %v3275_v38 = vld [vmem:[%s4199_s1 + $0x358] sm:$0xff]  }
  0x50   :  { %2848 = vmatpush3.bf16.msra.mxu0 %v3192_v29  ;;  %v3264_v29 = vld [vmem:[%s4199_s1 + $0x3b0] sm:$0xff]  }
  0x51   :  { %2849 = vmatprep.subr.bf16.mxu0 %v3201_v36  ;;  %v3273_v36 = vld [vmem:[%s4199_s1 + $0x3e8] sm:$0xff]  }
  0x52   :  { %2894 = vmatpush3.bf16.msra.mxu1 %v3204_v39  ;;  %v3276_v39 = vld [vmem:[%s4199_s1 + $0x3e0] sm:$0xff]  }
  0x53   :  { %1863 = vmatmul.mubr.bf16.gmra.mxu0 %v3197_v32  ;;  %2895 = vmatprep.subr.bf16.mxu1 %v3213_v46  ;;  %v3269_v32 = vld [vmem:[%s4199_s1 + $0x360] sm:$0xff]   ;;  %v3285_v46 = vld [vmem:[%s4199_s1 + $0x3d8] sm:$0xff]  }
  0x54   :  { %1935 = vmatmul.mubr.bf16.gmra.mxu1 %v3198_v33  ;;  %2850 = vmatpush3.bf16.msra.mxu0 %v3202_v37  ;;  %v3270_v33 = vld [vmem:[%s4200_s0 + $0x140] ss:$72 sps:$4 sm:$0xff]  }
  0x55   :  { %1870 = vmatprep.mubr.bf16.mxu0 %v3205_v40  ;;  %1942 = vmatprep.mubr.bf16.mxu1 %v3207_v41  ;;  %v3274_v37 = vld [vmem:[%s4199_s1 + $0x3a8] sm:$0xff]   ;;  %v3277_v40 = vld [vmem:[%s4199_s1 + $0x318] sm:$0xff]   ;;  %v3278_v41 = vld [vmem:[%s4199_s1 + $0x3a0] sm:$0xff]  }
  0x56   :  { %2851 = vmatprep.subr.bf16.mxu0 %v3209_v42  ;;  %2896 = vmatpush3.bf16.msra.mxu1 %v3214_v47  ;;  %v3279_v42 = vld [vmem:[%s4200_s0 + $0x1d4] ss:$72 sps:$4 sm:$0xff]  }
  0x57   :  { %2897 = vmatprep.subr.bf16.mxu1 %v3216_v49  ;;  %v3286_v47 = vld [vmem:[%s4199_s1 + $0x350] sm:$0xff]  }
  0x58   :  { %2852 = vmatpush3.bf16.msra.mxu0 %v3212_v45  ;;  %v3284_v45 = vld [vmem:[%s4200_s0 + $0x1d8] ss:$72 sps:$4 sm:$0xff]   ;;  %v3288_v49 = vld [vmem:[%s4199_s1 + $0x310] sm:$0xff]  }
  0x59   :  { %2853 = vmatprep.subr.bf16.mxu0 %v3215_v48  ;;  %v3287_v48 = vld [vmem:[%s4199_s1 + $0x398] sm:$0xff]  }
  0x5a   :  { %2898 = vmatpush3.bf16.msra.mxu1 %v3218_v51  ;;  %v3290_v51 = vld [vmem:[%s4199_s1 + $0x390] sm:$0xff]  }
  0x5b   :  { %1871 = vmatmul.mubr.bf16.gmra.mxu0 %v3210_v43  ;;  %2899 = vmatprep.subr.bf16.mxu1 %v3225_v56  ;;  %v3281_v43 = vld [vmem:[%s4200_s0 + $0x1dc] ss:$72 sps:$4 sm:$0xff]  }
  0x5c   :  { %1943 = vmatmul.mubr.bf16.gmra.mxu1 %v3211_v44  ;;  %2854 = vmatpush3.bf16.msra.mxu0 %v3217_v50  ;;  %v3283_v44 = vld [vmem:[%s4200_s0 + $0x1d0] ss:$72 sps:$4 sm:$0xff]  }
  0x5d   :  { %1878 = vmatprep.mubr.bf16.mxu0 %v3219_v52  ;;  %1950 = vmatprep.mubr.bf16.mxu1 %v3221_v53  ;;  %v3289_v50 = vld [vmem:[%s4199_s1 + $0x3d0] sm:$0xff]   ;;  %v3291_v52 = vld [vmem:[%s4199_s1 + $0x348] sm:$0xff]   ;;  %v91_v53 = vld [vmem:[%s4200_s0 + $0x260] sm:$0xff] }
  0x5e   :  { %2855 = vmatprep.subr.bf16.mxu0 %v3226_v57  ;;  %2900 = vmatpush3.bf16.msra.mxu1 %v3227_v58  ;;  %v3294_v57 = vld [vmem:[%s4199_s1 + $0x308] sm:$0xff]   ;;  %v2466_v58 = vcombine.low %v91_v53, %v91_v53 }
  0x5f   :  { %2901 = vmatprep.subr.bf16.mxu1 %v3229_v60  ;;  %v3297_v60 = vld [vmem:[%s4199_s1 + $0x3c8] sm:$0xff]  }
  0x60   :  { %2856 = vmatpush3.bf16.msra.mxu0 %v3228_v59 }
  0x61   :  { %2857 = vmatprep.subr.bf16.mxu0 %v3231_v62  ;;  %v3299_v62 = vld [vmem:[%s4199_s1 + $0x340] sm:$0xff]  }
  0x62   :  { %2902 = vmatpush3.bf16.msra.mxu1 %v3230_v61  ;;  %v3298_v61 = vld [vmem:[%s4199_s1 + $0x388] sm:$0xff]  }
  0x63   :  { %1879 = vmatmul.mubr.bf16.gmra.mxu0 %v3223_v54  ;;  %2903 = vmatprep.subr.bf16.mxu1 %v3237_v6  ;;  %v92_v54 = vld [vmem:[%s4200_s0 + $0x268] sm:$0xff]  ;;  %v3309_v6 = vld [vmem:[%s4199_s1 + $0x478] sm:$0xff]  }
  0x64   :  { %1951 = vmatmul.mubr.bf16.gmra.mxu1 %v3224_v55  ;;  %1886 = vmatprep.mubr.bf16.mxu0 %v2463_v1  ;;  %v2467_v55 = vcombine.high %v91_v53, %v91_v53  ;;  %v2469_v56 = vcombine.high %v92_v54, %v92_v54  ;;  %v2468_v59 = vcombine.low %v92_v54, %v92_v54  ;;  %v3302_v1 = vld [vmem:[%s4199_s1 + $0x380] sm:$0xff]  }
  0x65   :  { %1958 = vmatprep.mubr.bf16.mxu1 %v2465_v2  ;;  %2858 = vmatpush3.bf16.msra.mxu0 %v3234_v3  ;;  %v3303_v2 = vld [vmem:[%s4200_s0 + $0x30] ss:$72 sps:$4 sm:$0xff]   ;;  %v3305_v3 = vld [vmem:[%s4200_s0 + $0x34] ss:$72 sps:$4 sm:$0xff]   ;;  %v4059_v53 = vld [vmem:[%s4201_s2] ss:$0 sm:$0xff] }
  0x66   :  { %2904 = vmatpush3.bf16.msra.mxu1 %v3238_v7  ;;  %2859 = vmatprep.subr.bf16.mxu0 %v3239_v8  ;;  %v3310_v7 = vld [vmem:[%s4199_s1 + $0x438] sm:$0xff]   ;;  %v3311_v8 = vld [vmem:[%s4199_s1 + $0x470] sm:$0xff]  }
  0x67   :  { %2905 = vmatprep.subr.bf16.mxu1 %v3241_v10  ;;  %v3313_v10 = vld [vmem:[%s4200_s0 + $0xc4] ss:$72 sps:$4 sm:$0xff]  }
  0x69   :  { %2860 = vmatpush3.bf16.msra.mxu0 %v3240_v9  ;;  %v3312_v9 = vld [vmem:[%s4199_s1 + $0x430] sm:$0xff]  }
  0x6a   :  { %2906 = vmatpush3.bf16.msra.mxu1 %v3242_v11  ;;  %2937 = vmatprep.subr.bf16.mxu0 %v3249_v16  ;;  %v3315_v11 = vld [vmem:[%s4200_s0 + $0xcc] ss:$72 sps:$4 sm:$0xff]  }
  0x6b   :  { %1887 = vmatmul.mubr.bf16.gmra.mxu0 %v2462_v4  ;;  %2983 = vmatprep.subr.bf16.mxu1 %v3259_v24  ;;  %v3306_v4 = vld [vmem:[%s4200_s0 + $0x38] ss:$72 sps:$4 sm:$0xff]   ;;  %v3321_v16 = vld [vmem:[%s4200_s0 + $0x154] ss:$72 sps:$4 sm:$0xff]   ;;  %v3331_v24 = vld [vmem:[%s4200_s0 + $0x1e4] ss:$72 sps:$4 sm:$0xff]  }
  0x6c   :  { %1959 = vmatmul.mubr.bf16.gmra.mxu1 %v2464_v5  ;;  %1998 = vmatprep.mubr.bf16.mxu0 %v3245_v13  ;;  %v3308_v5 = vld [vmem:[%s4200_s0 + $0x3c] ss:$72 sps:$4 sm:$0xff]   ;;  %v3318_v13 = vld [vmem:[%s4200_s0 + $0xc8] ss:$72 sps:$4 sm:$0xff]  }
  0x6d   :  { %2070 = vmatprep.mubr.bf16.mxu1 %v3248_v15  ;;  %v3320_v15 = vld [vmem:[%s4199_s1 + $0x428] sm:$0xff]  }
  0x73   :  { %1999 = vmatmul.mubr.bf16.vlgmr.msra.gmra.mxu0 %v3243_v12  ;;  %v3317_v12 = vld [vmem:[%s4200_s0 + $0xc0] ss:$72 sps:$4 sm:$0xff]  }
  0x74   :  { %2071 = vmatmul.mubr.bf16.vlgmr.msra.gmra.mxu1 %v3246_v14  ;;  %2938 = vmatpush3.bf16.msra.mxu0 %v3250_v17  ;;  %v3319_v14 = vld [vmem:[%s4199_s1 + $0x468] sm:$0xff]   ;;  %v3323_v17 = vld [vmem:[%s4200_s0 + $0x15c] ss:$72 sps:$4 sm:$0xff]  }
  0x75   :  { %2939 = vmatprep.subr.bf16.mxu0 %v3251_v18  ;;  %2006 = vmatprep.mubr.bf16.mxu0 %v3253_v20  ;;  %v3325_v18 = vld [vmem:[%s4199_s1 + $0x460] sm:$0xff]  }
  0x76   :  { %2078 = vmatprep.mubr.bf16.mxu1 %v3255_v21  ;;  %2984 = vmatpush3.bf16.msra.mxu1 %v3260_v25  ;;  %v3327_v20 = vld [vmem:[%s4200_s0 + $0x158] ss:$72 sps:$4 sm:$0xff]   ;;  %v3333_v25 = vld [vmem:[%s4200_s0 + $0x1ec] ss:$72 sps:$4 sm:$0xff]  }
  0x77   :  { %2985 = vmatprep.subr.bf16.mxu1 %v3263_v28  ;;  %v3328_v21 = vld [vmem:[%s4199_s1 + $0x420] sm:$0xff]  }
  0x78   :  { %2940 = vmatpush3.bf16.msra.mxu0 %v3252_v19  ;;  %v3326_v19 = vld [vmem:[%s4200_s0 + $0x150] ss:$72 sps:$4 sm:$0xff]   ;;  %v3335_v28 = vld [vmem:[%s4200_s0 + $0x1e0] ss:$72 sps:$4 sm:$0xff]  }
  0x79   :  { %2941 = vmatprep.subr.bf16.mxu0 %v3261_v26  ;;  %v3337_v26 = vld [vmem:[%s4199_s1 + $0x450] sm:$0xff]  }
  0x7a   :  { %2986 = vmatpush3.bf16.msra.mxu1 %v3264_v29  ;;  %v3339_v29 = vld [vmem:[%s4199_s1 + $0x448] sm:$0xff]  }
  0x7b   :  { %2007 = vmatmul.mubr.bf16.gmra.mxu0 %v3257_v22  ;;  %2987 = vmatprep.subr.bf16.mxu1 %v3273_v36  ;;  %v3329_v22 = vld [vmem:[%s4199_s1 + $0x458] sm:$0xff]   ;;  %v3345_v36 = vld [vmem:[%s4199_s1 + $0x440] sm:$0xff]  }
  0x7c   :  { %2079 = vmatmul.mubr.bf16.gmra.mxu1 %v3258_v23  ;;  %2942 = vmatpush3.bf16.msra.mxu0 %v3262_v27  ;;  %v3330_v23 = vld [vmem:[%s4199_s1 + $0x418] sm:$0xff]   ;;  %v3338_v27 = vld [vmem:[%s4199_s1 + $0x410] sm:$0xff]  }
  0x7d   :  { %2014 = vmatprep.mubr.bf16.mxu0 %v3265_v30  ;;  %2086 = vmatprep.mubr.bf16.mxu1 %v3267_v31  ;;  %v93_v30 = vld [vmem:[%s4200_s0 + $0x270] sm:$0xff]  ;;  %v94_v31 = vld [vmem:[%s4200_s0 + $0x278] sm:$0xff] }
  0x7e   :  { %2943 = vmatprep.subr.bf16.mxu0 %v3269_v32  ;;  %2988 = vmatpush3.bf16.msra.mxu1 %v3274_v37  ;;  %v3336_v32 = vld [vmem:[%s4200_s0 + $0x1e8] ss:$72 sps:$4 sm:$0xff]   ;;  %v3346_v37 = vld [vmem:[%s4199_s1 + $0x400] sm:$0xff]  }
  0x7f   :  { %2989 = vmatprep.subr.bf16.mxu1 %v3276_v39  ;;  %v2472_v39 = vcombine.low %v94_v31, %v94_v31 }
  0x80   :  { %2944 = vmatpush3.bf16.msra.mxu0 %v3272_v35  ;;  %v3342_v35 = vld [vmem:[%s4199_s1 + $0x408] sm:$0xff]  }
  0x81   :  { %2945 = vmatprep.subr.bf16.mxu0 %v3275_v38  ;;  %v2470_v38 = vcombine.low %v93_v30, %v93_v30 }
  0x82   :  { %2990 = vmatpush3.bf16.msra.mxu1 %v3278_v41  ;;  %v3352_v41 = vld [vmem:[%s4200_s0 + $0x1f4] ss:$72 sps:$4 sm:$0xff]  }
  0x83   :  { %2015 = vmatmul.mubr.bf16.gmra.mxu0 %v3270_v33  ;;  %2991 = vmatprep.subr.bf16.mxu1 %v3285_v46  ;;  %v2471_v33 = vcombine.high %v93_v30, %v93_v30 }
  0x84   :  { %2087 = vmatmul.mubr.bf16.gmra.mxu1 %v3271_v34  ;;  %2946 = vmatpush3.bf16.msra.mxu0 %v3277_v40  ;;  %v2473_v34 = vcombine.high %v94_v31, %v94_v31  ;;  %v3349_v40 = vld [vmem:[%s4200_s0 + $0x44] ss:$72 sps:$4 sm:$0xff]  }
  0x85   :  { %2022 = vmatprep.mubr.bf16.mxu0 %v3279_v42  ;;  %2094 = vmatprep.mubr.bf16.mxu1 %v3281_v43  ;;  %v95_v42 = vld [vmem:[%s4200_s0 + $0x280] sm:$0xff] }
  0x86   :  { %2947 = vmatprep.subr.bf16.mxu0 %v3286_v47  ;;  %2992 = vmatpush3.bf16.msra.mxu1 %v3287_v48  ;;  %v3347_v43 = vld [vmem:[%s4200_s0 + $0x40] ss:$72 sps:$4 sm:$0xff]   ;;  %v2475_v46 = vcombine.high %v95_v42, %v95_v42  ;;  %v3356_v47 = vld [vmem:[%s4200_s0 + $0xd0] ss:$72 sps:$4 sm:$0xff]   ;;  %v2474_v48 = vcombine.low %v95_v42, %v95_v42 }
  0x87   :  { %2993 = vmatprep.subr.bf16.mxu1 %v3289_v50  ;;  %v3360_v50 = vld [vmem:[%s4200_s0 + $0x160] ss:$72 sps:$4 sm:$0xff]  }
  0x88   :  { %2948 = vmatpush3.bf16.msra.mxu0 %v3288_v49  ;;  %v3358_v49 = vld [vmem:[%s4200_s0 + $0x164] ss:$72 sps:$4 sm:$0xff]  }
  0x89   :  { %2949 = vmatprep.subr.bf16.mxu0 %v3291_v52 }
  0x8a   :  { %2994 = vmatpush3.bf16.msra.mxu1 %v3290_v51 }
  0x8b   :  { %2023 = vmatmul.mubr.bf16.gmra.mxu0 %v3283_v44  ;;  %2995 = vmatprep.subr.bf16.mxu1 %v3297_v60  ;;  %v3350_v44 = vld [vmem:[%s4200_s0 + $0x1f0] ss:$72 sps:$4 sm:$0xff]  }
  0x8c   :  { %2095 = vmatmul.mubr.bf16.gmra.mxu1 %v3284_v45  ;;  %2030 = vmatprep.mubr.bf16.mxu0 %v2467_v55  ;;  %v3353_v45 = vld [vmem:[%s4200_s0 + $0xd4] ss:$72 sps:$4 sm:$0xff]  }
  0x8d   :  { %2102 = vmatprep.mubr.bf16.mxu1 %v2469_v56  ;;  %2950 = vmatpush3.bf16.msra.mxu0 %v3294_v57 }
  0x8e   :  { %2996 = vmatpush3.bf16.msra.mxu1 %v3298_v61  ;;  %2951 = vmatprep.subr.bf16.mxu0 %v3299_v62 }
  0x8f   :  { %2997 = vmatprep.subr.bf16.mxu1 %v3301_v0 }
  0x91   :  { %2952 = vmatpush3.bf16.msra.mxu0 %v3300_v63 }
  0x92   :  { %2998 = vmatpush3.bf16.msra.mxu1 %v3302_v1  ;;  %3029 = vmatprep.subr.bf16.mxu0 %v3309_v6 }
  0x93   :  { %2031 = vmatmul.mubr.bf16.gmra.mxu0 %v2466_v58  ;;  %3075 = vmatprep.subr.bf16.mxu1 %v3309_v6 }
  0x94   :  { %2103 = vmatmul.mubr.bf16.gmra.mxu1 %v2468_v59  ;;  %2142 = vmatprep.mubr.bf16.mxu0 %v3305_v3 }
  0x95   :  { %2214 = vmatprep.mubr.bf16.mxu1 %v3308_v5 }
  0x9b   :  { %2143 = vmatmul.mubr.bf16.vlgmr.msra.gmra.mxu0 %v3303_v2 }
  0x9c   :  { %2215 = vmatmul.mubr.bf16.vlgmr.msra.gmra.mxu1 %v3306_v4  ;;  %3030 = vmatpush3.bf16.msra.mxu0 %v3310_v7 }
  0x9d   :  { %3083 = vmatpush3.bf16.msra.mxu1 %v3310_v7  ;;  %3031 = vmatprep.subr.bf16.mxu0 %v3311_v8 }
  0x9e   :  { %3076 = vmatprep.subr.bf16.mxu1 %v3311_v8  ;;  %2150 = vmatprep.mubr.bf16.mxu0 %v3313_v10 }
  0x9f   :  { %2222 = vmatprep.mubr.bf16.mxu1 %v3315_v11 }
  0xa0   :  { %3032 = vmatpush3.bf16.msra.mxu0 %v3312_v9 }
  0xa1   :  { %3084 = vmatpush3.bf16.msra.mxu1 %v3312_v9  ;;  %3033 = vmatprep.subr.bf16.mxu0 %v3319_v14 }
  0xa2   :  { %3077 = vmatprep.subr.bf16.mxu1 %v3319_v14 }
  0xa3   :  { %2151 = vmatmul.mubr.bf16.gmra.mxu0 %v3317_v12 }
  0xa4   :  { %2223 = vmatmul.mubr.bf16.gmra.mxu1 %v3318_v13  ;;  %2158 = vmatprep.mubr.bf16.mxu0 %v3321_v16 }
  0xa5   :  { %3034 = vmatpush3.bf16.msra.mxu0 %v3320_v15  ;;  %2230 = vmatprep.mubr.bf16.mxu1 %v3323_v17 }
  0xa6   :  { %3035 = vmatprep.subr.bf16.mxu0 %v3325_v18  ;;  %3085 = vmatpush3.bf16.msra.mxu1 %v3320_v15 }
  0xa7   :  { %3078 = vmatprep.subr.bf16.mxu1 %v3325_v18 }
  0xa9   :  { %3036 = vmatpush3.bf16.msra.mxu0 %v3328_v21 }
  0xaa   :  { %3037 = vmatprep.subr.bf16.mxu0 %v3329_v22  ;;  %3086 = vmatpush3.bf16.msra.mxu1 %v3328_v21 }
  0xab   :  { %2159 = vmatmul.mubr.bf16.gmra.mxu0 %v3326_v19  ;;  %3079 = vmatprep.subr.bf16.mxu1 %v3329_v22 }
  0xac   :  { %2231 = vmatmul.mubr.bf16.gmra.mxu1 %v3327_v20  ;;  %2166 = vmatprep.mubr.bf16.mxu0 %v3331_v24 }
  0xad   :  { %2238 = vmatprep.mubr.bf16.mxu1 %v3333_v25  ;;  %3038 = vmatpush3.bf16.msra.mxu0 %v3330_v23 }
  0xae   :  { %3087 = vmatpush3.bf16.msra.mxu1 %v3330_v23  ;;  %3039 = vmatprep.subr.bf16.mxu0 %v3337_v26 }
  0xaf   :  { %3080 = vmatprep.subr.bf16.mxu1 %v3337_v26 }
  0xb1   :  { %3040 = vmatpush3.bf16.msra.mxu0 %v3338_v27 }
  0xb2   :  { %3088 = vmatpush3.bf16.msra.mxu1 %v3338_v27  ;;  %3041 = vmatprep.subr.bf16.mxu0 %v3339_v29 }
  0xb3   :  { %2167 = vmatmul.mubr.bf16.gmra.mxu0 %v3335_v28  ;;  %3081 = vmatprep.subr.bf16.mxu1 %v3339_v29 }
  0xb4   :  { %2239 = vmatmul.mubr.bf16.gmra.mxu1 %v3336_v32  ;;  %2174 = vmatprep.mubr.bf16.mxu0 %v2471_v33 }
  0xb5   :  { %2246 = vmatprep.mubr.bf16.mxu1 %v2473_v34  ;;  %3042 = vmatpush3.bf16.msra.mxu0 %v3342_v35 }
  0xb6   :  { %3089 = vmatpush3.bf16.msra.mxu1 %v3342_v35  ;;  %3043 = vmatprep.subr.bf16.mxu0 %v3345_v36 }
  0xb7   :  { %3082 = vmatprep.subr.bf16.mxu1 %v3345_v36 }
  0xb9   :  { %3044 = vmatpush3.bf16.msra.mxu0 %v3346_v37 }
  0xba   :  { %3090 = vmatpush3.bf16.msra.mxu1 %v3346_v37 }
  0xbb   :  { %2175 = vmatmul.mubr.bf16.gmra.mxu0 %v2470_v38 }
  0xbc   :  { %2247 = vmatmul.mubr.bf16.gmra.mxu1 %v2472_v39  ;;  %2286 = vmatprep.mubr.bf16.mxu0 %v3349_v40 }
  0xbd   :  { %2310 = vmatprep.mubr.bf16.mxu1 %v3352_v41 }
  0xc3   :  { %2287 = vmatmul.mubr.bf16.vlgmr.msra.gmra.mxu0 %v3347_v43 }
  0xc4   :  { %2311 = vmatmul.mubr.bf16.vlgmr.msra.gmra.mxu1 %v3350_v44  ;;  %2294 = vmatprep.mubr.bf16.mxu0 %v3353_v45 }
  0xc5   :  { %2318 = vmatprep.mubr.bf16.mxu1 %v2475_v46 }
  0xcb   :  { %2295 = vmatmul.mubr.bf16.gmra.mxu0 %v3356_v47 }
  0xcc   :  { %2319 = vmatmul.mubr.bf16.gmra.mxu1 %v2474_v48  ;;  %2302 = vmatprep.mubr.bf16.mxu0 %v3358_v49 }
  0xd3   :  { %2303 = vmatmul.mubr.bf16.gmra.mxu0 %v3360_v50 }
  0xe3   :  { %v2677_v51 = vpop.f32.mrf.mxu0 }
  0xe4   :  { %v2723_v52 = vpop.f32.mrf.mxu1 }
  0xe5   :  { %v2678_v54 = vpop.f32.mrf.mxu0 }
  0xe6   :  { %v2679_v55 = vadd.f32 %v2678_v54, %v2677_v51  ;;  %v2724_v56 = vpop.f32.mrf.mxu1 }
  0xe7   :  { %v2725_v57 = vadd.f32 %v2724_v56, %v2723_v52  ;;  %v2680_v58 = vpop.f32.mrf.mxu0 }
  0xe8   :  { %v1713_v59 = vadd.f32 %v2679_v55, %v4059_v53  ;;  %v2726_v60 = vpop.f32.mrf.mxu1 }
  0xe9   :  { %v2681_v61 = vpop.f32.mrf.mxu0 }
  0xea   :  { %v4062_v62 = vadd.f32 %v2725_v57, %v1713_v59  ;;  %v2682_v63 = vadd.f32 %v2681_v61, %v2680_v58  ;;  %v2727_v0 = vpop.f32.mrf.mxu1 }
  0xeb   :  { %v2728_v1 = vadd.f32 %v2727_v0, %v2726_v60  ;;  %v2683_v2 = vpop.f32.mrf.mxu0 }
  0xec   :  { %v1716_v3 = vadd.f32 %v2682_v63, %v4059_v53  ;;  %v2729_v4 = vpop.f32.mrf.mxu1 }
  0xed   :  { %v2684_v5 = vpop.f32.mrf.mxu0 }
  0xee   :  { %v4065_v6 = vadd.f32 %v2728_v1, %v1716_v3  ;;  %v2685_v7 = vadd.f32 %v2684_v5, %v2683_v2  ;;  %v2730_v8 = vpop.f32.mrf.mxu1 }
  0xef   :  { %v2731_v9 = vadd.f32 %v2730_v8, %v2729_v4  ;;  %v2686_v10 = vpop.f32.mrf.mxu0 }
  0xf0   :  { %v1721_v11 = vadd.f32 %v2685_v7, %v4059_v53  ;;  %v2732_v12 = vpop.f32.mrf.mxu1 }
  0xf1   :  { %v2687_v13 = vpop.f32.mrf.mxu0 }
  0xf2   :  { %v4068_v14 = vadd.f32 %v2731_v9, %v1721_v11  ;;  %v2688_v15 = vadd.f32 %v2687_v13, %v2686_v10  ;;  %v2733_v16 = vpop.f32.mrf.mxu1 }
  0xf3   :  { %v2734_v17 = vadd.f32 %v2733_v16, %v2732_v12  ;;  %v2689_v18 = vpop.f32.mrf.mxu0 }
  0xf4   :  { %v1724_v19 = vadd.f32 %v2688_v15, %v4059_v53  ;;  %v2735_v20 = vpop.f32.mrf.mxu1 }
  0xf5   :  { %v2690_v21 = vpop.f32.mrf.mxu0 }
  0xf6   :  { %v4071_v22 = vadd.f32 %v2734_v17, %v1724_v19  ;;  %v2691_v23 = vadd.f32 %v2690_v21, %v2689_v18  ;;  %v2736_v24 = vpop.f32.mrf.mxu1 }
  0xf7   :  { %v2737_v25 = vadd.f32 %v2736_v24, %v2735_v20  ;;  %v2692_v26 = vpop.f32.mrf.mxu0 }
  0xf8   :  { %v1729_v27 = vadd.f32 %v2691_v23, %v4059_v53  ;;  %v2738_v28 = vpop.f32.mrf.mxu1 }
  0xf9   :  { %v2693_v29 = vpop.f32.mrf.mxu0 }
  0xfa   :  { %v4074_v30 = vadd.f32 %v2737_v25, %v1729_v27  ;;  %v2694_v31 = vadd.f32 %v2693_v29, %v2692_v26  ;;  %v2739_v32 = vpop.f32.mrf.mxu1 }
  0xfb   :  { %v2740_v33 = vadd.f32 %v2739_v32, %v2738_v28  ;;  %v2695_v35 = vpop.f32.mrf.mxu0 }
  0xfc   :  { %v1732_v34 = vadd.f32 %v2694_v31, %v4059_v53  ;;  %v2741_v36 = vpop.f32.mrf.mxu1 }
  0xfd   :  { %v2696_v38 = vpop.f32.mrf.mxu0 }
  0xfe   :  { %v4077_v37 = vadd.f32 %v2740_v33, %v1732_v34  ;;  %v2742_v39 = vpop.f32.mrf.mxu1  ;;  %v2697_v40 = vadd.f32 %v2696_v38, %v2695_v35 }
  0xff   :  { %v2743_v41 = vadd.f32 %v2742_v39, %v2741_v36  ;;  %v2698_v42 = vpop.f32.mrf.mxu0 }
 0x100   :  { %v2744_v43 = vpop.f32.mrf.mxu1  ;;  %v1737_v44 = vadd.f32 %v2697_v40, %v4059_v53 }
 0x101   :  { %v2699_v45 = vpop.f32.mrf.mxu0 }
 0x102   :  { %v2745_v46 = vpop.f32.mrf.mxu1  ;;  %v4080_v47 = vadd.f32 %v2743_v41, %v1737_v44  ;;  %v2700_v48 = vadd.f32 %v2699_v45, %v2698_v42 }
 0x103   :  { %v2746_v49 = vadd.f32 %v2745_v46, %v2744_v43  ;;  %v2701_v51 = vpop.f32.mrf.mxu0 }
 0x104   :  { %v1740_v50 = vadd.f32 %v2700_v48, %v4059_v53  ;;  %v2747_v52 = vpop.f32.mrf.mxu1 }
 0x105   :  { %v2702_v55 = vpop.f32.mrf.mxu0 }
 0x106   :  { %v4083_v54 = vadd.f32 %v2746_v49, %v1740_v50  ;;  %v2748_v56 = vpop.f32.mrf.mxu1  ;;  %v2703_v57 = vadd.f32 %v2702_v55, %v2701_v51 }
 0x107   :  { %v2749_v58 = vadd.f32 %v2748_v56, %v2747_v52  ;;  %v2704_v59 = vpop.f32.mrf.mxu0 }
 0x108   :  { %v2750_v60 = vpop.f32.mrf.mxu1  ;;  %v1745_v61 = vadd.f32 %v2703_v57, %v4059_v53 }
 0x109   :  { %v2705_v63 = vpop.f32.mrf.mxu0 }
 0x10a   :  { %v2751_v0 = vpop.f32.mrf.mxu1  ;;  %v4086_v1 = vadd.f32 %v2749_v58, %v1745_v61 }
 0x10b   :  { %v2769_v2 = vpop.f32.mrf.mxu0 }
 0x10c   :  { %v2815_v3 = vpop.f32.mrf.mxu1 }
 0x10d   :  { %v2770_v4 = vpop.f32.mrf.mxu0 }
 0x10e   :  { %v2771_v5 = vadd.f32 %v2770_v4, %v2769_v2  ;;  %v2816_v7 = vpop.f32.mrf.mxu1 }
 0x10f   :  { %v2817_v8 = vadd.f32 %v2816_v7, %v2815_v3  ;;  %v2772_v9 = vpop.f32.mrf.mxu0 }
 0x110   :  { %v1857_v10 = vadd.f32 %v2771_v5, %v4062_v62  ;;  %v2818_v11 = vpop.f32.mrf.mxu1 }
 0x111   :  { %v2773_v12 = vpop.f32.mrf.mxu0 }
 0x112   :  { %v4089_v13 = vadd.f32 %v2817_v8, %v1857_v10  ;;  %v2774_v15 = vadd.f32 %v2773_v12, %v2772_v9  ;;  %v2819_v16 = vpop.f32.mrf.mxu1 }
 0x113   :  { %v2820_v53 = vadd.f32 %v2819_v16, %v2818_v11  ;;  %v2775_v17 = vpop.f32.mrf.mxu0 }
 0x114   :  { %v1860_v18 = vadd.f32 %v2774_v15, %v4065_v6  ;;  %v2821_v19 = vpop.f32.mrf.mxu1 }
 0x115   :  { %v2776_v20 = vpop.f32.mrf.mxu0 }
 0x116   :  { %v4092_v21 = vadd.f32 %v2820_v53, %v1860_v18  ;;  %v2777_v23 = vadd.f32 %v2776_v20, %v2775_v17  ;;  %v2822_v24 = vpop.f32.mrf.mxu1 }
 0x117   :  { %v2823_v25 = vadd.f32 %v2822_v24, %v2821_v19  ;;  %v2778_v26 = vpop.f32.mrf.mxu0 }
 0x118   :  { %v1865_v62 = vadd.f32 %v2777_v23, %v4068_v14  ;;  %v2824_v27 = vpop.f32.mrf.mxu1 }
 0x119   :  { %v2779_v28 = vpop.f32.mrf.mxu0 }
 0x11a   :  { %v4095_v29 = vadd.f32 %v2823_v25, %v1865_v62  ;;  %v2780_v31 = vadd.f32 %v2779_v28, %v2778_v26  ;;  %v2825_v32 = vpop.f32.mrf.mxu1 }
 0x11b   :  { %v2826_v33 = vadd.f32 %v2825_v32, %v2824_v27  ;;  %v2781_v34 = vpop.f32.mrf.mxu0 }
 0x11c   :  { %v1868_v6 = vadd.f32 %v2780_v31, %v4071_v22  ;;  %v2827_v35 = vpop.f32.mrf.mxu1 }
 0x11d   :  { %v2782_v36 = vpop.f32.mrf.mxu0 }
 0x11e   :  { %v4098_v38 = vadd.f32 %v2826_v33, %v1868_v6  ;;  %v2783_v39 = vadd.f32 %v2782_v36, %v2781_v34  ;;  %v2828_v40 = vpop.f32.mrf.mxu1 }
 0x11f   :  { %v2829_v41 = vadd.f32 %v2828_v40, %v2827_v35  ;;  %v2784_v42 = vpop.f32.mrf.mxu0 }
 0x120   :  { %v1873_v14 = vadd.f32 %v2783_v39, %v4074_v30  ;;  %v2830_v43 = vpop.f32.mrf.mxu1 }
 0x121   :  { %v2785_v44 = vpop.f32.mrf.mxu0 }
 0x122   :  { %v4101_v45 = vadd.f32 %v2829_v41, %v1873_v14  ;;  %v2786_v46 = vadd.f32 %v2785_v44, %v2784_v42  ;;  %v2831_v48 = vpop.f32.mrf.mxu1 }
 0x123   :  { %v2832_v49 = vadd.f32 %v2831_v48, %v2830_v43  ;;  %v2787_v22 = vpop.f32.mrf.mxu0 }
 0x124   :  { %v1876_v50 = vadd.f32 %v2786_v46, %v4077_v37  ;;  %v2833_v51 = vpop.f32.mrf.mxu1 }
 0x125   :  { %v2788_v55 = vpop.f32.mrf.mxu0 }
 0x126   :  { %v4104_v52 = vadd.f32 %v2832_v49, %v1876_v50  ;;  %v2789_v56 = vadd.f32 %v2788_v55, %v2787_v22  ;;  %v2834_v57 = vpop.f32.mrf.mxu1 }
 0x127   :  { %v2835_v58 = vadd.f32 %v2834_v57, %v2833_v51  ;;  %v2790_v59 = vpop.f32.mrf.mxu0 }
 0x128   :  { %v1881_v30 = vadd.f32 %v2789_v56, %v4080_v47  ;;  %v2836_v60 = vpop.f32.mrf.mxu1 }
 0x129   :  { %v2791_v61 = vpop.f32.mrf.mxu0 }
 0x12a   :  { %v4107_v63 = vadd.f32 %v2835_v58, %v1881_v30  ;;  %v2792_v0 = vadd.f32 %v2791_v61, %v2790_v59  ;;  %v2837_v2 = vpop.f32.mrf.mxu1 }
 0x12b   :  { %v2838_v3 = vadd.f32 %v2837_v2, %v2836_v60  ;;  %v2793_v7 = vpop.f32.mrf.mxu0 }
 0x12c   :  { %v1884_v37 = vadd.f32 %v2792_v0, %v4083_v54  ;;  %v2839_v4 = vpop.f32.mrf.mxu1 }
 0x12d   :  { %v2794_v9 = vpop.f32.mrf.mxu0 }
 0x12e   :  { %v4110_v5 = vadd.f32 %v2838_v3, %v1884_v37  ;;  %v2840_v8 = vpop.f32.mrf.mxu1  ;;  %v2795_v11 = vadd.f32 %v2794_v9, %v2793_v7 }
 0x12f   :  { %v2841_v10 = vadd.f32 %v2840_v8, %v2839_v4  ;;  %v2796_v15 = vpop.f32.mrf.mxu0 }
 0x130   :  { %v2842_v12 = vpop.f32.mrf.mxu1  ;;  %v1889_v47 = vadd.f32 %v2795_v11, %v4086_v1 }
 0x131   :  { %v2797_v53 = vpop.f32.mrf.mxu0 }
 0x132   :  { %v2843_v16 = vpop.f32.mrf.mxu1  ;;  %v4113_v17 = vadd.f32 %v2841_v10, %v1889_v47 }
 0x133   :  { %v2861_v18 = vpop.f32.mrf.mxu0 }
 0x134   :  { %v2907_v19 = vpop.f32.mrf.mxu1 }
 0x135   :  { %v2862_v20 = vpop.f32.mrf.mxu0 }
 0x136   :  { %v2908_v54 = vpop.f32.mrf.mxu1  ;;  %v2863_v23 = vadd.f32 %v2862_v20, %v2861_v18 }
 0x137   :  { %v2909_v24 = vadd.f32 %v2908_v54, %v2907_v19  ;;  %v2864_v25 = vpop.f32.mrf.mxu0 }
 0x138   :  { %v2910_v26 = vpop.f32.mrf.mxu1  ;;  %v2001_v62 = vadd.f32 %v2863_v23, %v4089_v13 }
 0x139   :  { %v2865_v27 = vpop.f32.mrf.mxu0 }
 0x13a   :  { %v2911_v28 = vpop.f32.mrf.mxu1  ;;  %v4116_v31 = vadd.f32 %v2909_v24, %v2001_v62  ;;  %v2866_v32 = vadd.f32 %v2865_v27, %v2864_v25 }
 0x13b   :  { %v2912_v1 = vadd.f32 %v2911_v28, %v2910_v26  ;;  %v2867_v33 = vpop.f32.mrf.mxu0 }
 0x13c   :  { %v2913_v34 = vpop.f32.mrf.mxu1  ;;  %v2004_v6 = vadd.f32 %v2866_v32, %v4092_v21 }
 0x13d   :  { %v2868_v35 = vpop.f32.mrf.mxu0 }
 0x13e   :  { %v2914_v36 = vpop.f32.mrf.mxu1  ;;  %v4119_v39 = vadd.f32 %v2912_v1, %v2004_v6  ;;  %v2869_v40 = vadd.f32 %v2868_v35, %v2867_v33 }
 0x13f   :  { %v2915_v41 = vadd.f32 %v2914_v36, %v2913_v34  ;;  %v2870_v42 = vpop.f32.mrf.mxu0 }
 0x140   :  { %v2916_v14 = vpop.f32.mrf.mxu1  ;;  %v2009_v13 = vadd.f32 %v2869_v40, %v4095_v29 }
 0x141   :  { %v2871_v43 = vpop.f32.mrf.mxu0 }
 0x142   :  { %v2917_v44 = vpop.f32.mrf.mxu1  ;;  %v4122_v46 = vadd.f32 %v2915_v41, %v2009_v13  ;;  %v2872_v48 = vadd.f32 %v2871_v43, %v2870_v42 }
 0x143   :  { %v2918_v49 = vadd.f32 %v2917_v44, %v2916_v14  ;;  %v2873_v50 = vpop.f32.mrf.mxu0 }
 0x144   :  { %v2919_v22 = vpop.f32.mrf.mxu1  ;;  %v2012_v21 = vadd.f32 %v2872_v48, %v4098_v38 }
 0x145   :  { %v2874_v51 = vpop.f32.mrf.mxu0 }
 0x146   :  { %v2920_v55 = vpop.f32.mrf.mxu1  ;;  %v4125_v56 = vadd.f32 %v2918_v49, %v2012_v21  ;;  %v2875_v57 = vadd.f32 %v2874_v51, %v2873_v50 }
 0x147   :  { %v2921_v58 = vadd.f32 %v2920_v55, %v2919_v22  ;;  %v2876_v59 = vpop.f32.mrf.mxu0 }
 0x148   :  { %v2922_v30 = vpop.f32.mrf.mxu1  ;;  %v2017_v29 = vadd.f32 %v2875_v57, %v4101_v45 }
 0x149   :  { %v2877_v60 = vpop.f32.mrf.mxu0 }
 0x14a   :  { %v2923_v61 = vpop.f32.mrf.mxu1  ;;  %v4128_v0 = vadd.f32 %v2921_v58, %v2017_v29  ;;  %v2878_v2 = vadd.f32 %v2877_v60, %v2876_v59 }
 0x14b   :  { %v2924_v3 = vadd.f32 %v2923_v61, %v2922_v30  ;;  %v2879_v37 = vpop.f32.mrf.mxu0 }
 0x14c   :  { %4203 = vst [vmem:[#allocation2_spill] sm:$0xff] %v4128_v0  ;;  %v2020_v4 = vadd.f32 %v2878_v2, %v4104_v52  ;;  %v2925_v38 = vpop.f32.mrf.mxu1 }
 0x14d   :  { %v2880_v7 = vpop.f32.mrf.mxu0 }
 0x14e   :  { %v4131_v8 = vadd.f32 %v2924_v3, %v2020_v4  ;;  %v2926_v9 = vpop.f32.mrf.mxu1  ;;  %v2881_v58 = vadd.f32 %v2880_v7, %v2879_v37 }
 0x14f   :  { %v2882_v10 = vpop.f32.mrf.mxu0  ;;  %v2927_v3 = vadd.f32 %v2926_v9, %v2925_v38 }
 0x150   :  { %4204 = vst [vmem:[#allocation3_spill] sm:$0xff] %v4131_v8  ;;  %v2928_v11 = vpop.f32.mrf.mxu1  ;;  %v2025_v2 = vadd.f32 %v2881_v58, %v4107_v63 }
 0x151   :  { %v2883_v12 = vpop.f32.mrf.mxu0 }
 0x152   :  { %v2929_v15 = vpop.f32.mrf.mxu1  ;;  %v2884_v61 = vadd.f32 %v2883_v12, %v2882_v10 }
 0x153   :  { %v2885_v45 = vpop.f32.mrf.mxu0 }
 0x154   :  { %v2931_v47 = vpop.f32.mrf.mxu1 }
 0x155   :  { %v2886_v53 = vpop.f32.mrf.mxu0 }
 0x156   :  { %v2932_v16 = vpop.f32.mrf.mxu1 }
 0x157   :  { %v2888_v19 = vpop.f32.mrf.mxu0  ;;  %v2933_v10 = vadd.f32 %v2932_v16, %v2931_v47 }
 0x158   :  { %v2934_v18 = vpop.f32.mrf.mxu1  ;;  %v2887_v19 = vadd.f32 %v2886_v53, %v2885_v45 }
 0x159   :  { %v2889_v54 = vpop.f32.mrf.mxu0 }
 0x15a   :  { %v2935_v20 = vpop.f32.mrf.mxu1 }
 0x15b   :  { %v2953_v23 = vpop.f32.mrf.mxu0 }
 0x15c   :  { %v2999_v24 = vpop.f32.mrf.mxu1 }
 0x15d   :  { %v2954_v52 = vpop.f32.mrf.mxu0 }
 0x15e   :  { %v3000_v25 = vpop.f32.mrf.mxu1  ;;  %v2955_v20 = vadd.f32 %v2954_v52, %v2953_v23 }
 0x15f   :  { %v2956_v26 = vpop.f32.mrf.mxu0  ;;  %v3001_v38 = vadd.f32 %v3000_v25, %v2999_v24 }
 0x160   :  { %v3002_v62 = vpop.f32.mrf.mxu1  ;;  %v2145_v63 = vadd.f32 %v2955_v20, %v4116_v31 }
 0x161   :  { %v2957_v27 = vpop.f32.mrf.mxu0 }
 0x162   :  { %v3003_v28 = vpop.f32.mrf.mxu1  ;;  %v2958_v37 = vadd.f32 %v2957_v27, %v2956_v26  ;;  %v2217_v16 = vadd.f32 %v3001_v38, %v2145_v63 }
 0x163   :  { %v4133_v32 = vpop.f32.mrf.mxu0 }
 0x164   :  { %v4135_v1 = vpop.f32.mrf.mxu1  ;;  %v2148_v52 = vadd.f32 %v2958_v37, %v4119_v39 }
 0x165   :  { %v2960_v33 = vpop.f32.mrf.mxu0 }
 0x166   :  { %v4137_v34 = vpop.f32.mrf.mxu1  ;;  %v2961_v31 = vadd.f32 %v2960_v33, %v4133_v32 }
 0x167   :  { %v4139_v6 = vpop.f32.mrf.mxu0  ;;  %v3007_v32 = vadd.f32 %v4137_v34, %v4135_v1 }
 0x168   :  { %v4141_v35 = vpop.f32.mrf.mxu1 }
 0x169   :  { %v2963_v36 = vpop.f32.mrf.mxu0 }
 0x16a   :  { %v4143_v40 = vpop.f32.mrf.mxu1 }
 0x16b   :  { %v4145_v41 = vpop.f32.mrf.mxu0 }
 0x16c   :  { %v4147_v42 = vpop.f32.mrf.mxu1 }
 0x16d   :  { %4205 = vst [vmem:[#allocation4_spill] sm:$0xff] %v4147_v42  ;;  %v4149_v14 = vpop.f32.mrf.mxu0  ;;  %v2097_v42 = vadd.f32 %v2927_v3, %v2025_v2 }
 0x16e   :  { %v4151_v13 = vpop.f32.mrf.mxu1 }
 0x16f   :  { %4206 = vst [vmem:[#allocation5_spill] sm:$0xff] %v4151_v13  ;;  %v4153_v43 = vpop.f32.mrf.mxu0  ;;  %v2930_v13 = vadd.f32 %v2929_v15, %v2928_v11 }
 0x170   :  { %v4155_v44 = vpop.f32.mrf.mxu1 }
 0x171   :  { %4207 = vst [vmem:[#allocation6_spill] sm:$0xff] %v4155_v44  ;;  %v4157_v48 = vpop.f32.mrf.mxu0  ;;  %v2028_v44 = vadd.f32 %v2884_v61, %v4110_v5  ;;  %v3004_v5 = vadd.f32 %v3003_v28, %v3002_v62 }
 0x172   :  { %4208 = vst [vmem:[#allocation7_spill] sm:$0xff] %v4157_v48  ;;  %v4159_v49 = vpop.f32.mrf.mxu1  ;;  %v2033_v48 = vadd.f32 %v2887_v19, %v4113_v17 }
 0x173   :  { %4209 = vst [vmem:[#allocation8_spill] sm:$0xff] %v4159_v49  ;;  %v2971_v50 = vpop.f32.mrf.mxu0 }
 0x174   :  { %v3017_v22 = vpop.f32.mrf.mxu1  ;;  %v2105_v47 = vadd.f32 %v2933_v10, %v2033_v48  ;;  %v2153_v48 = vadd.f32 %v2961_v31, %v4122_v46 }
 0x175   :  { %v2972_v21 = vpop.f32.mrf.mxu0 }
 0x176   :  { %v3018_v51 = vpop.f32.mrf.mxu1  ;;  %v2973_v54 = vadd.f32 %v2972_v21, %v2971_v50  ;;  %v2964_v50 = vadd.f32 %v2963_v36, %v4139_v6  ;;  %v2220_v21 = vadd.f32 %v3004_v5, %v2148_v52  ;;  %v3010_v6 = vadd.f32 %v4143_v40, %v4141_v35 }
 0x177   :  { %v2974_v55 = vpop.f32.mrf.mxu0  ;;  %v3019_v45 = vadd.f32 %v3018_v51, %v3017_v22  ;;  %v2225_v20 = vadd.f32 %v3007_v32, %v2153_v48 }
 0x178   :  { %v3020_v57 = vpop.f32.mrf.mxu1  ;;  %v2169_v9 = vadd.f32 %v2973_v54, %v2097_v42  ;;  %v2967_v54 = vadd.f32 %v4149_v14, %v4145_v41 }
 0x179   :  { %v2975_v59 = vpop.f32.mrf.mxu0 }
 0x17a   :  { %v3021_v30 = vpop.f32.mrf.mxu1  ;;  %v2976_v12 = vadd.f32 %v2975_v59, %v2974_v55  ;;  %v2241_v24 = vadd.f32 %v3019_v45, %v2169_v9  ;;  %v4211_v45 = vld [vmem:[#allocation2_spill] sm:$0xff] }
 0x17b   :  { %v2977_v29 = vpop.f32.mrf.mxu0 }
 0x17c   :  { %v3023_v60 = vpop.f32.mrf.mxu1 }
 0x17d   :  { %v2978_v4 = vpop.f32.mrf.mxu0 }
 0x17e   :  { %v3024_v18 = vpop.f32.mrf.mxu1  ;;  %v2979_v11 = vadd.f32 %v2978_v4, %v2977_v29 }
 0x17f   :  { %v2980_v8 = vpop.f32.mrf.mxu0 }
 0x180   :  { %v3026_v49 = vpop.f32.mrf.mxu1  ;;  %v2100_v8 = vadd.f32 %v2930_v13, %v2028_v44  ;;  %v2177_v13 = vadd.f32 %v2979_v11, %v2105_v47  ;;  %v3025_v44 = vadd.f32 %v3024_v18, %v3023_v60 }
 0x181   :  { %v2981_v7 = vpop.f32.mrf.mxu0 }
 0x182   :  { %v3027_v0 = vpop.f32.mrf.mxu1  ;;  %v2172_v27 = vadd.f32 %v2976_v12, %v2100_v8  ;;  %v2249_v29 = vadd.f32 %v3025_v44, %v2177_v13  ;;  %v4210_v12 = vld [vmem:[#allocation7_spill] sm:$0xff]  ;;  %v4213_v8 = vld [vmem:[#allocation5_spill] sm:$0xff] }
 0x183   :  { %v3045_v53 = vpop.f32.mrf.mxu0  ;;  %v3022_v0 = vadd.f32 %v3021_v30, %v3020_v57  ;;  %v2156_v30 = vadd.f32 %v2964_v50, %v4125_v56  ;;  %v2970_v63 = vadd.f32 %v4210_v12, %v4153_v43  ;;  %v4214_v43 = vld [vmem:[#allocation6_spill] sm:$0xff] }
 0x184   :  { %v3063_v23 = vpop.f32.mrf.mxu1 }
 0x185   :  { %v3046_v15 = vpop.f32.mrf.mxu0  ;;  %v2244_v51 = vadd.f32 %v3022_v0, %v2172_v27  ;;  %v2228_v7 = vadd.f32 %v3010_v6, %v2156_v30  ;;  %v4216_v0 = vld [vmem:[#allocation3_spill] sm:$0xff] }
 0x186   :  { %v3064_v26 = vpop.f32.mrf.mxu1  ;;  %v3047_v49 = vadd.f32 %v3046_v15, %v3045_v53  ;;  %v2161_v53 = vadd.f32 %v2967_v54, %v4211_v45  ;;  %v4215_v15 = vld [vmem:[#allocation8_spill] sm:$0xff] }
 0x187   :  { %v3065_v17 = vadd.f32 %v3064_v26, %v3063_v23  ;;  %v3048_v25 = vpop.f32.mrf.mxu0  ;;  %v4212_v23 = vld [vmem:[#allocation4_spill] sm:$0xff]  ;;  %v3016_v26 = vadd.f32 %v4215_v15, %v4214_v43 }
 0x188   :  { %v3066_v42 = vpop.f32.mrf.mxu1  ;;  %v2289_v39 = vadd.f32 %v3047_v49, %v2217_v16  ;;  %v3013_v52 = vadd.f32 %v4213_v8, %v4212_v23  ;;  %v2164_v49 = vadd.f32 %v2970_v63, %v4216_v0 }
 0x189   :  { %v2313_v62 = vadd.f32 %v3065_v17, %v2241_v24  ;;  %v3049_v28 = vpop.f32.mrf.mxu0 }
 0x18a   :  { %v3067_v22 = vpop.f32.mrf.mxu1  ;;  %v3050_v55 = vadd.f32 %v3049_v28, %v3048_v25  ;;  %v2326_v60 = vmax.f32 %v2289_v39, 0.0  ;;  %v2233_v24 = vadd.f32 %v3013_v52, %v2161_v53  ;;  %v2236_v50 = vadd.f32 %v3016_v26, %v2164_v49 }
 0x18b   :  { %v3068_v57 = vadd.f32 %v3067_v22, %v3066_v42  ;;  %v3051_v33 = vpop.f32.mrf.mxu0  ;;  %v2332_v61 = vmax.f32 %v2313_v62, 0.0 }
 0x18c   :  { %v3069_v58 = vpop.f32.mrf.mxu1  ;;  %v2292_v36 = vadd.f32 %v3050_v55, %v2220_v21 }
 0x18d   :  { %v2316_v59 = vadd.f32 %v3068_v57, %v2244_v51  ;;  %v3052_v2 = vpop.f32.mrf.mxu0 }
 0x18e   :  { %v3070_v3 = vpop.f32.mrf.mxu1  ;;  %v2327_v4 = vmax.f32 %v2292_v36, 0.0  ;;  %v3053_v46 = vadd.f32 %v3052_v2, %v3051_v33 }
 0x18f   :  { %v2333_v18 = vmax.f32 %v2316_v59, 0.0  ;;  %v3071_v19 = vadd.f32 %v3070_v3, %v3069_v58  ;;  %v3054_v1 = vpop.f32.mrf.mxu0 }
 0x190   :  { %v3072_v34 = vpop.f32.mrf.mxu1  ;;  %v2641_v35 = vpack.c.bf16 %v2327_v4, %v2326_v60  ;;  %v2297_v38 = vadd.f32 %v3053_v46, %v2225_v20 }
 0x191   :  { %v2656_v40 = vpack.c.bf16 %v2333_v18, %v2332_v61  ;;  %v2321_v37 = vadd.f32 %v3071_v19, %v2249_v29  ;;  %v3055_v56 = vpop.f32.mrf.mxu0 }
 0x192   :  { %v3073_v10 = vpop.f32.mrf.mxu1  ;;  %2642 = vst [vmem:[%s4202_s3] sm:$0xff] %v2641_v35   ;;  %v3056_v41 = vadd.f32 %v3055_v56, %v3054_v1  ;;  %v2328_v17 = vmax.f32 %v2297_v38, 0.0 }
 0x193   :  { %2660 = vst [vmem:[%s4202_s3 + $0x18] sm:$0xff] %v2656_v40   ;;  %v2334_v9 = vmax.f32 %v2321_v37, 0.0  ;;  %v3057_v14 = vpop.f32.mrf.mxu0 }
 0x194   :  { %v2300_v11 = vadd.f32 %v3056_v41, %v2228_v7 }
 0x195   :  { %v2637_v5 = vpack.c.bf16 %v2334_v9, %v2334_v9  ;;  %v3058_v27 = vpop.f32.mrf.mxu0 }
 0x196   :  { %v2329_v47 = vmax.f32 %v2300_v11, 0.0  ;;  %v3059_v16 = vadd.f32 %v3058_v27, %v3057_v14 }
 0x197   :  { %2380 = vst [vmem:[%s4202_s3 + $0x20] sm:$0xf] %v2637_v5  ;;  %v3060_v31 = vpop.f32.mrf.mxu0 }
 0x198   :  { %v2646_v25 = vpack.c.bf16 %v2329_v47, %v2328_v17  ;;  %v2305_v13 = vadd.f32 %v3059_v16, %v2233_v24 }
 0x199   :  { %v3061_v42 = vpop.f32.mrf.mxu0 }
 0x19a   :  { %2658 = vst [vmem:[%s4202_s3 + $0x8] sm:$0xff] %v2646_v25   ;;  %v3062_v44 = vadd.f32 %v3061_v42, %v3060_v31  ;;  %v2330_v62 = vmax.f32 %v2305_v13, 0.0 }
 0x19c   :  { %v2308_v39 = vadd.f32 %v3062_v44, %v2236_v50 }
 0x19e   :  { %v2331_v28 = vmax.f32 %v2308_v39, 0.0 }
 0x1a0   :  { %v2651_v22 = vpack.c.bf16 %v2331_v28, %v2330_v62 }
 0x1a2   :  { %2659 = vst [vmem:[%s4202_s3 + $0x10] sm:$0xff] %v2651_v22  }

// kernel: lisa_cnn_forward.7
= control target key start
LH: loop header
LB: loop body
LE: loop exit
PB: predicated region body
PF: predicated region fallthrough
CT: control target
= control target key end

     0   :  { %v100_v30 = vlaneseq  ;;  %v539_v34 = vmov 1966171168   ;;  %s666_s0 = inlined_call_operand.vmem [shape: bf16[2,512], index: 0, kind: input, shape index: {}]   ;;  %s667_s1 = inlined_call_operand.vmem [shape: bf16[512,16], index: 1, kind: input, shape index: {}]   ;;  %s668_s2 = inlined_call_operand.vmem [shape: f32[1,16], index: 2, kind: input, shape index: {}]   ;;  %s669_s3 = inlined_call_operand.hbm [shape: f32[2,16], index: 3, kind: output, shape index: {}]  }
   0x1   :  { %v485_v0 = vld [vmem:[%s667_s1 + $0x78] sm:$0xff]   ;;  %v489_v4 = vld [vmem:[%s667_s1 + $0x70] sm:$0xff]   ;;  %v493_v8 = vld [vmem:[%s667_s1 + $0x68] sm:$0xff]   ;;  %v98_v35 = vunpack.c.l.s4 %v539_v34 }
   0x2   :  { %v486_v1 = vld [vmem:[%s667_s1 + $0xf8] sm:$0xff]   ;;  %439 = vmatprep.subr.bf16.mxu0 %v485_v0  ;;  %v490_v5 = vld [vmem:[%s667_s1 + $0xf0] sm:$0xff]   ;;  %v494_v9 = vld [vmem:[%s667_s1 + $0xe8] sm:$0xff]   ;;  %v101_v36 = vshrl.u32 %v100_v30, 7 }
   0x3   :  { %v487_v2 = vld [vmem:[%s667_s1 + $0x38] sm:$0xff]   ;;  %461 = vmatprep.subr.bf16.mxu1 %v486_v1  ;;  %v491_v6 = vld [vmem:[%s667_s1 + $0x30] sm:$0xff]   ;;  %v495_v10 = vld [vmem:[%s667_s1 + $0x28] sm:$0xff]  }
   0x4   :  { %v488_v3 = vld [vmem:[%s667_s1 + $0xb8] sm:$0xff]   ;;  %440 = vmatpush3.bf16.msra.mxu0 %v487_v2  ;;  %v492_v7 = vld [vmem:[%s667_s1 + $0xb0] sm:$0xff]   ;;  %v496_v11 = vld [vmem:[%s667_s1 + $0xa8] sm:$0xff]  }
   0x5   :  { %462 = vmatpush3.bf16.msra.mxu1 %v488_v3  ;;  %441 = vmatprep.subr.bf16.mxu0 %v489_v4  ;;  %v497_v12 = vld [vmem:[%s667_s1 + $0x60] sm:$0xff]   ;;  %v501_v16 = vld [vmem:[%s667_s1 + $0x58] sm:$0xff]   ;;  %v505_v20 = vld [vmem:[%s667_s1 + $0x50] sm:$0xff]  }
   0x6   :  { %463 = vmatprep.subr.bf16.mxu1 %v490_v5  ;;  %v498_v13 = vld [vmem:[%s667_s1 + $0xe0] sm:$0xff]   ;;  %v502_v17 = vld [vmem:[%s667_s1 + $0xd8] sm:$0xff]   ;;  %v506_v21 = vld [vmem:[%s667_s1 + $0xd0] sm:$0xff]  }
   0x7   :  { %v499_v14 = vld [vmem:[%s667_s1 + $0x20] sm:$0xff]   ;;  %v503_v18 = vld [vmem:[%s667_s1 + $0x18] sm:$0xff]   ;;  %v507_v22 = vld [vmem:[%s667_s1 + $0x10] sm:$0xff]  }
   0x8   :  { %442 = vmatpush3.bf16.msra.mxu0 %v491_v6  ;;  %v500_v15 = vld [vmem:[%s667_s1 + $0xa0] sm:$0xff]   ;;  %v504_v19 = vld [vmem:[%s667_s1 + $0x98] sm:$0xff]   ;;  %v508_v23 = vld [vmem:[%s667_s1 + $0x90] sm:$0xff]  }
   0x9   :  { %464 = vmatpush3.bf16.msra.mxu1 %v492_v7  ;;  %443 = vmatprep.subr.bf16.mxu0 %v493_v8  ;;  %v509_v24 = vld [vmem:[%s667_s1 + $0x48] sm:$0xff]   ;;  %v513_v28 = vld [vmem:[%s667_s1 + $0x40] sm:$0xff]  }
   0xa   :  { %465 = vmatprep.subr.bf16.mxu1 %v494_v9  ;;  %v510_v25 = vld [vmem:[%s667_s1 + $0xc8] sm:$0xff]   ;;  %v514_v29 = vld [vmem:[%s667_s1 + $0xc0] sm:$0xff]  }
   0xb   :  { %v511_v26 = vld [vmem:[%s667_s1 + $0x8] sm:$0xff]   ;;  %v515_v31 = vld [vmem:[%s667_s1] sm:$0xff]  }
   0xc   :  { %444 = vmatpush3.bf16.msra.mxu0 %v495_v10  ;;  %v512_v27 = vld [vmem:[%s667_s1 + $0x88] sm:$0xff]   ;;  %v516_v32 = vld [vmem:[%s667_s1 + $0x80] sm:$0xff]  }
   0xd   :  { %466 = vmatpush3.bf16.msra.mxu1 %v496_v11  ;;  %445 = vmatprep.subr.bf16.mxu0 %v497_v12  ;;  %v406_v33 = vld.sshfl [vmem:[%s666_s0] sm:$0x33 pattern:$0x75316420] }
   0xe   :  { %467 = vmatprep.subr.bf16.mxu1 %v498_v13 }
  0x10   :  { %446 = vmatpush3.bf16.msra.mxu0 %v499_v14 }
  0x11   :  { %468 = vmatpush3.bf16.msra.mxu1 %v500_v15  ;;  %447 = vmatprep.subr.bf16.mxu0 %v501_v16 }
  0x12   :  { %469 = vmatprep.subr.bf16.mxu1 %v502_v17 }
  0x14   :  { %448 = vmatpush3.bf16.msra.mxu0 %v503_v18 }
  0x15   :  { %470 = vmatpush3.bf16.msra.mxu1 %v504_v19  ;;  %449 = vmatprep.subr.bf16.mxu0 %v505_v20 }
  0x16   :  { %471 = vmatprep.subr.bf16.mxu1 %v506_v21 }
  0x18   :  { %450 = vmatpush3.bf16.msra.mxu0 %v507_v22 }
  0x19   :  { %472 = vmatpush3.bf16.msra.mxu1 %v508_v23  ;;  %451 = vmatprep.subr.bf16.mxu0 %v509_v24 }
  0x1a   :  { %473 = vmatprep.subr.bf16.mxu1 %v510_v25 }
  0x1c   :  { %452 = vmatpush3.bf16.msra.mxu0 %v511_v26 }
  0x1d   :  { %474 = vmatpush3.bf16.msra.mxu1 %v512_v27  ;;  %453 = vmatprep.subr.bf16.mxu0 %v513_v28 }
  0x1e   :  { %475 = vmatprep.subr.bf16.mxu1 %v514_v29 }
  0x20   :  { %454 = vmatpush3.bf16.msra.mxu0 %v515_v31 }
  0x21   :  { %476 = vmatpush3.bf16.msra.mxu1 %v516_v32 }
  0x22   :  { %8 = vsyncpa [#allocation3], 0  ;;  %v96_v37 = vcombine.high %v406_v33, %v406_v33  ;;  %v99_v38 = vunpack.c.0.s8 %v98_v35  ;;  %v405_v46 = vld [vmem:[%s668_s2] ss:$0 sm:$0xff]  ;;  %s540_s24 = smov [#allocation2]   ;;  %vm389_vm0 = vcmask 123904  }
  0x23   :  { %s397_s25 = sshll.u32 %s540_s24, 4  ;;  %s398_s25 = int_to_ptr.vmem [resolvable:$true] %s397_s25 }
  0x24   :  { %v102_v39 = vsub.s32 %v99_v38, %v101_v36  ;;  %s517_s26 = scalar_lea.vmem %s398_s25, 32  ;;  %p522_p1 = scmp.lt.s32.totalorder %s398_s25, %s398_s25 }
  0x25   :  { %p518_p0 = scmp.ne.s32.totalorder %s398_s25, %s517_s26  ;;  %p523_p2 = scmp.lt.s32.totalorder %s517_s26, %s517_s26 }
  0x26   :  { %v110_v40 = vrot.slane %v96_v37, %v102_v39  ;;  %v103_v41 = vrot.slane %v406_v33, %v102_v39 }
  0x27   :  { %p524_p3 = por %p523_p2, %p522_p1 }
  0x28   :  { %341 = vmatprep.mubr.bf16.mxu0 %v110_v40  ;;  %v112_v42 = vcombine.high %v110_v40, %v110_v40  ;;  %v111_v43 = vcombine.high %v103_v41, %v103_v41 }
  0x29   :  { %342 = vmatmul.mubr.bf16.vlgmr.msra.gmra.mxu0 %v103_v41  ;;  %p525_p4 = pnand %p524_p3, %p518_p0 }
  0x2a   :  { %381 = vmatprep.mubr.bf16.mxu1 %v112_v42 }
  0x2b   :  { %382 = vmatmul.mubr.bf16.vlgmr.msra.gmra.mxu1 %v111_v43 }
  0xe9   :  { %v455_v44 = vpop.f32.mrf.mxu0 }
  0xeb   :  { %v477_v45 = vpop.f32.mrf.mxu1  ;;  %v456_v47 = vpop.f32.mrf.mxu0 }
  0xec   :  { %v457_v48 = vadd.f32 %v456_v47, %v455_v44 }
  0xed   :  { %v478_v49 = vpop.f32.mrf.mxu1  ;;  %v458_v50 = vpop.f32.mrf.mxu0 }
  0xee   :  { %v344_v51 = vadd.f32 %v457_v48, %v405_v46  ;;  %v479_v52 = vadd.f32 %v478_v49, %v477_v45 }
  0xef   :  { %v480_v53 = vpop.f32.mrf.mxu1  ;;  %v459_v54 = vpop.f32.mrf.mxu0 }
  0xf0   :  { %v384_v55 = vadd.f32 %v479_v52, %v344_v51 }
  0xf1   :  { %v481_v56 = vpop.f32.mrf.mxu1 }
  0xf2   :  { %390 = vst.msk [vmem:[#allocation2] sm:$0x3] %vm389_vm0, %v384_v55 }
  0xf3   :  { %528 = shalt.err (!%p525_p4)
}
  0xf4   :  { %400 = dma.vmem_to_hbm [thread:$0]  %s398_s25, 32, %s669_s3, [#allocation3]  }
  0xf5   :  { %537 = dma.done.wait [#allocation3], 32  }
  0xf6   :  { %538 = vsyncadd [#allocation3], 4294967264 }
  0xf7   :  { %404 = vsyncpa [#allocation3], 1 }

// kernel: lisa_cnn_forward.6
= control target key start
LH: loop header
LB: loop body
LE: loop exit
PB: predicated region body
PF: predicated region fallthrough
CT: control target
= control target key end

     0   :  { %vm2997_vm0 = vmmov 0   ;;  %s3663_s1 = inlined_call_operand.vmem [shape: bf16[3200,128], index: 1, kind: input, shape index: {}]   ;;  %s3664_s0 = inlined_call_operand.vmem [shape: bf16[8,3200], index: 0, kind: input, shape index: {}]   ;;  %s3665_s2 = inlined_call_operand.vmem [shape: f32[1,128], index: 2, kind: input, shape index: {}]   ;;  %s3666_s3 = inlined_call_operand.vmem [shape: bf16[8,128], index: 3, kind: output, shape index: {}]  }
   0x1   :  { %v2771_v0 = vld [vmem:[%s3663_s1 + $0x78] sm:$0xff]   ;;  %v2775_v4 = vld [vmem:[%s3663_s1 + $0x70] sm:$0xff]   ;;  %v2779_v8 = vld [vmem:[%s3663_s1 + $0x68] sm:$0xff]  }
   0x2   :  { %v2772_v1 = vld [vmem:[%s3663_s1 + $0x38] sm:$0xff]   ;;  %2476 = vmatprep.subr.bf16.mxu0 %v2771_v0  ;;  %v2776_v5 = vld [vmem:[%s3663_s1 + $0x30] sm:$0xff]   ;;  %v2780_v9 = vld [vmem:[%s3663_s1 + $0x28] sm:$0xff]  }
   0x3   :  { %v2773_v2 = vld [vmem:[%s3663_s1 + $0xf8] sm:$0xff]   ;;  %2477 = vmatpush3.bf16.msra.mxu0 %v2772_v1  ;;  %v2777_v6 = vld [vmem:[%s3663_s1 + $0xf0] sm:$0xff]   ;;  %v2781_v10 = vld [vmem:[%s3663_s1 + $0xe8] sm:$0xff]  }
   0x4   :  { %v2774_v3 = vld [vmem:[%s3663_s1 + $0xb8] sm:$0xff]   ;;  %2498 = vmatprep.subr.bf16.mxu1 %v2773_v2  ;;  %2478 = vmatprep.subr.bf16.mxu0 %v2775_v4  ;;  %v2778_v7 = vld [vmem:[%s3663_s1 + $0xb0] sm:$0xff]   ;;  %v2782_v11 = vld [vmem:[%s3663_s1 + $0xa8] sm:$0xff]  }
   0x5   :  { %2499 = vmatpush3.bf16.msra.mxu1 %v2774_v3  ;;  %v2783_v12 = vld [vmem:[%s3663_s1 + $0x60] sm:$0xff]   ;;  %v2787_v16 = vld [vmem:[%s3663_s1 + $0x58] sm:$0xff]   ;;  %v2791_v20 = vld [vmem:[%s3663_s1 + $0x50] sm:$0xff]  }
   0x6   :  { %2500 = vmatprep.subr.bf16.mxu1 %v2777_v6  ;;  %v2784_v13 = vld [vmem:[%s3663_s1 + $0x20] sm:$0xff]   ;;  %v2788_v17 = vld [vmem:[%s3663_s1 + $0x18] sm:$0xff]   ;;  %v2792_v21 = vld [vmem:[%s3663_s1 + $0x10] sm:$0xff]  }
   0x7   :  { %2479 = vmatpush3.bf16.msra.mxu0 %v2776_v5  ;;  %v2785_v14 = vld [vmem:[%s3663_s1 + $0xe0] sm:$0xff]   ;;  %v2789_v18 = vld [vmem:[%s3663_s1 + $0xd8] sm:$0xff]   ;;  %v2793_v22 = vld [vmem:[%s3663_s1 + $0xd0] sm:$0xff]  }
   0x8   :  { %2480 = vmatprep.subr.bf16.mxu0 %v2779_v8  ;;  %v2786_v15 = vld [vmem:[%s3663_s1 + $0xa0] sm:$0xff]   ;;  %v2790_v19 = vld [vmem:[%s3663_s1 + $0x98] sm:$0xff]   ;;  %v2794_v23 = vld [vmem:[%s3663_s1 + $0x90] sm:$0xff]  }
   0x9   :  { %2501 = vmatpush3.bf16.msra.mxu1 %v2778_v7  ;;  %v2795_v24 = vld [vmem:[%s3663_s1 + $0x48] sm:$0xff]   ;;  %v2799_v28 = vld [vmem:[%s3663_s1 + $0x40] sm:$0xff]   ;;  %v2805_v35 = vld [vmem:[%s3663_s1 + $0x178] sm:$0xff]  }
   0xa   :  { %2502 = vmatprep.subr.bf16.mxu1 %v2781_v10  ;;  %v2796_v25 = vld [vmem:[%s3663_s1 + $0x8] sm:$0xff]   ;;  %v2800_v29 = vld [vmem:[%s3663_s1] sm:$0xff]   ;;  %v2808_v39 = vld [vmem:[%s3663_s1 + $0x138] sm:$0xff]  }
   0xb   :  { %2481 = vmatpush3.bf16.msra.mxu0 %v2780_v9  ;;  %v2797_v26 = vld [vmem:[%s3663_s1 + $0xc8] sm:$0xff]   ;;  %v2801_v30 = vld [vmem:[%s3663_s1 + $0xc0] sm:$0xff]   ;;  %v2809_v40 = vld [vmem:[%s3663_s1 + $0x1f8] sm:$0xff]  }
   0xc   :  { %2482 = vmatprep.subr.bf16.mxu0 %v2783_v12  ;;  %v2798_v27 = vld [vmem:[%s3663_s1 + $0x88] sm:$0xff]   ;;  %v15_v31 = vld [vmem:[%s3664_s0] sm:$0xff]  ;;  %v2810_v41 = vld [vmem:[%s3663_s1 + $0x1b8] sm:$0xff]  }
   0xd   :  { %2503 = vmatpush3.bf16.msra.mxu1 %v2782_v11  ;;  %v2251_v32 = vcombine.low %v15_v31, %v15_v31  ;;  %v2252_v33 = vcombine.high %v15_v31, %v15_v31  ;;  %v2804_v34 = vld [vmem:[%s3663_s1 + $0x80] sm:$0xff]   ;;  %v16_v36 = vld [vmem:[%s3664_s0 + $0x8] sm:$0xff]  ;;  %v2811_v42 = vld [vmem:[%s3663_s1 + $0x170] sm:$0xff]  }
   0xe   :  { %2504 = vmatprep.subr.bf16.mxu1 %v2785_v14  ;;  %v2253_v37 = vcombine.low %v16_v36, %v16_v36  ;;  %v2254_v38 = vcombine.high %v16_v36, %v16_v36  ;;  %v2812_v43 = vld [vmem:[%s3663_s1 + $0x130] sm:$0xff]   ;;  %v2815_v46 = vld [vmem:[%s3663_s1 + $0x168] sm:$0xff]   ;;  %v2819_v50 = vld [vmem:[%s3663_s1 + $0x160] sm:$0xff]  }
   0xf   :  { %2483 = vmatpush3.bf16.msra.mxu0 %v2784_v13  ;;  %1755 = vmatprep.mubr.bf16.mxu0 %v2252_v33  ;;  %v2813_v44 = vld [vmem:[%s3663_s1 + $0x1f0] sm:$0xff]   ;;  %v2816_v47 = vld [vmem:[%s3663_s1 + $0x128] sm:$0xff]   ;;  %v2820_v51 = vld [vmem:[%s3663_s1 + $0x120] sm:$0xff]  }
  0x10   :  { %2484 = vmatprep.subr.bf16.mxu0 %v2787_v16  ;;  %1795 = vmatprep.mubr.bf16.mxu1 %v2254_v38  ;;  %v2814_v45 = vld [vmem:[%s3663_s1 + $0x1b0] sm:$0xff]   ;;  %v2817_v48 = vld [vmem:[%s3663_s1 + $0x1e8] sm:$0xff]   ;;  %v2821_v52 = vld [vmem:[%s3663_s1 + $0x1e0] sm:$0xff]  }
  0x11   :  { %2505 = vmatpush3.bf16.msra.mxu1 %v2786_v15  ;;  %v2818_v49 = vld [vmem:[%s3663_s1 + $0x1a8] sm:$0xff]   ;;  %v2822_v53 = vld [vmem:[%s3663_s1 + $0x1a0] sm:$0xff]   ;;  %v2823_v54 = vld [vmem:[%s3663_s1 + $0x158] sm:$0xff]  }
  0x12   :  { %2506 = vmatprep.subr.bf16.mxu1 %v2789_v18  ;;  %v2824_v55 = vld [vmem:[%s3663_s1 + $0x118] sm:$0xff]   ;;  %v2827_v58 = vld [vmem:[%s3663_s1 + $0x150] sm:$0xff]   ;;  %v2831_v62 = vld [vmem:[%s3663_s1 + $0x148] sm:$0xff]  }
  0x13   :  { %2485 = vmatpush3.bf16.msra.mxu0 %v2788_v17  ;;  %v2825_v56 = vld [vmem:[%s3663_s1 + $0x1d8] sm:$0xff]   ;;  %v2828_v59 = vld [vmem:[%s3663_s1 + $0x110] sm:$0xff]   ;;  %v2832_v63 = vld [vmem:[%s3663_s1 + $0x108] sm:$0xff]  }
  0x14   :  { %2486 = vmatprep.subr.bf16.mxu0 %v2791_v20  ;;  %v2826_v57 = vld [vmem:[%s3663_s1 + $0x198] sm:$0xff]   ;;  %v2829_v60 = vld [vmem:[%s3663_s1 + $0x1d0] sm:$0xff]   ;;  %v2833_v0 = vld [vmem:[%s3663_s1 + $0x1c8] sm:$0xff]  }
  0x15   :  { %2507 = vmatpush3.bf16.msra.mxu1 %v2790_v19  ;;  %v2830_v61 = vld [vmem:[%s3663_s1 + $0x190] sm:$0xff]   ;;  %v2834_v1 = vld [vmem:[%s3663_s1 + $0x188] sm:$0xff]   ;;  %v2835_v2 = vld [vmem:[%s3663_s1 + $0x140] sm:$0xff]  }
  0x16   :  { %2508 = vmatprep.subr.bf16.mxu1 %v2793_v22  ;;  %v2836_v3 = vld [vmem:[%s3663_s1 + $0x100] sm:$0xff]   ;;  %v17_v5 = vld [vmem:[%s3664_s0 + $0x10] sm:$0xff]  ;;  %v2841_v9 = vld [vmem:[%s3663_s1 + $0x278] sm:$0xff]  }
  0x17   :  { %2487 = vmatpush3.bf16.msra.mxu0 %v2792_v21  ;;  %v2837_v4 = vld [vmem:[%s3663_s1 + $0x1c0] sm:$0xff]   ;;  %v2255_v6 = vcombine.low %v17_v5, %v17_v5  ;;  %v2256_v7 = vcombine.high %v17_v5, %v17_v5  ;;  %v18_v10 = vld [vmem:[%s3664_s0 + $0x18] sm:$0xff]  ;;  %v2847_v16 = vld [vmem:[%s3663_s1 + $0x270] sm:$0xff]  }
  0x18   :  { %2488 = vmatprep.subr.bf16.mxu0 %v2795_v24  ;;  %v2840_v8 = vld [vmem:[%s3663_s1 + $0x180] sm:$0xff]   ;;  %v2257_v11 = vcombine.low %v18_v10, %v18_v10  ;;  %v2258_v12 = vcombine.high %v18_v10, %v18_v10  ;;  %v2844_v13 = vld [vmem:[%s3663_s1 + $0x238] sm:$0xff]   ;;  %v2848_v17 = vld [vmem:[%s3663_s1 + $0x230] sm:$0xff]  }
  0x19   :  { %2509 = vmatpush3.bf16.msra.mxu1 %v2794_v23  ;;  %v2845_v14 = vld [vmem:[%s3663_s1 + $0x2f8] sm:$0xff]   ;;  %v2849_v18 = vld [vmem:[%s3663_s1 + $0x2f0] sm:$0xff]   ;;  %v2851_v20 = vld [vmem:[%s3663_s1 + $0x268] sm:$0xff]  }
  0x1a   :  { %2510 = vmatprep.subr.bf16.mxu1 %v2797_v26  ;;  %v2846_v15 = vld [vmem:[%s3663_s1 + $0x2b8] sm:$0xff]   ;;  %v2850_v19 = vld [vmem:[%s3663_s1 + $0x2b0] sm:$0xff]   ;;  %v2852_v21 = vld [vmem:[%s3663_s1 + $0x228] sm:$0xff]  }
  0x1b   :  { %2489 = vmatpush3.bf16.msra.mxu0 %v2796_v25  ;;  %v2853_v22 = vld [vmem:[%s3663_s1 + $0x2e8] sm:$0xff]   ;;  %v2855_v24 = vld [vmem:[%s3663_s1 + $0x260] sm:$0xff]   ;;  %v2862_v31 = vld [vmem:[%s3663_s1 + $0x298] sm:$0xff]  }
  0x1c   :  { %2490 = vmatprep.subr.bf16.mxu0 %v2799_v28  ;;  %v2854_v23 = vld [vmem:[%s3663_s1 + $0x2a8] sm:$0xff]   ;;  %v2856_v25 = vld [vmem:[%s3663_s1 + $0x220] sm:$0xff]   ;;  %v2859_v28 = vld [vmem:[%s3663_s1 + $0x258] sm:$0xff]  }
  0x1d   :  { %2511 = vmatpush3.bf16.msra.mxu1 %v2798_v27  ;;  %v2857_v26 = vld [vmem:[%s3663_s1 + $0x2e0] sm:$0xff]   ;;  %v2864_v33 = vld [vmem:[%s3663_s1 + $0x210] sm:$0xff]   ;;  %v2867_v36 = vld [vmem:[%s3663_s1 + $0x248] sm:$0xff]  }
  0x1e   :  { %2512 = vmatprep.subr.bf16.mxu1 %v2801_v30  ;;  %v2858_v27 = vld [vmem:[%s3663_s1 + $0x2a0] sm:$0xff]   ;;  %v2861_v30 = vld [vmem:[%s3663_s1 + $0x2d8] sm:$0xff]   ;;  %v2869_v38 = vld [vmem:[%s3663_s1 + $0x2c8] sm:$0xff]  }
  0x1f   :  { %2491 = vmatpush3.bf16.msra.mxu0 %v2800_v29  ;;  %v2860_v29 = vld [vmem:[%s3663_s1 + $0x218] sm:$0xff]   ;;  %v2903_v10 = vld [vmem:[%s3663_s1 + $0x348] sm:$0xff]  }
  0x20   :  { %2520 = vmatprep.subr.bf16.mxu0 %v2805_v35  ;;  %v2866_v35 = vld [vmem:[%s3663_s1 + $0x290] sm:$0xff]   ;;  %v2898_v5 = vld [vmem:[%s3663_s1 + $0x398] sm:$0xff]  }
  0x21   :  { %2513 = vmatpush3.bf16.msra.mxu1 %v2804_v34  ;;  %v2865_v34 = vld [vmem:[%s3663_s1 + $0x2d0] sm:$0xff]  }
  0x22   :  { %1756 = vmatmul.mubr.bf16.vlgmr.msra.gmra.mxu0 %v2251_v32  ;;  %2542 = vmatprep.subr.bf16.mxu1 %v2809_v40  ;;  %v2863_v32 = vld [vmem:[%s3663_s1 + $0x250] sm:$0xff]   ;;  %v2871_v40 = vld [vmem:[%s3663_s1 + $0x240] sm:$0xff]  }
  0x23   :  { %2521 = vmatpush3.bf16.msra.mxu0 %v2808_v39  ;;  %1835 = vmatprep.mubr.bf16.mxu0 %v2256_v7  ;;  %v2870_v39 = vld [vmem:[%s3663_s1 + $0x288] sm:$0xff]   ;;  %v2900_v7 = vld [vmem:[%s3663_s1 + $0x310] sm:$0xff]  }
  0x24   :  { %1796 = vmatmul.mubr.bf16.vlgmr.msra.gmra.mxu1 %v2253_v37  ;;  %2522 = vmatprep.subr.bf16.mxu0 %v2811_v42  ;;  %v2868_v37 = vld [vmem:[%s3663_s1 + $0x208] sm:$0xff]   ;;  %v2873_v42 = vld [vmem:[%s3663_s1 + $0x2c0] sm:$0xff]  }
  0x25   :  { %2543 = vmatpush3.bf16.msra.mxu1 %v2810_v41  ;;  %1875 = vmatprep.mubr.bf16.mxu1 %v2258_v12  ;;  %v2872_v41 = vld [vmem:[%s3663_s1 + $0x200] sm:$0xff]   ;;  %v2905_v12 = vld [vmem:[%s3663_s1 + $0x3c8] sm:$0xff]  }
  0x26   :  { %2544 = vmatprep.subr.bf16.mxu1 %v2813_v44 }
  0x27   :  { %2523 = vmatpush3.bf16.msra.mxu0 %v2812_v43  ;;  %v19_v43 = vld [vmem:[%s3664_s0 + $0x20] sm:$0xff] }
  0x28   :  { %2524 = vmatprep.subr.bf16.mxu0 %v2815_v46  ;;  %v2259_v44 = vcombine.low %v19_v43, %v19_v43  ;;  %v2876_v46 = vld [vmem:[%s3663_s1 + $0x280] sm:$0xff]  }
  0x29   :  { %2545 = vmatpush3.bf16.msra.mxu1 %v2814_v45  ;;  %v2260_v45 = vcombine.high %v19_v43, %v19_v43  ;;  %v2934_v43 = vld [vmem:[%s3663_s1 + $0x498] sm:$0xff]  }
  0x2a   :  { %2546 = vmatprep.subr.bf16.mxu1 %v2817_v48  ;;  %v20_v48 = vld [vmem:[%s3664_s0 + $0x28] sm:$0xff] }
  0x2b   :  { %2525 = vmatpush3.bf16.msra.mxu0 %v2816_v47  ;;  %v2877_v47 = vld [vmem:[%s3663_s1 + $0x378] sm:$0xff]  }
  0x2c   :  { %2526 = vmatprep.subr.bf16.mxu0 %v2819_v50  ;;  %v2262_v50 = vcombine.high %v20_v48, %v20_v48 }
  0x2d   :  { %2547 = vmatpush3.bf16.msra.mxu1 %v2818_v49  ;;  %v2261_v49 = vcombine.low %v20_v48, %v20_v48  ;;  %v2939_v48 = vld [vmem:[%s3663_s1 + $0x448] sm:$0xff]  }
  0x2e   :  { %2548 = vmatprep.subr.bf16.mxu1 %v2821_v52  ;;  %v2881_v52 = vld [vmem:[%s3663_s1 + $0x3f8] sm:$0xff]  }
  0x2f   :  { %2527 = vmatpush3.bf16.msra.mxu0 %v2820_v51  ;;  %v2880_v51 = vld [vmem:[%s3663_s1 + $0x338] sm:$0xff]  }
  0x30   :  { %2528 = vmatprep.subr.bf16.mxu0 %v2823_v54  ;;  %v2883_v54 = vld [vmem:[%s3663_s1 + $0x370] sm:$0xff]  }
  0x31   :  { %2549 = vmatpush3.bf16.msra.mxu1 %v2822_v53  ;;  %v2882_v53 = vld [vmem:[%s3663_s1 + $0x3b8] sm:$0xff]  }
  0x32   :  { %2550 = vmatprep.subr.bf16.mxu1 %v2825_v56  ;;  %v2885_v56 = vld [vmem:[%s3663_s1 + $0x3f0] sm:$0xff]  }
  0x33   :  { %2529 = vmatpush3.bf16.msra.mxu0 %v2824_v55  ;;  %v2884_v55 = vld [vmem:[%s3663_s1 + $0x330] sm:$0xff]  }
  0x34   :  { %2530 = vmatprep.subr.bf16.mxu0 %v2827_v58  ;;  %v2887_v58 = vld [vmem:[%s3663_s1 + $0x368] sm:$0xff]  }
  0x35   :  { %2551 = vmatpush3.bf16.msra.mxu1 %v2826_v57  ;;  %v2886_v57 = vld [vmem:[%s3663_s1 + $0x3b0] sm:$0xff]  }
  0x36   :  { %2552 = vmatprep.subr.bf16.mxu1 %v2829_v60  ;;  %v2889_v60 = vld [vmem:[%s3663_s1 + $0x3e8] sm:$0xff]  }
  0x37   :  { %2531 = vmatpush3.bf16.msra.mxu0 %v2828_v59  ;;  %v2888_v59 = vld [vmem:[%s3663_s1 + $0x328] sm:$0xff]  }
  0x38   :  { %2532 = vmatprep.subr.bf16.mxu0 %v2831_v62  ;;  %v2891_v62 = vld [vmem:[%s3663_s1 + $0x360] sm:$0xff]  }
  0x39   :  { %2553 = vmatpush3.bf16.msra.mxu1 %v2830_v61  ;;  %v2890_v61 = vld [vmem:[%s3663_s1 + $0x3a8] sm:$0xff]  }
  0x3a   :  { %2554 = vmatprep.subr.bf16.mxu1 %v2833_v0  ;;  %v2893_v0 = vld [vmem:[%s3663_s1 + $0x3e0] sm:$0xff]  }
  0x3b   :  { %2533 = vmatpush3.bf16.msra.mxu0 %v2832_v63  ;;  %v2892_v63 = vld [vmem:[%s3663_s1 + $0x320] sm:$0xff]  }
  0x3c   :  { %2534 = vmatprep.subr.bf16.mxu0 %v2835_v2  ;;  %v2895_v2 = vld [vmem:[%s3663_s1 + $0x358] sm:$0xff]  }
  0x3d   :  { %2555 = vmatpush3.bf16.msra.mxu1 %v2834_v1  ;;  %v2894_v1 = vld [vmem:[%s3663_s1 + $0x3a0] sm:$0xff]  }
  0x3e   :  { %2556 = vmatprep.subr.bf16.mxu1 %v2837_v4  ;;  %v2897_v4 = vld [vmem:[%s3663_s1 + $0x3d8] sm:$0xff]  }
  0x3f   :  { %2535 = vmatpush3.bf16.msra.mxu0 %v2836_v3  ;;  %v2896_v3 = vld [vmem:[%s3663_s1 + $0x318] sm:$0xff]  }
  0x40   :  { %2564 = vmatprep.subr.bf16.mxu0 %v2841_v9  ;;  %v2902_v9 = vld [vmem:[%s3663_s1 + $0x390] sm:$0xff]  }
  0x41   :  { %2557 = vmatpush3.bf16.msra.mxu1 %v2840_v8  ;;  %v2901_v8 = vld [vmem:[%s3663_s1 + $0x3d0] sm:$0xff]  }
  0x42   :  { %1836 = vmatmul.mubr.bf16.vlgmr.msra.gmra.mxu0 %v2255_v6  ;;  %2586 = vmatprep.subr.bf16.mxu1 %v2845_v14  ;;  %v2899_v6 = vld [vmem:[%s3663_s1 + $0x350] sm:$0xff]   ;;  %v2907_v14 = vld [vmem:[%s3663_s1 + $0x340] sm:$0xff]  }
  0x43   :  { %2565 = vmatpush3.bf16.msra.mxu0 %v2844_v13  ;;  %1915 = vmatprep.mubr.bf16.mxu0 %v2260_v45  ;;  %v2906_v13 = vld [vmem:[%s3663_s1 + $0x388] sm:$0xff]   ;;  %v2936_v45 = vld [vmem:[%s3663_s1 + $0x410] sm:$0xff]  }
  0x44   :  { %1876 = vmatmul.mubr.bf16.vlgmr.msra.gmra.mxu1 %v2257_v11  ;;  %2566 = vmatprep.subr.bf16.mxu0 %v2847_v16  ;;  %v2904_v11 = vld [vmem:[%s3663_s1 + $0x308] sm:$0xff]   ;;  %v2909_v16 = vld [vmem:[%s3663_s1 + $0x3c0] sm:$0xff]  }
  0x45   :  { %2587 = vmatpush3.bf16.msra.mxu1 %v2846_v15  ;;  %1955 = vmatprep.mubr.bf16.mxu1 %v2262_v50  ;;  %v2908_v15 = vld [vmem:[%s3663_s1 + $0x300] sm:$0xff]   ;;  %v2941_v50 = vld [vmem:[%s3663_s1 + $0x4c8] sm:$0xff]  }
  0x46   :  { %2588 = vmatprep.subr.bf16.mxu1 %v2849_v18 }
  0x47   :  { %2567 = vmatpush3.bf16.msra.mxu0 %v2848_v17  ;;  %v21_v17 = vld [vmem:[%s3664_s0 + $0x30] sm:$0xff] }
  0x48   :  { %2568 = vmatprep.subr.bf16.mxu0 %v2851_v20  ;;  %v2263_v18 = vcombine.low %v21_v17, %v21_v17  ;;  %v2912_v20 = vld [vmem:[%s3663_s1 + $0x380] sm:$0xff]  }
  0x49   :  { %2589 = vmatpush3.bf16.msra.mxu1 %v2850_v19  ;;  %v2264_v19 = vcombine.high %v21_v17, %v21_v17  ;;  %v2970_v17 = vld [vmem:[%s3663_s1 + $0x598] sm:$0xff]  }
  0x4a   :  { %2590 = vmatprep.subr.bf16.mxu1 %v2853_v22  ;;  %v22_v22 = vld [vmem:[%s3664_s0 + $0x38] sm:$0xff] }
  0x4b   :  { %2569 = vmatpush3.bf16.msra.mxu0 %v2852_v21  ;;  %v2913_v21 = vld [vmem:[%s3663_s1 + $0x478] sm:$0xff]  }
  0x4c   :  { %2570 = vmatprep.subr.bf16.mxu0 %v2855_v24  ;;  %v2266_v24 = vcombine.high %v22_v22, %v22_v22 }
  0x4d   :  { %2591 = vmatpush3.bf16.msra.mxu1 %v2854_v23  ;;  %v2265_v23 = vcombine.low %v22_v22, %v22_v22  ;;  %v2975_v22 = vld [vmem:[%s3663_s1 + $0x548] sm:$0xff]  }
  0x4e   :  { %2592 = vmatprep.subr.bf16.mxu1 %v2857_v26  ;;  %v2917_v26 = vld [vmem:[%s3663_s1 + $0x4f8] sm:$0xff]  }
  0x4f   :  { %2571 = vmatpush3.bf16.msra.mxu0 %v2856_v25  ;;  %v2916_v25 = vld [vmem:[%s3663_s1 + $0x438] sm:$0xff]  }
  0x50   :  { %2572 = vmatprep.subr.bf16.mxu0 %v2859_v28  ;;  %v2919_v28 = vld [vmem:[%s3663_s1 + $0x470] sm:$0xff]  }
  0x51   :  { %2593 = vmatpush3.bf16.msra.mxu1 %v2858_v27  ;;  %v2918_v27 = vld [vmem:[%s3663_s1 + $0x4b8] sm:$0xff]  }
  0x52   :  { %2594 = vmatprep.subr.bf16.mxu1 %v2861_v30  ;;  %v2921_v30 = vld [vmem:[%s3663_s1 + $0x4f0] sm:$0xff]  }
  0x53   :  { %2573 = vmatpush3.bf16.msra.mxu0 %v2860_v29  ;;  %v2920_v29 = vld [vmem:[%s3663_s1 + $0x430] sm:$0xff]  }
  0x54   :  { %2574 = vmatprep.subr.bf16.mxu0 %v2863_v32  ;;  %v2923_v32 = vld [vmem:[%s3663_s1 + $0x468] sm:$0xff]  }
  0x55   :  { %2595 = vmatpush3.bf16.msra.mxu1 %v2862_v31  ;;  %v2922_v31 = vld [vmem:[%s3663_s1 + $0x4b0] sm:$0xff]  }
  0x56   :  { %2596 = vmatprep.subr.bf16.mxu1 %v2865_v34  ;;  %v2925_v34 = vld [vmem:[%s3663_s1 + $0x4e8] sm:$0xff]  }
  0x57   :  { %2575 = vmatpush3.bf16.msra.mxu0 %v2864_v33  ;;  %v2924_v33 = vld [vmem:[%s3663_s1 + $0x428] sm:$0xff]  }
  0x58   :  { %2576 = vmatprep.subr.bf16.mxu0 %v2867_v36  ;;  %v2927_v36 = vld [vmem:[%s3663_s1 + $0x460] sm:$0xff]  }
  0x59   :  { %2597 = vmatpush3.bf16.msra.mxu1 %v2866_v35  ;;  %v2926_v35 = vld [vmem:[%s3663_s1 + $0x4a8] sm:$0xff]  }
  0x5a   :  { %2598 = vmatprep.subr.bf16.mxu1 %v2869_v38  ;;  %v2929_v38 = vld [vmem:[%s3663_s1 + $0x4e0] sm:$0xff]  }
  0x5b   :  { %2577 = vmatpush3.bf16.msra.mxu0 %v2868_v37  ;;  %v2928_v37 = vld [vmem:[%s3663_s1 + $0x420] sm:$0xff]  }
  0x5c   :  { %2578 = vmatprep.subr.bf16.mxu0 %v2871_v40  ;;  %v2931_v40 = vld [vmem:[%s3663_s1 + $0x458] sm:$0xff]  }
  0x5d   :  { %2599 = vmatpush3.bf16.msra.mxu1 %v2870_v39  ;;  %v2930_v39 = vld [vmem:[%s3663_s1 + $0x4a0] sm:$0xff]  }
  0x5e   :  { %2600 = vmatprep.subr.bf16.mxu1 %v2873_v42  ;;  %v2933_v42 = vld [vmem:[%s3663_s1 + $0x4d8] sm:$0xff]  }
  0x5f   :  { %2579 = vmatpush3.bf16.msra.mxu0 %v2872_v41  ;;  %v2932_v41 = vld [vmem:[%s3663_s1 + $0x418] sm:$0xff]  }
  0x60   :  { %2608 = vmatprep.subr.bf16.mxu0 %v2877_v47  ;;  %v2938_v47 = vld [vmem:[%s3663_s1 + $0x490] sm:$0xff]  }
  0x61   :  { %2601 = vmatpush3.bf16.msra.mxu1 %v2876_v46  ;;  %v2937_v46 = vld [vmem:[%s3663_s1 + $0x4d0] sm:$0xff]  }
  0x62   :  { %1916 = vmatmul.mubr.bf16.vlgmr.msra.gmra.mxu0 %v2259_v44  ;;  %2630 = vmatprep.subr.bf16.mxu1 %v2881_v52  ;;  %v2935_v44 = vld [vmem:[%s3663_s1 + $0x450] sm:$0xff]   ;;  %v2943_v52 = vld [vmem:[%s3663_s1 + $0x440] sm:$0xff]  }
  0x63   :  { %2609 = vmatpush3.bf16.msra.mxu0 %v2880_v51  ;;  %1995 = vmatprep.mubr.bf16.mxu0 %v2264_v19  ;;  %v2942_v51 = vld [vmem:[%s3663_s1 + $0x488] sm:$0xff]   ;;  %v2972_v19 = vld [vmem:[%s3663_s1 + $0x510] sm:$0xff]  }
  0x64   :  { %1956 = vmatmul.mubr.bf16.vlgmr.msra.gmra.mxu1 %v2261_v49  ;;  %2610 = vmatprep.subr.bf16.mxu0 %v2883_v54  ;;  %v2940_v49 = vld [vmem:[%s3663_s1 + $0x408] sm:$0xff]   ;;  %v2945_v54 = vld [vmem:[%s3663_s1 + $0x4c0] sm:$0xff]  }
  0x65   :  { %2631 = vmatpush3.bf16.msra.mxu1 %v2882_v53  ;;  %2035 = vmatprep.mubr.bf16.mxu1 %v2266_v24  ;;  %v2944_v53 = vld [vmem:[%s3663_s1 + $0x400] sm:$0xff]   ;;  %v2977_v24 = vld [vmem:[%s3663_s1 + $0x5c8] sm:$0xff]  }
  0x66   :  { %2632 = vmatprep.subr.bf16.mxu1 %v2885_v56 }
  0x67   :  { %2611 = vmatpush3.bf16.msra.mxu0 %v2884_v55  ;;  %v23_v55 = vld [vmem:[%s3664_s0 + $0x40] sm:$0xff] }
  0x68   :  { %2612 = vmatprep.subr.bf16.mxu0 %v2887_v58  ;;  %v2267_v56 = vcombine.low %v23_v55, %v23_v55  ;;  %v2948_v58 = vld [vmem:[%s3663_s1 + $0x480] sm:$0xff]  }
  0x69   :  { %2633 = vmatpush3.bf16.msra.mxu1 %v2886_v57  ;;  %v2268_v57 = vcombine.high %v23_v55, %v23_v55 }
  0x6a   :  { %2634 = vmatprep.subr.bf16.mxu1 %v2889_v60  ;;  %v24_v60 = vld [vmem:[%s3664_s0 + $0x48] sm:$0xff] }
  0x6b   :  { %2613 = vmatpush3.bf16.msra.mxu0 %v2888_v59  ;;  %v2949_v59 = vld [vmem:[%s3663_s1 + $0x578] sm:$0xff]  }
  0x6c   :  { %2614 = vmatprep.subr.bf16.mxu0 %v2891_v62  ;;  %v2270_v62 = vcombine.high %v24_v60, %v24_v60 }
  0x6d   :  { %2635 = vmatpush3.bf16.msra.mxu1 %v2890_v61  ;;  %v2269_v61 = vcombine.low %v24_v60, %v24_v60 }
  0x6e   :  { %2636 = vmatprep.subr.bf16.mxu1 %v2893_v0  ;;  %v2953_v0 = vld [vmem:[%s3663_s1 + $0x5f8] sm:$0xff]  }
  0x6f   :  { %2615 = vmatpush3.bf16.msra.mxu0 %v2892_v63  ;;  %v2952_v63 = vld [vmem:[%s3663_s1 + $0x538] sm:$0xff]  }
  0x70   :  { %2616 = vmatprep.subr.bf16.mxu0 %v2895_v2  ;;  %v2955_v2 = vld [vmem:[%s3663_s1 + $0x570] sm:$0xff]  }
  0x71   :  { %2637 = vmatpush3.bf16.msra.mxu1 %v2894_v1  ;;  %v2954_v1 = vld [vmem:[%s3663_s1 + $0x5b8] sm:$0xff]  }
  0x72   :  { %2638 = vmatprep.subr.bf16.mxu1 %v2897_v4  ;;  %v2957_v4 = vld [vmem:[%s3663_s1 + $0x5f0] sm:$0xff]  }
  0x73   :  { %2617 = vmatpush3.bf16.msra.mxu0 %v2896_v3  ;;  %v2956_v3 = vld [vmem:[%s3663_s1 + $0x530] sm:$0xff]  }
  0x74   :  { %2618 = vmatprep.subr.bf16.mxu0 %v2899_v6  ;;  %v2959_v6 = vld [vmem:[%s3663_s1 + $0x568] sm:$0xff]  }
  0x75   :  { %2639 = vmatpush3.bf16.msra.mxu1 %v2898_v5  ;;  %v2958_v5 = vld [vmem:[%s3663_s1 + $0x5b0] sm:$0xff]  }
  0x76   :  { %2640 = vmatprep.subr.bf16.mxu1 %v2901_v8  ;;  %v2961_v8 = vld [vmem:[%s3663_s1 + $0x5e8] sm:$0xff]  }
  0x77   :  { %2619 = vmatpush3.bf16.msra.mxu0 %v2900_v7  ;;  %v2960_v7 = vld [vmem:[%s3663_s1 + $0x528] sm:$0xff]  }
  0x78   :  { %2620 = vmatprep.subr.bf16.mxu0 %v2903_v10  ;;  %v2963_v10 = vld [vmem:[%s3663_s1 + $0x560] sm:$0xff]  }
  0x79   :  { %2641 = vmatpush3.bf16.msra.mxu1 %v2902_v9  ;;  %v2962_v9 = vld [vmem:[%s3663_s1 + $0x5a8] sm:$0xff]  }
  0x7a   :  { %2642 = vmatprep.subr.bf16.mxu1 %v2905_v12  ;;  %v2965_v12 = vld [vmem:[%s3663_s1 + $0x5e0] sm:$0xff]  }
  0x7b   :  { %2621 = vmatpush3.bf16.msra.mxu0 %v2904_v11  ;;  %v2964_v11 = vld [vmem:[%s3663_s1 + $0x520] sm:$0xff]  }
  0x7c   :  { %2622 = vmatprep.subr.bf16.mxu0 %v2907_v14  ;;  %v2967_v14 = vld [vmem:[%s3663_s1 + $0x558] sm:$0xff]  }
  0x7d   :  { %2643 = vmatpush3.bf16.msra.mxu1 %v2906_v13  ;;  %v2966_v13 = vld [vmem:[%s3663_s1 + $0x5a0] sm:$0xff]  }
  0x7e   :  { %2644 = vmatprep.subr.bf16.mxu1 %v2909_v16  ;;  %v2969_v16 = vld [vmem:[%s3663_s1 + $0x5d8] sm:$0xff]  }
  0x7f   :  { %2623 = vmatpush3.bf16.msra.mxu0 %v2908_v15  ;;  %v2968_v15 = vld [vmem:[%s3663_s1 + $0x518] sm:$0xff]  }
  0x80   :  { %2652 = vmatprep.subr.bf16.mxu0 %v2913_v21  ;;  %v2974_v21 = vld [vmem:[%s3663_s1 + $0x590] sm:$0xff]  }
  0x81   :  { %2645 = vmatpush3.bf16.msra.mxu1 %v2912_v20  ;;  %v2973_v20 = vld [vmem:[%s3663_s1 + $0x5d0] sm:$0xff]  }
  0x82   :  { %1996 = vmatmul.mubr.bf16.vlgmr.msra.gmra.mxu0 %v2263_v18  ;;  %2674 = vmatprep.subr.bf16.mxu1 %v2917_v26  ;;  %v2971_v18 = vld [vmem:[%s3663_s1 + $0x550] sm:$0xff]   ;;  %v2979_v26 = vld [vmem:[%s3663_s1 + $0x540] sm:$0xff]  }
  0x83   :  { %2653 = vmatpush3.bf16.msra.mxu0 %v2916_v25  ;;  %2075 = vmatprep.mubr.bf16.mxu0 %v2268_v57  ;;  %v2978_v25 = vld [vmem:[%s3663_s1 + $0x588] sm:$0xff]  }
  0x84   :  { %2036 = vmatmul.mubr.bf16.vlgmr.msra.gmra.mxu1 %v2265_v23  ;;  %2654 = vmatprep.subr.bf16.mxu0 %v2919_v28  ;;  %v2976_v23 = vld [vmem:[%s3663_s1 + $0x508] sm:$0xff]   ;;  %v2981_v28 = vld [vmem:[%s3663_s1 + $0x5c0] sm:$0xff]  }
  0x85   :  { %2675 = vmatpush3.bf16.msra.mxu1 %v2918_v27  ;;  %2115 = vmatprep.mubr.bf16.mxu1 %v2270_v62  ;;  %v2980_v27 = vld [vmem:[%s3663_s1 + $0x500] sm:$0xff]  }
  0x86   :  { %2676 = vmatprep.subr.bf16.mxu1 %v2921_v30 }
  0x87   :  { %2655 = vmatpush3.bf16.msra.mxu0 %v2920_v29  ;;  %v25_v29 = vld [vmem:[%s3664_s0 + $0x50] sm:$0xff] }
  0x88   :  { %2656 = vmatprep.subr.bf16.mxu0 %v2923_v32  ;;  %v2271_v30 = vcombine.low %v25_v29, %v25_v29  ;;  %v2984_v32 = vld [vmem:[%s3663_s1 + $0x580] sm:$0xff]  }
  0x89   :  { %2677 = vmatpush3.bf16.msra.mxu1 %v2922_v31  ;;  %v2272_v31 = vcombine.high %v25_v29, %v25_v29 }
  0x8a   :  { %2678 = vmatprep.subr.bf16.mxu1 %v2925_v34  ;;  %v2996_v34 = vmov 0.0  }
  0x8b   :  { %2657 = vmatpush3.bf16.msra.mxu0 %v2924_v33  ;;  %v26_v33 = vld [vmem:[%s3664_s0 + $0x58] sm:$0xff] }
  0x8c   :  { %2658 = vmatprep.subr.bf16.mxu0 %v2927_v36  ;;  %v2274_v36 = vcombine.high %v26_v33, %v26_v33 }
  0x8d   :  { %2679 = vmatpush3.bf16.msra.mxu1 %v2926_v35  ;;  %v2273_v35 = vcombine.low %v26_v33, %v26_v33 }
  0x8e   :  { %2680 = vmatprep.subr.bf16.mxu1 %v2929_v38  ;;  %v2988_v38 = vld [vmem:[%s3663_s1 + $0x630] sm:$0xff]  }
  0x8f   :  { %2659 = vmatpush3.bf16.msra.mxu0 %v2928_v37  ;;  %v2987_v37 = vld [vmem:[%s3663_s1 + $0x638] sm:$0xff]  }
  0x90   :  { %2660 = vmatprep.subr.bf16.mxu0 %v2931_v40  ;;  %v2990_v40 = vld [vmem:[%s3663_s1 + $0x620] sm:$0xff]  }
  0x91   :  { %2681 = vmatpush3.bf16.msra.mxu1 %v2930_v39  ;;  %v2989_v39 = vld [vmem:[%s3663_s1 + $0x628] sm:$0xff]  }
  0x92   :  { %2682 = vmatprep.subr.bf16.mxu1 %v2933_v42  ;;  %v2992_v42 = vld [vmem:[%s3663_s1 + $0x610] sm:$0xff]  }
  0x93   :  { %2661 = vmatpush3.bf16.msra.mxu0 %v2932_v41  ;;  %v2991_v41 = vld [vmem:[%s3663_s1 + $0x618] sm:$0xff]  }
  0x94   :  { %2662 = vmatprep.subr.bf16.mxu0 %v2935_v44  ;;  %v2994_v44 = vld [vmem:[%s3663_s1 + $0x600] sm:$0xff]  }
  0x95   :  { %2683 = vmatpush3.bf16.msra.mxu1 %v2934_v43  ;;  %v2993_v43 = vld [vmem:[%s3663_s1 + $0x608] sm:$0xff]  }
  0x96   :  { %2684 = vmatprep.subr.bf16.mxu1 %v2937_v46 }
  0x97   :  { %2663 = vmatpush3.bf16.msra.mxu0 %v2936_v45  ;;  %v2995_v45 = vld [vmem:[%s3664_s0 + $0x60] ss:$0 sps:$4 sm:$0xff]  }
  0x98   :  { %2664 = vmatprep.subr.bf16.mxu0 %v2939_v48 }
  0x99   :  { %2685 = vmatpush3.bf16.msra.mxu1 %v2938_v47  ;;  %v2250_v47 = vld [vmem:[%s3665_s2] ss:$0 sm:$0xff] }
  0x9a   :  { %2686 = vmatprep.subr.bf16.mxu1 %v2941_v50 }
  0x9b   :  { %2665 = vmatpush3.bf16.msra.mxu0 %v2940_v49 }
  0x9c   :  { %2666 = vmatprep.subr.bf16.mxu0 %v2943_v52 }
  0x9d   :  { %2687 = vmatpush3.bf16.msra.mxu1 %v2942_v51 }
  0x9e   :  { %2688 = vmatprep.subr.bf16.mxu1 %v2945_v54 }
  0x9f   :  { %2667 = vmatpush3.bf16.msra.mxu0 %v2944_v53 }
  0xa0   :  { %2696 = vmatprep.subr.bf16.mxu0 %v2949_v59 }
  0xa1   :  { %2689 = vmatpush3.bf16.msra.mxu1 %v2948_v58 }
  0xa2   :  { %2076 = vmatmul.mubr.bf16.vlgmr.msra.gmra.mxu0 %v2267_v56  ;;  %2718 = vmatprep.subr.bf16.mxu1 %v2953_v0 }
  0xa3   :  { %2697 = vmatpush3.bf16.msra.mxu0 %v2952_v63  ;;  %2155 = vmatprep.mubr.bf16.mxu0 %v2272_v31 }
  0xa4   :  { %2116 = vmatmul.mubr.bf16.vlgmr.msra.gmra.mxu1 %v2269_v61  ;;  %2698 = vmatprep.subr.bf16.mxu0 %v2955_v2 }
  0xa5   :  { %2719 = vmatpush3.bf16.msra.mxu1 %v2954_v1  ;;  %2195 = vmatprep.mubr.bf16.mxu1 %v2274_v36 }
  0xa6   :  { %2720 = vmatprep.subr.bf16.mxu1 %v2957_v4 }
  0xa7   :  { %2699 = vmatpush3.bf16.msra.mxu0 %v2956_v3 }
  0xa8   :  { %2700 = vmatprep.subr.bf16.mxu0 %v2959_v6 }
  0xa9   :  { %2721 = vmatpush3.bf16.msra.mxu1 %v2958_v5 }
  0xaa   :  { %2722 = vmatprep.subr.bf16.mxu1 %v2961_v8 }
  0xab   :  { %2701 = vmatpush3.bf16.msra.mxu0 %v2960_v7 }
  0xac   :  { %2702 = vmatprep.subr.bf16.mxu0 %v2963_v10 }
  0xad   :  { %2723 = vmatpush3.bf16.msra.mxu1 %v2962_v9 }
  0xae   :  { %2724 = vmatprep.subr.bf16.mxu1 %v2965_v12 }
  0xaf   :  { %2703 = vmatpush3.bf16.msra.mxu0 %v2964_v11 }
  0xb0   :  { %2704 = vmatprep.subr.bf16.mxu0 %v2967_v14 }
  0xb1   :  { %2725 = vmatpush3.bf16.msra.mxu1 %v2966_v13 }
  0xb2   :  { %2726 = vmatprep.subr.bf16.mxu1 %v2969_v16 }
  0xb3   :  { %2705 = vmatpush3.bf16.msra.mxu0 %v2968_v15 }
  0xb4   :  { %2706 = vmatprep.subr.bf16.mxu0 %v2971_v18 }
  0xb5   :  { %2727 = vmatpush3.bf16.msra.mxu1 %v2970_v17 }
  0xb6   :  { %2728 = vmatprep.subr.bf16.mxu1 %v2973_v20 }
  0xb7   :  { %2707 = vmatpush3.bf16.msra.mxu0 %v2972_v19 }
  0xb8   :  { %2708 = vmatprep.subr.bf16.mxu0 %v2975_v22 }
  0xb9   :  { %2729 = vmatpush3.bf16.msra.mxu1 %v2974_v21 }
  0xba   :  { %2730 = vmatprep.subr.bf16.mxu1 %v2977_v24 }
  0xbb   :  { %2709 = vmatpush3.bf16.msra.mxu0 %v2976_v23 }
  0xbc   :  { %2710 = vmatprep.subr.bf16.mxu0 %v2979_v26 }
  0xbd   :  { %2731 = vmatpush3.bf16.msra.mxu1 %v2978_v25 }
  0xbe   :  { %2732 = vmatprep.subr.bf16.mxu1 %v2981_v28 }
  0xbf   :  { %2711 = vmatpush3.bf16.msra.mxu0 %v2980_v27 }
  0xc0   :  { %2749 = vmatprep.subr.bf16.mxu0 %v2996_v34 }
  0xc1   :  { %2733 = vmatpush3.bf16.msra.mxu1 %v2984_v32 }
  0xc2   :  { %2156 = vmatmul.mubr.bf16.vlgmr.msra.gmra.mxu0 %v2271_v30 }
  0xc3   :  { %2750 = vmatpush3.bf16.msra.mxu0 %v2987_v37  ;;  %2765 = vmatprep.mubr.msk.bf16.mxu0 %vm2997_vm0, %v2996_v34 }
  0xc4   :  { %2196 = vmatmul.mubr.bf16.vlgmr.msra.gmra.mxu1 %v2273_v35  ;;  %2751 = vmatprep.subr.bf16.mxu0 %v2996_v34 }
  0xc7   :  { %2752 = vmatpush3.bf16.msra.mxu0 %v2988_v38 }
  0xc8   :  { %2753 = vmatprep.subr.bf16.mxu0 %v2996_v34 }
  0xcb   :  { %2754 = vmatpush3.bf16.msra.mxu0 %v2989_v39 }
  0xcc   :  { %2755 = vmatprep.subr.bf16.mxu0 %v2996_v34 }
  0xcf   :  { %2756 = vmatpush3.bf16.msra.mxu0 %v2990_v40 }
  0xd0   :  { %2757 = vmatprep.subr.bf16.mxu0 %v2996_v34 }
  0xd3   :  { %2758 = vmatpush3.bf16.msra.mxu0 %v2991_v41 }
  0xd4   :  { %2759 = vmatprep.subr.bf16.mxu0 %v2996_v34 }
  0xd7   :  { %2760 = vmatpush3.bf16.msra.mxu0 %v2992_v42 }
  0xd8   :  { %2761 = vmatprep.subr.bf16.mxu0 %v2996_v34 }
  0xdb   :  { %2762 = vmatpush3.bf16.msra.mxu0 %v2993_v43 }
  0xdc   :  { %2763 = vmatprep.subr.bf16.mxu0 %v2996_v34 }
  0xdf   :  { %2764 = vmatpush3.bf16.msra.mxu0 %v2994_v44 }
  0xe2   :  { %v2492_v46 = vpop.f32.mrf.mxu0  ;;  %2766 = vmatmul.mubr.bf16.vlgmr.msra.gmra.mxu0 %v2995_v45 }
  0xe4   :  { %v2493_v48 = vpop.f32.mrf.mxu0  ;;  %v2514_v49 = vpop.f32.mrf.mxu1 }
  0xe5   :  { %v2494_v50 = vadd.f32 %v2493_v48, %v2492_v46 }
  0xe6   :  { %v2495_v51 = vpop.f32.mrf.mxu0  ;;  %v2515_v52 = vpop.f32.mrf.mxu1 }
  0xe7   :  { %v1758_v53 = vadd.f32 %v2494_v50, %v2250_v47  ;;  %v2516_v54 = vadd.f32 %v2515_v52, %v2514_v49 }
  0xe8   :  { %v2496_v55 = vpop.f32.mrf.mxu0  ;;  %v2517_v56 = vpop.f32.mrf.mxu1 }
  0xe9   :  { %v1798_v57 = vadd.f32 %v2516_v54, %v1758_v53 }
  0xea   :  { %v2518_v58 = vpop.f32.mrf.mxu1 }
 0x102   :  { %v2536_v59 = vpop.f32.mrf.mxu0 }
 0x104   :  { %v2537_v60 = vpop.f32.mrf.mxu0  ;;  %v2558_v62 = vpop.f32.mrf.mxu1 }
 0x105   :  { %v2538_v61 = vadd.f32 %v2537_v60, %v2536_v59 }
 0x106   :  { %v2539_v63 = vpop.f32.mrf.mxu0  ;;  %v2559_v1 = vpop.f32.mrf.mxu1 }
 0x107   :  { %v1838_v0 = vadd.f32 %v2538_v61, %v1798_v57  ;;  %v2560_v2 = vadd.f32 %v2559_v1, %v2558_v62 }
 0x108   :  { %v2540_v3 = vpop.f32.mrf.mxu0  ;;  %v2561_v4 = vpop.f32.mrf.mxu1 }
 0x109   :  { %v1878_v5 = vadd.f32 %v2560_v2, %v1838_v0 }
 0x10a   :  { %v2562_v6 = vpop.f32.mrf.mxu1 }
 0x122   :  { %v2580_v7 = vpop.f32.mrf.mxu0 }
 0x124   :  { %v2581_v8 = vpop.f32.mrf.mxu0  ;;  %v2602_v9 = vpop.f32.mrf.mxu1 }
 0x125   :  { %v2582_v10 = vadd.f32 %v2581_v8, %v2580_v7 }
 0x126   :  { %v2583_v11 = vpop.f32.mrf.mxu0  ;;  %v2603_v12 = vpop.f32.mrf.mxu1 }
 0x127   :  { %v1918_v13 = vadd.f32 %v2582_v10, %v1878_v5  ;;  %v2604_v14 = vadd.f32 %v2603_v12, %v2602_v9 }
 0x128   :  { %v2584_v15 = vpop.f32.mrf.mxu0  ;;  %v2605_v16 = vpop.f32.mrf.mxu1 }
 0x129   :  { %v1958_v17 = vadd.f32 %v2604_v14, %v1918_v13 }
 0x12a   :  { %v2606_v18 = vpop.f32.mrf.mxu1 }
 0x142   :  { %v2624_v19 = vpop.f32.mrf.mxu0 }
 0x144   :  { %v2625_v20 = vpop.f32.mrf.mxu0  ;;  %v2646_v21 = vpop.f32.mrf.mxu1 }
 0x145   :  { %v2626_v22 = vadd.f32 %v2625_v20, %v2624_v19 }
 0x146   :  { %v2627_v23 = vpop.f32.mrf.mxu0  ;;  %v2647_v24 = vpop.f32.mrf.mxu1 }
 0x147   :  { %v1998_v25 = vadd.f32 %v2626_v22, %v1958_v17  ;;  %v2648_v26 = vadd.f32 %v2647_v24, %v2646_v21 }
 0x148   :  { %v2628_v27 = vpop.f32.mrf.mxu0  ;;  %v2649_v28 = vpop.f32.mrf.mxu1 }
 0x149   :  { %v2038_v29 = vadd.f32 %v2648_v26, %v1998_v25 }
 0x14a   :  { %v2650_v30 = vpop.f32.mrf.mxu1 }
 0x162   :  { %v2668_v31 = vpop.f32.mrf.mxu0 }
 0x164   :  { %v2669_v32 = vpop.f32.mrf.mxu0  ;;  %v2690_v33 = vpop.f32.mrf.mxu1 }
 0x165   :  { %v2670_v47 = vadd.f32 %v2669_v32, %v2668_v31 }
 0x166   :  { %v2671_v34 = vpop.f32.mrf.mxu0  ;;  %v2691_v35 = vpop.f32.mrf.mxu1 }
 0x167   :  { %v2078_v48 = vadd.f32 %v2670_v47, %v2038_v29  ;;  %v2692_v49 = vadd.f32 %v2691_v35, %v2690_v33 }
 0x168   :  { %v2672_v36 = vpop.f32.mrf.mxu0  ;;  %v2693_v37 = vpop.f32.mrf.mxu1 }
 0x169   :  { %v2118_v51 = vadd.f32 %v2692_v49, %v2078_v48 }
 0x16a   :  { %v2694_v38 = vpop.f32.mrf.mxu1 }
 0x182   :  { %v2712_v39 = vpop.f32.mrf.mxu0 }
 0x184   :  { %v2713_v40 = vpop.f32.mrf.mxu0  ;;  %v2734_v41 = vpop.f32.mrf.mxu1 }
 0x185   :  { %v2714_v50 = vadd.f32 %v2713_v40, %v2712_v39 }
 0x186   :  { %v2715_v42 = vpop.f32.mrf.mxu0  ;;  %v2735_v43 = vpop.f32.mrf.mxu1 }
 0x187   :  { %v2158_v52 = vadd.f32 %v2714_v50, %v2118_v51  ;;  %v2736_v53 = vadd.f32 %v2735_v43, %v2734_v41 }
 0x188   :  { %v2716_v44 = vpop.f32.mrf.mxu0  ;;  %v2737_v45 = vpop.f32.mrf.mxu1 }
 0x189   :  { %v2198_v54 = vadd.f32 %v2736_v53, %v2158_v52 }
 0x18a   :  { %v2738_v46 = vpop.f32.mrf.mxu1 }
 0x1a2   :  { %v2237_v55 = vpop.f32.mrf.mxu0 }
 0x1a3   :  { %v2238_v56 = vadd.f32 %v2237_v55, %v2198_v54 }
 0x1a4   :  { %v2767_v57 = vpop.f32.mrf.mxu0 }
 0x1a5   :  { %v2243_v58 = vmax.f32 %v2238_v56, 0.0 }
 0x1a6   :  { %v2240_v59 = vpop.f32.mrf.mxu0 }
 0x1a7   :  { %v2244_v60 = vpack.c.bf16 %v2243_v58, %v2243_v58 }
 0x1a8   :  { %v2768_v61 = vpop.f32.mrf.mxu0 }
 0x1a9   :  { %2245 = vst [vmem:[%s3666_s3] sm:$0xf] %v2244_v60 }

</bundles_post_ra>
